<compile_context>
chip_gen: v7x
topology: tpu7x:2x2x1
jax: 0.10.0
libtpu: 0.0.40
codegen_flags: <defaults>
</compile_context>

<pallas_src>
import functools

import jax
import jax.numpy as jnp
import numpy as np
from jax import lax
from jax.experimental import pallas as pl
from jax.experimental.pallas import tpu as pltpu

EPS = 1e-5
PAD = 128  # left/right lane pad of the depthwise scratch (one full vreg -> aligned stores)


# ------------------------------- fused kernel -------------------------------

def _fused_unit_kernel(x_ref, w1_ref, b1_ref, wdwm_ref, bdw_ref, w2_ref,
                       b2_ref, o_ref, mid_ref, *, W):
    """Whole ShuffleNetUnit (stride=1, add fusion) for one batch element.

    x_ref    : (D, Cin, HW)       input, channels on sublanes, H*W on lanes
    w1_ref   : (Cmp, Cin)         bottleneck PW weight (BN scale + shuffle folded, padded)
    b1_ref   : (Cmp, 1)           bottleneck folded bias
    wdwm_ref : (27, Cmp, HW)      depthwise taps * (kh,kw) boundary masks (BN scale folded)
    bdw_ref  : (Cmp, 1)           depthwise folded bias
    w2_ref   : (Cout, Cmp)        expand PW weight (BN scale folded, padded cols)
    b2_ref   : (Cout, 1)          expand folded bias
    o_ref    : (D, Cout, HW)      output
    mid_ref  : (D+2, Cmp, PADW)   VMEM scratch: depth- and lane-zero-padded mid activations
    """
    D, _, HW = x_ref.shape
    Cmp = w1_ref.shape[0]
    Cout = w2_ref.shape[0]

    # Zero the padded scratch (depth pad slabs + lane pads).
    mid_ref[...] = jnp.zeros_like(mid_ref)

    w1 = w1_ref[...]
    b1 = jnp.broadcast_to(b1_ref[...], (Cmp, HW))           # hoisted broadcast

    # Stage 1: grouped 1x1x1 conv (dense block-diag, shuffle + BN scale folded) + ReLU.
    for d in range(D):
        z = jnp.dot(w1, x_ref[d], preferred_element_type=jnp.float32)
        mid_ref[1 + d, :, PAD:PAD + HW] = jnp.maximum(z + b1, 0.0)

    bdw = jnp.broadcast_to(bdw_ref[...], (Cmp, HW))          # hoisted broadcasts
    w2 = w2_ref[...]
    b2 = jnp.broadcast_to(b2_ref[...], (Cout, HW))

    # Stage 2 + 3: depthwise 3x3x3 conv + BN, then expand PW + BN + shortcut + ReLU.
    for d in range(D):
        acc = jnp.zeros((Cmp, HW), jnp.float32)
        for kd in range(3):
            slab = mid_ref[d + kd]                           # (Cmp, PADW), zero padded
            for kh in range(3):
                for kw in range(3):
                    k = kd * 9 + kh * 3 + kw
                    s = (kh - 1) * W + (kw - 1)              # static lane offset
                    win = slab[:, PAD + s:PAD + s + HW]      # shifted full-vreg window
                    acc = acc + wdwm_ref[k] * win            # mask pre-folded into weight
        dw = acc + bdw
        y = jnp.dot(w2, dw, preferred_element_type=jnp.float32) + b2 + x_ref[d]
        o_ref[d] = jnp.maximum(y, 0.0)


# ------------------------------- wrapper / glue ------------------------------

def shufflenet_unit_forward(x, params):
    """x: (N, Cin, D, H, W) float32 -> (N, Cout, D, H, W)."""
    N, Cin, D, H, W = x.shape
    HW = H * W
    Cmp = params["w1"].shape[0]
    Cout = params["w2"].shape[0]
    padw = PAD + HW + PAD

    # NCDHW -> (N, D, Cin, H*W): channels on sublanes, lane-dense spatial plane.
    x_r = jnp.transpose(x, (0, 2, 1, 3, 4)).reshape(N, D, Cin, HW)

    out = pl.pallas_call(
        functools.partial(_fused_unit_kernel, W=W),
        out_shape=jax.ShapeDtypeStruct((N, D, Cout, HW), jnp.float32),
        grid=(N,),
        in_specs=[
            pl.BlockSpec((None, D, Cin, HW), lambda n: (n, 0, 0, 0)),   # x
            pl.BlockSpec((Cmp, Cin), lambda n: (0, 0)),                 # w1
            pl.BlockSpec((Cmp, 1), lambda n: (0, 0)),                   # b1
            pl.BlockSpec((27, Cmp, HW), lambda n: (0, 0, 0)),           # wdw * masks
            pl.BlockSpec((Cmp, 1), lambda n: (0, 0)),                   # b_dw
            pl.BlockSpec((Cout, Cmp), lambda n: (0, 0)),                # w2
            pl.BlockSpec((Cout, 1), lambda n: (0, 0)),                  # b2
        ],
        out_specs=pl.BlockSpec((None, D, Cout, HW), lambda n: (n, 0, 0, 0)),
        scratch_shapes=[pltpu.VMEM((D + 2, Cmp, padw), jnp.float32)],
        compiler_params=pltpu.CompilerParams(
            dimension_semantics=("parallel",)),
    )(x_r, params["w1"], params["b1"], params["wdw_masked"], params["b_dw"],
      params["w2"], params["b2"])

    return out.reshape(N, D, Cout, H, W).transpose(0, 2, 1, 3, 4)


# ------------------------------- param folding -------------------------------

def _block_diag(w_group, groups):
    """(Cout, Cin_per_group) grouped conv weight -> dense (Cout, Cin)."""
    cout, cin_pg = w_group.shape
    cout_pg = cout // groups
    dense = np.zeros((cout, cin_pg * groups), np.float32)
    for g in range(groups):
        dense[g * cout_pg:(g + 1) * cout_pg,
              g * cin_pg:(g + 1) * cin_pg] = w_group[g * cout_pg:(g + 1) * cout_pg]
    return dense


def make_params(raw, *, groups, H, W):
    """Fold BN scales into weights, shuffle into w1 rows, masks into dw taps."""
    HW = H * W
    r = {k: np.asarray(v, np.float32) for k, v in raw.items()}
    Cm = r["w1"].shape[0]
    Cout = r["w2"].shape[0]
    Cin = r["w1"].shape[1] * groups
    Cmp = max(8, ((Cm + 7) // 8) * 8)   # pad mid channels to a full sublane group

    def fold(b, g, be, rm, rv):
        s = g / np.sqrt(rv + EPS)
        return s, (b - rm) * s + be

    s1, b1 = fold(r["b1"], r["g1"], r["be1"], r["rm1"], r["rv1"])
    sdw, bdw = fold(r["b_dw"], r["g_dw"], r["be_dw"], r["rm_dw"], r["rv_dw"])
    s2, b2 = fold(r["b2"], r["g2"], r["be2"], r["rm2"], r["rv2"])

    # Bottleneck PW: dense block-diag, BN scale folded, channel shuffle folded (row perm).
    w1 = _block_diag(r["w1"].reshape(Cm, Cin // groups), groups) * s1[:, None]
    cpg = Cm // groups
    perm = np.array([(c % groups) * cpg + c // groups for c in range(Cm)])
    w1, b1 = w1[perm], b1[perm]
    w1_p = np.zeros((Cmp, Cin), np.float32); w1_p[:Cm] = w1
    b1_p = np.zeros((Cmp, 1), np.float32);   b1_p[:Cm, 0] = b1

    # Depthwise: BN scale folded into taps; (kh,kw) boundary masks folded in too.
    wdw = r["w_dw"].reshape(Cm, 27) * sdw[:, None]
    wdw_p = np.zeros((Cmp, 27), np.float32); wdw_p[:Cm] = wdw
    bdw_p = np.zeros((Cmp, 1), np.float32);  bdw_p[:Cm, 0] = bdw

    hh = np.arange(HW) // W
    ww = np.arange(HW) % W
    masks = np.zeros((27, HW), np.float32)
    for kd in range(3):
        for kh in range(3):
            for kw in range(3):
                k = kd * 9 + kh * 3 + kw
                valid = ((hh + kh - 1 >= 0) & (hh + kh - 1 < H) &
                         (ww + kw - 1 >= 0) & (ww + kw - 1 < W))
                masks[k] = valid.astype(np.float32)
    wdw_masked = wdw_p.T[:, :, None] * masks[:, None, :]    # (27, Cmp, HW)

    # Expand PW: dense block-diag, BN scale folded, padded mid columns.
    w2 = _block_diag(r["w2"].reshape(Cout, Cm // groups), groups) * s2[:, None]
    w2_p = np.zeros((Cout, Cmp), np.float32); w2_p[:, :Cm] = w2
    b2_p = b2.reshape(Cout, 1).astype(np.float32)

    return {
        "w1": jnp.asarray(w1_p), "b1": jnp.asarray(b1_p),
        "wdw_masked": jnp.asarray(wdw_masked), "b_dw": jnp.asarray(bdw_p),
        "w2": jnp.asarray(w2_p), "b2": jnp.asarray(b2_p),
    }


# -------------------------------- pure-JAX ref --------------------------------

def ref_forward(x, raw, groups):
    dn = ("NCDHW", "OIDHW", "NCDHW")

    def bn(z, g_, b_, rm, rv):
        sh = (1, -1, 1, 1, 1)
        return ((z - rm.reshape(sh)) / jnp.sqrt(rv.reshape(sh) + EPS)
                * g_.reshape(sh) + b_.reshape(sh))

    z = lax.conv_general_dilated(x, raw["w1"], (1, 1, 1), [(0, 0)] * 3,
                                 dimension_numbers=dn, feature_group_count=groups)
    z = z + raw["b1"].reshape(1, -1, 1, 1, 1)
    z = jnp.maximum(bn(z, raw["g1"], raw["be1"], raw["rm1"], raw["rv1"]), 0.0)

    N_, Cm, D_, H_, W_ = z.shape
    z = (z.reshape(N_, groups, Cm // groups, D_, H_, W_)
         .transpose(0, 2, 1, 3, 4, 5).reshape(N_, Cm, D_, H_, W_))

    z = lax.conv_general_dilated(z, raw["w_dw"], (1, 1, 1), [(1, 1)] * 3,
                                 dimension_numbers=dn, feature_group_count=Cm)
    z = z + raw["b_dw"].reshape(1, -1, 1, 1, 1)
    z = bn(z, raw["g_dw"], raw["be_dw"], raw["rm_dw"], raw["rv_dw"])

    z = lax.conv_general_dilated(z, raw["w2"], (1, 1, 1), [(0, 0)] * 3,
                                 dimension_numbers=dn, feature_group_count=groups)
    z = z + raw["b2"].reshape(1, -1, 1, 1, 1)
    z = bn(z, raw["g2"], raw["be2"], raw["rm2"], raw["rv2"])

    return jnp.maximum(x + z, 0.0)


# ----------------------------------- main -----------------------------------

if __name__ == "__main__":
    # ShuffleNetUnit(input_channels=16, output_channels=16, stage=3, stride=1, groups=2)
    # TODO(synk): the stride!=1 / Cin!=Cout branch (AvgPool3d shortcut + concat fusion)
    #             is not implemented; this config uses the identity + add path.
    N, Cin, D, H, W = 2, 16, 4, 8, 16
    Cout, groups = 16, 2
    mid = Cout // 4  # = 4

    key = jax.random.PRNGKey(0)
    ks = jax.random.split(key, 24)

    raw = {
        # bottleneck pointwise: Conv3d(16, 4, 1, groups=2) + BN(4)
        "w1": jax.random.normal(ks[0], (mid, Cin // groups, 1, 1, 1)) * 0.3,
        "b1": jax.random.normal(ks[1], (mid,)) * 0.1,
        "g1": jax.random.uniform(ks[2], (mid,), minval=0.5, maxval=1.5),
        "be1": jax.random.normal(ks[3], (mid,)) * 0.1,
        "rm1": jax.random.normal(ks[4], (mid,)) * 0.1,
        "rv1": jax.random.uniform(ks[5], (mid,), minval=0.5, maxval=1.5),
        # depthwise: Conv3d(4, 4, 3, groups=4, stride=1, padding=1) + BN(4)
        "w_dw": jax.random.normal(ks[6], (mid, 1, 3, 3, 3)) * 0.3,
        "b_dw": jax.random.normal(ks[7], (mid,)) * 0.1,
        "g_dw": jax.random.uniform(ks[8], (mid,), minval=0.5, maxval=1.5),
        "be_dw": jax.random.normal(ks[9], (mid,)) * 0.1,
        "rm_dw": jax.random.normal(ks[10], (mid,)) * 0.1,
        "rv_dw": jax.random.uniform(ks[11], (mid,), minval=0.5, maxval=1.5),
        # expand pointwise: Conv3d(4, 16, 1, groups=2) + BN(16)
        "w2": jax.random.normal(ks[12], (Cout, mid // groups, 1, 1, 1)) * 0.3,
        "b2": jax.random.normal(ks[13], (Cout,)) * 0.1,
        "g2": jax.random.uniform(ks[14], (Cout,), minval=0.5, maxval=1.5),
        "be2": jax.random.normal(ks[15], (Cout,)) * 0.1,
        "rm2": jax.random.normal(ks[16], (Cout,)) * 0.1,
        "rv2": jax.random.uniform(ks[17], (Cout,), minval=0.5, maxval=1.5),
    }

    params = make_params(raw, groups=groups, H=H, W=W)
    x = jax.random.normal(ks[18], (N, Cin, D, H, W), dtype=jnp.float32)

    out = jax.block_until_ready(shufflenet_unit_forward(x, params))
    ref = jax.block_until_ready(ref_forward(x, raw, groups))

    assert out.shape == (N, Cout, D, H, W)
    assert np.allclose(np.asarray(out), np.asarray(ref), rtol=2e-2, atol=2e-2)

    print("KERNEL_OK")
</pallas_src>

<mosaic_0001>
module attributes {stable_mosaic.version = 11 : i64} {
  func.func @_fused_unit_kernel(%arg0: i32, %arg1: memref<1x4x16x128xf32, #tpu.memory_space<vmem>>, %arg2: memref<8x16xf32, #tpu.memory_space<vmem>>, %arg3: memref<8x1xf32, #tpu.memory_space<vmem>>, %arg4: memref<27x8x128xf32, #tpu.memory_space<vmem>>, %arg5: memref<8x1xf32, #tpu.memory_space<vmem>>, %arg6: memref<16x8xf32, #tpu.memory_space<vmem>>, %arg7: memref<16x1xf32, #tpu.memory_space<vmem>>, %arg8: memref<1x4x16x128xf32, #tpu.memory_space<vmem>>, %arg9: memref<6x8x384xf32, #tpu.memory_space<vmem>>) attributes {dimension_semantics = [#tpu.dimension_semantics<parallel>], iteration_bounds = array<i64: 2>, scalar_prefetch = 0 : i64, scratch_operands = 1 : i64, tpu.core_type = #tpu.core_type<tc>, window_params = [{transform_indices = @transform_0, window_bounds = array<i64: 1, 4, 16, 128>}, {pipeline_mode = #tpu.pipeline_mode<synchronous>, transform_indices = @transform_1, window_bounds = array<i64: 8, 16>}, {pipeline_mode = #tpu.pipeline_mode<synchronous>, transform_indices = @transform_2, window_bounds = array<i64: 8, 1>}, {pipeline_mode = #tpu.pipeline_mode<synchronous>, transform_indices = @transform_3, window_bounds = array<i64: 27, 8, 128>}, {pipeline_mode = #tpu.pipeline_mode<synchronous>, transform_indices = @transform_4, window_bounds = array<i64: 8, 1>}, {pipeline_mode = #tpu.pipeline_mode<synchronous>, transform_indices = @transform_5, window_bounds = array<i64: 16, 8>}, {pipeline_mode = #tpu.pipeline_mode<synchronous>, transform_indices = @transform_6, window_bounds = array<i64: 16, 1>}, {transform_indices = @transform_7, window_bounds = array<i64: 1, 4, 16, 128>}]} {
    %cst = arith.constant 0.000000e+00 : f32
    %0 = vector.broadcast %cst : f32 to vector<6x8x384xf32>
    %c0 = arith.constant 0 : index
    %c0_0 = arith.constant 0 : index
    %c0_1 = arith.constant 0 : index
    %1 = vector.load %arg9[%c0, %c0_0, %c0_1] : memref<6x8x384xf32, #tpu.memory_space<vmem>>, vector<6x8x384xf32>
    tpu.vector_store %arg9[%c0, %c0_0, %c0_1], %0 {strides = array<i32>} : memref<6x8x384xf32, #tpu.memory_space<vmem>>, vector<6x8x384xf32>,
    %c0_2 = arith.constant 0 : index
    %c0_3 = arith.constant 0 : index
    %2 = vector.load %arg2[%c0_2, %c0_3] : memref<8x16xf32, #tpu.memory_space<vmem>>, vector<8x16xf32>
    %c0_4 = arith.constant 0 : index
    %c0_5 = arith.constant 0 : index
    %3 = vector.load %arg3[%c0_4, %c0_5] : memref<8x1xf32, #tpu.memory_space<vmem>>, vector<8x1xf32>
    %4 = vector.shape_cast %3 : vector<8x1xf32> to vector<8x1xf32>
    %5 = vector.broadcast %4 : vector<8x1xf32> to vector<8x128xf32>
    %c0_6 = arith.constant 0 : index
    %c0_7 = arith.constant 0 : index
    %c0_8 = arith.constant 0 : index
    %c0_9 = arith.constant 0 : index
    %6 = vector.load %arg1[%c0_6, %c0_7, %c0_8, %c0_9] : memref<1x4x16x128xf32, #tpu.memory_space<vmem>>, vector<1x1x16x128xf32>
    %7 = vector.shape_cast %6 : vector<1x1x16x128xf32> to vector<16x128xf32>
    %cst_10 = arith.constant dense<0.000000e+00> : vector<8x128xf32>
    %8 = tpu.matmul %2, %7, %cst_10 {dimension_numbers = #tpu.dot_dimension_numbers<[1], [0], [0], [1], [0, 0, 1, 1], [], []>} : vector<8x16xf32>, vector<16x128xf32>, vector<8x128xf32> -> vector<8x128xf32>
    %9 = arith.addf %8, %5 : vector<8x128xf32>
    %cst_11 = arith.constant 0.000000e+00 : f32
    %10 = vector.broadcast %cst_11 : f32 to vector<8x128xf32>
    %11 = arith.maximumf %9, %10 : vector<8x128xf32>
    %c1 = arith.constant 1 : index
    %c0_12 = arith.constant 0 : index
    %c128 = arith.constant 128 : index
    %12 = vector.load %arg9[%c1, %c0_12, %c128] : memref<6x8x384xf32, #tpu.memory_space<vmem>>, vector<1x8x128xf32>
    %13 = vector.shape_cast %12 : vector<1x8x128xf32> to vector<8x128xf32>
    %14 = vector.shape_cast %11 : vector<8x128xf32> to vector<1x8x128xf32>
    tpu.vector_store %arg9[%c1, %c0_12, %c128], %14 {strides = array<i32>} : memref<6x8x384xf32, #tpu.memory_space<vmem>>, vector<1x8x128xf32>,
    %c0_13 = arith.constant 0 : index
    %c1_14 = arith.constant 1 : index
    %c0_15 = arith.constant 0 : index
    %c0_16 = arith.constant 0 : index
    %15 = vector.load %arg1[%c0_13, %c1_14, %c0_15, %c0_16] : memref<1x4x16x128xf32, #tpu.memory_space<vmem>>, vector<1x1x16x128xf32>
    %16 = vector.shape_cast %15 : vector<1x1x16x128xf32> to vector<16x128xf32>
    %cst_17 = arith.constant dense<0.000000e+00> : vector<8x128xf32>
    %17 = tpu.matmul %2, %16, %cst_17 {dimension_numbers = #tpu.dot_dimension_numbers<[1], [0], [0], [1], [0, 0, 1, 1], [], []>} : vector<8x16xf32>, vector<16x128xf32>, vector<8x128xf32> -> vector<8x128xf32>
    %18 = arith.addf %17, %5 : vector<8x128xf32>
    %cst_18 = arith.constant 0.000000e+00 : f32
    %19 = vector.broadcast %cst_18 : f32 to vector<8x128xf32>
    %20 = arith.maximumf %18, %19 : vector<8x128xf32>
    %c2 = arith.constant 2 : index
    %c0_19 = arith.constant 0 : index
    %c128_20 = arith.constant 128 : index
    %21 = vector.load %arg9[%c2, %c0_19, %c128_20] : memref<6x8x384xf32, #tpu.memory_space<vmem>>, vector<1x8x128xf32>
    %22 = vector.shape_cast %21 : vector<1x8x128xf32> to vector<8x128xf32>
    %23 = vector.shape_cast %20 : vector<8x128xf32> to vector<1x8x128xf32>
    tpu.vector_store %arg9[%c2, %c0_19, %c128_20], %23 {strides = array<i32>} : memref<6x8x384xf32, #tpu.memory_space<vmem>>, vector<1x8x128xf32>,
    %c0_21 = arith.constant 0 : index
    %c2_22 = arith.constant 2 : index
    %c0_23 = arith.constant 0 : index
    %c0_24 = arith.constant 0 : index
    %24 = vector.load %arg1[%c0_21, %c2_22, %c0_23, %c0_24] : memref<1x4x16x128xf32, #tpu.memory_space<vmem>>, vector<1x1x16x128xf32>
    %25 = vector.shape_cast %24 : vector<1x1x16x128xf32> to vector<16x128xf32>
    %cst_25 = arith.constant dense<0.000000e+00> : vector<8x128xf32>
    %26 = tpu.matmul %2, %25, %cst_25 {dimension_numbers = #tpu.dot_dimension_numbers<[1], [0], [0], [1], [0, 0, 1, 1], [], []>} : vector<8x16xf32>, vector<16x128xf32>, vector<8x128xf32> -> vector<8x128xf32>
    %27 = arith.addf %26, %5 : vector<8x128xf32>
    %cst_26 = arith.constant 0.000000e+00 : f32
    %28 = vector.broadcast %cst_26 : f32 to vector<8x128xf32>
    %29 = arith.maximumf %27, %28 : vector<8x128xf32>
    %c3 = arith.constant 3 : index
    %c0_27 = arith.constant 0 : index
    %c128_28 = arith.constant 128 : index
    %30 = vector.load %arg9[%c3, %c0_27, %c128_28] : memref<6x8x384xf32, #tpu.memory_space<vmem>>, vector<1x8x128xf32>
    %31 = vector.shape_cast %30 : vector<1x8x128xf32> to vector<8x128xf32>
    %32 = vector.shape_cast %29 : vector<8x128xf32> to vector<1x8x128xf32>
    tpu.vector_store %arg9[%c3, %c0_27, %c128_28], %32 {strides = array<i32>} : memref<6x8x384xf32, #tpu.memory_space<vmem>>, vector<1x8x128xf32>,
    %c0_29 = arith.constant 0 : index
    %c3_30 = arith.constant 3 : index
    %c0_31 = arith.constant 0 : index
    %c0_32 = arith.constant 0 : index
    %33 = vector.load %arg1[%c0_29, %c3_30, %c0_31, %c0_32] : memref<1x4x16x128xf32, #tpu.memory_space<vmem>>, vector<1x1x16x128xf32>
    %34 = vector.shape_cast %33 : vector<1x1x16x128xf32> to vector<16x128xf32>
    %cst_33 = arith.constant dense<0.000000e+00> : vector<8x128xf32>
    %35 = tpu.matmul %2, %34, %cst_33 {dimension_numbers = #tpu.dot_dimension_numbers<[1], [0], [0], [1], [0, 0, 1, 1], [], []>} : vector<8x16xf32>, vector<16x128xf32>, vector<8x128xf32> -> vector<8x128xf32>
    %36 = arith.addf %35, %5 : vector<8x128xf32>
    %cst_34 = arith.constant 0.000000e+00 : f32
    %37 = vector.broadcast %cst_34 : f32 to vector<8x128xf32>
    %38 = arith.maximumf %36, %37 : vector<8x128xf32>
    %c4 = arith.constant 4 : index
    %c0_35 = arith.constant 0 : index
    %c128_36 = arith.constant 128 : index
    %39 = vector.load %arg9[%c4, %c0_35, %c128_36] : memref<6x8x384xf32, #tpu.memory_space<vmem>>, vector<1x8x128xf32>
    %40 = vector.shape_cast %39 : vector<1x8x128xf32> to vector<8x128xf32>
    %41 = vector.shape_cast %38 : vector<8x128xf32> to vector<1x8x128xf32>
    tpu.vector_store %arg9[%c4, %c0_35, %c128_36], %41 {strides = array<i32>} : memref<6x8x384xf32, #tpu.memory_space<vmem>>, vector<1x8x128xf32>,
    %c0_37 = arith.constant 0 : index
    %c0_38 = arith.constant 0 : index
    %42 = vector.load %arg5[%c0_37, %c0_38] : memref<8x1xf32, #tpu.memory_space<vmem>>, vector<8x1xf32>
    %43 = vector.shape_cast %42 : vector<8x1xf32> to vector<8x1xf32>
    %44 = vector.broadcast %43 : vector<8x1xf32> to vector<8x128xf32>
    %c0_39 = arith.constant 0 : index
    %c0_40 = arith.constant 0 : index
    %45 = vector.load %arg6[%c0_39, %c0_40] : memref<16x8xf32, #tpu.memory_space<vmem>>, vector<16x8xf32>
    %c0_41 = arith.constant 0 : index
    %c0_42 = arith.constant 0 : index
    %46 = vector.load %arg7[%c0_41, %c0_42] : memref<16x1xf32, #tpu.memory_space<vmem>>, vector<16x1xf32>
    %47 = vector.shape_cast %46 : vector<16x1xf32> to vector<16x1xf32>
    %48 = vector.broadcast %47 : vector<16x1xf32> to vector<16x128xf32>
    %cst_43 = arith.constant 0.000000e+00 : f32
    %49 = vector.broadcast %cst_43 : f32 to vector<8x128xf32>
    %c0_44 = arith.constant 0 : index
    %c0_45 = arith.constant 0 : index
    %c0_46 = arith.constant 0 : index
    %50 = vector.load %arg9[%c0_44, %c0_45, %c0_46] : memref<6x8x384xf32, #tpu.memory_space<vmem>>, vector<1x8x384xf32>
    %51 = vector.shape_cast %50 : vector<1x8x384xf32> to vector<8x384xf32>
    %52 = vector.extract_strided_slice %51 {offsets = [0, 111], sizes = [8, 128], strides = [1, 1]} : vector<8x384xf32> to vector<8x128xf32>
    %c0_47 = arith.constant 0 : index
    %c0_48 = arith.constant 0 : index
    %c0_49 = arith.constant 0 : index
    %53 = vector.load %arg4[%c0_47, %c0_48, %c0_49] : memref<27x8x128xf32, #tpu.memory_space<vmem>>, vector<1x8x128xf32>
    %54 = vector.shape_cast %53 : vector<1x8x128xf32> to vector<8x128xf32>
    %55 = arith.mulf %54, %52 : vector<8x128xf32>
    %56 = arith.addf %49, %55 : vector<8x128xf32>
    %57 = vector.extract_strided_slice %51 {offsets = [0, 112], sizes = [8, 128], strides = [1, 1]} : vector<8x384xf32> to vector<8x128xf32>
    %c1_50 = arith.constant 1 : index
    %c0_51 = arith.constant 0 : index
    %c0_52 = arith.constant 0 : index
    %58 = vector.load %arg4[%c1_50, %c0_51, %c0_52] : memref<27x8x128xf32, #tpu.memory_space<vmem>>, vector<1x8x128xf32>
    %59 = vector.shape_cast %58 : vector<1x8x128xf32> to vector<8x128xf32>
    %60 = arith.mulf %59, %57 : vector<8x128xf32>
    %61 = arith.addf %56, %60 : vector<8x128xf32>
    %62 = vector.extract_strided_slice %51 {offsets = [0, 113], sizes = [8, 128], strides = [1, 1]} : vector<8x384xf32> to vector<8x128xf32>
    %c2_53 = arith.constant 2 : index
    %c0_54 = arith.constant 0 : index
    %c0_55 = arith.constant 0 : index
    %63 = vector.load %arg4[%c2_53, %c0_54, %c0_55] : memref<27x8x128xf32, #tpu.memory_space<vmem>>, vector<1x8x128xf32>
    %64 = vector.shape_cast %63 : vector<1x8x128xf32> to vector<8x128xf32>
    %65 = arith.mulf %64, %62 : vector<8x128xf32>
    %66 = arith.addf %61, %65 : vector<8x128xf32>
    %67 = vector.extract_strided_slice %51 {offsets = [0, 127], sizes = [8, 128], strides = [1, 1]} : vector<8x384xf32> to vector<8x128xf32>
    %c3_56 = arith.constant 3 : index
    %c0_57 = arith.constant 0 : index
    %c0_58 = arith.constant 0 : index
    %68 = vector.load %arg4[%c3_56, %c0_57, %c0_58] : memref<27x8x128xf32, #tpu.memory_space<vmem>>, vector<1x8x128xf32>
    %69 = vector.shape_cast %68 : vector<1x8x128xf32> to vector<8x128xf32>
    %70 = arith.mulf %69, %67 : vector<8x128xf32>
    %71 = arith.addf %66, %70 : vector<8x128xf32>
    %72 = vector.extract_strided_slice %51 {offsets = [0, 128], sizes = [8, 128], strides = [1, 1]} : vector<8x384xf32> to vector<8x128xf32>
    %c4_59 = arith.constant 4 : index
    %c0_60 = arith.constant 0 : index
    %c0_61 = arith.constant 0 : index
    %73 = vector.load %arg4[%c4_59, %c0_60, %c0_61] : memref<27x8x128xf32, #tpu.memory_space<vmem>>, vector<1x8x128xf32>
    %74 = vector.shape_cast %73 : vector<1x8x128xf32> to vector<8x128xf32>
    %75 = arith.mulf %74, %72 : vector<8x128xf32>
    %76 = arith.addf %71, %75 : vector<8x128xf32>
    %77 = vector.extract_strided_slice %51 {offsets = [0, 129], sizes = [8, 128], strides = [1, 1]} : vector<8x384xf32> to vector<8x128xf32>
    %c5 = arith.constant 5 : index
    %c0_62 = arith.constant 0 : index
    %c0_63 = arith.constant 0 : index
    %78 = vector.load %arg4[%c5, %c0_62, %c0_63] : memref<27x8x128xf32, #tpu.memory_space<vmem>>, vector<1x8x128xf32>
    %79 = vector.shape_cast %78 : vector<1x8x128xf32> to vector<8x128xf32>
    %80 = arith.mulf %79, %77 : vector<8x128xf32>
    %81 = arith.addf %76, %80 : vector<8x128xf32>
    %82 = vector.extract_strided_slice %51 {offsets = [0, 143], sizes = [8, 128], strides = [1, 1]} : vector<8x384xf32> to vector<8x128xf32>
    %c6 = arith.constant 6 : index
    %c0_64 = arith.constant 0 : index
    %c0_65 = arith.constant 0 : index
    %83 = vector.load %arg4[%c6, %c0_64, %c0_65] : memref<27x8x128xf32, #tpu.memory_space<vmem>>, vector<1x8x128xf32>
    %84 = vector.shape_cast %83 : vector<1x8x128xf32> to vector<8x128xf32>
    %85 = arith.mulf %84, %82 : vector<8x128xf32>
    %86 = arith.addf %81, %85 : vector<8x128xf32>
    %87 = vector.extract_strided_slice %51 {offsets = [0, 144], sizes = [8, 128], strides = [1, 1]} : vector<8x384xf32> to vector<8x128xf32>
    %c7 = arith.constant 7 : index
    %c0_66 = arith.constant 0 : index
    %c0_67 = arith.constant 0 : index
    %88 = vector.load %arg4[%c7, %c0_66, %c0_67] : memref<27x8x128xf32, #tpu.memory_space<vmem>>, vector<1x8x128xf32>
    %89 = vector.shape_cast %88 : vector<1x8x128xf32> to vector<8x128xf32>
    %90 = arith.mulf %89, %87 : vector<8x128xf32>
    %91 = arith.addf %86, %90 : vector<8x128xf32>
    %92 = vector.extract_strided_slice %51 {offsets = [0, 145], sizes = [8, 128], strides = [1, 1]} : vector<8x384xf32> to vector<8x128xf32>
    %c8 = arith.constant 8 : index
    %c0_68 = arith.constant 0 : index
    %c0_69 = arith.constant 0 : index
    %93 = vector.load %arg4[%c8, %c0_68, %c0_69] : memref<27x8x128xf32, #tpu.memory_space<vmem>>, vector<1x8x128xf32>
    %94 = vector.shape_cast %93 : vector<1x8x128xf32> to vector<8x128xf32>
    %95 = arith.mulf %94, %92 : vector<8x128xf32>
    %96 = arith.addf %91, %95 : vector<8x128xf32>
    %c1_70 = arith.constant 1 : index
    %c0_71 = arith.constant 0 : index
    %c0_72 = arith.constant 0 : index
    %97 = vector.load %arg9[%c1_70, %c0_71, %c0_72] : memref<6x8x384xf32, #tpu.memory_space<vmem>>, vector<1x8x384xf32>
    %98 = vector.shape_cast %97 : vector<1x8x384xf32> to vector<8x384xf32>
    %99 = vector.extract_strided_slice %98 {offsets = [0, 111], sizes = [8, 128], strides = [1, 1]} : vector<8x384xf32> to vector<8x128xf32>
    %c9 = arith.constant 9 : index
    %c0_73 = arith.constant 0 : index
    %c0_74 = arith.constant 0 : index
    %100 = vector.load %arg4[%c9, %c0_73, %c0_74] : memref<27x8x128xf32, #tpu.memory_space<vmem>>, vector<1x8x128xf32>
    %101 = vector.shape_cast %100 : vector<1x8x128xf32> to vector<8x128xf32>
    %102 = arith.mulf %101, %99 : vector<8x128xf32>
    %103 = arith.addf %96, %102 : vector<8x128xf32>
    %104 = vector.extract_strided_slice %98 {offsets = [0, 112], sizes = [8, 128], strides = [1, 1]} : vector<8x384xf32> to vector<8x128xf32>
    %c10 = arith.constant 10 : index
    %c0_75 = arith.constant 0 : index
    %c0_76 = arith.constant 0 : index
    %105 = vector.load %arg4[%c10, %c0_75, %c0_76] : memref<27x8x128xf32, #tpu.memory_space<vmem>>, vector<1x8x128xf32>
    %106 = vector.shape_cast %105 : vector<1x8x128xf32> to vector<8x128xf32>
    %107 = arith.mulf %106, %104 : vector<8x128xf32>
    %108 = arith.addf %103, %107 : vector<8x128xf32>
    %109 = vector.extract_strided_slice %98 {offsets = [0, 113], sizes = [8, 128], strides = [1, 1]} : vector<8x384xf32> to vector<8x128xf32>
    %c11 = arith.constant 11 : index
    %c0_77 = arith.constant 0 : index
    %c0_78 = arith.constant 0 : index
    %110 = vector.load %arg4[%c11, %c0_77, %c0_78] : memref<27x8x128xf32, #tpu.memory_space<vmem>>, vector<1x8x128xf32>
    %111 = vector.shape_cast %110 : vector<1x8x128xf32> to vector<8x128xf32>
    %112 = arith.mulf %111, %109 : vector<8x128xf32>
    %113 = arith.addf %108, %112 : vector<8x128xf32>
    %114 = vector.extract_strided_slice %98 {offsets = [0, 127], sizes = [8, 128], strides = [1, 1]} : vector<8x384xf32> to vector<8x128xf32>
    %c12 = arith.constant 12 : index
    %c0_79 = arith.constant 0 : index
    %c0_80 = arith.constant 0 : index
    %115 = vector.load %arg4[%c12, %c0_79, %c0_80] : memref<27x8x128xf32, #tpu.memory_space<vmem>>, vector<1x8x128xf32>
    %116 = vector.shape_cast %115 : vector<1x8x128xf32> to vector<8x128xf32>
    %117 = arith.mulf %116, %114 : vector<8x128xf32>
    %118 = arith.addf %113, %117 : vector<8x128xf32>
    %119 = vector.extract_strided_slice %98 {offsets = [0, 128], sizes = [8, 128], strides = [1, 1]} : vector<8x384xf32> to vector<8x128xf32>
    %c13 = arith.constant 13 : index
    %c0_81 = arith.constant 0 : index
    %c0_82 = arith.constant 0 : index
    %120 = vector.load %arg4[%c13, %c0_81, %c0_82] : memref<27x8x128xf32, #tpu.memory_space<vmem>>, vector<1x8x128xf32>
    %121 = vector.shape_cast %120 : vector<1x8x128xf32> to vector<8x128xf32>
    %122 = arith.mulf %121, %119 : vector<8x128xf32>
    %123 = arith.addf %118, %122 : vector<8x128xf32>
    %124 = vector.extract_strided_slice %98 {offsets = [0, 129], sizes = [8, 128], strides = [1, 1]} : vector<8x384xf32> to vector<8x128xf32>
    %c14 = arith.constant 14 : index
    %c0_83 = arith.constant 0 : index
    %c0_84 = arith.constant 0 : index
    %125 = vector.load %arg4[%c14, %c0_83, %c0_84] : memref<27x8x128xf32, #tpu.memory_space<vmem>>, vector<1x8x128xf32>
    %126 = vector.shape_cast %125 : vector<1x8x128xf32> to vector<8x128xf32>
    %127 = arith.mulf %126, %124 : vector<8x128xf32>
    %128 = arith.addf %123, %127 : vector<8x128xf32>
    %129 = vector.extract_strided_slice %98 {offsets = [0, 143], sizes = [8, 128], strides = [1, 1]} : vector<8x384xf32> to vector<8x128xf32>
    %c15 = arith.constant 15 : index
    %c0_85 = arith.constant 0 : index
    %c0_86 = arith.constant 0 : index
    %130 = vector.load %arg4[%c15, %c0_85, %c0_86] : memref<27x8x128xf32, #tpu.memory_space<vmem>>, vector<1x8x128xf32>
    %131 = vector.shape_cast %130 : vector<1x8x128xf32> to vector<8x128xf32>
    %132 = arith.mulf %131, %129 : vector<8x128xf32>
    %133 = arith.addf %128, %132 : vector<8x128xf32>
    %134 = vector.extract_strided_slice %98 {offsets = [0, 144], sizes = [8, 128], strides = [1, 1]} : vector<8x384xf32> to vector<8x128xf32>
    %c16 = arith.constant 16 : index
    %c0_87 = arith.constant 0 : index
    %c0_88 = arith.constant 0 : index
    %135 = vector.load %arg4[%c16, %c0_87, %c0_88] : memref<27x8x128xf32, #tpu.memory_space<vmem>>, vector<1x8x128xf32>
    %136 = vector.shape_cast %135 : vector<1x8x128xf32> to vector<8x128xf32>
    %137 = arith.mulf %136, %134 : vector<8x128xf32>
    %138 = arith.addf %133, %137 : vector<8x128xf32>
    %139 = vector.extract_strided_slice %98 {offsets = [0, 145], sizes = [8, 128], strides = [1, 1]} : vector<8x384xf32> to vector<8x128xf32>
    %c17 = arith.constant 17 : index
    %c0_89 = arith.constant 0 : index
    %c0_90 = arith.constant 0 : index
    %140 = vector.load %arg4[%c17, %c0_89, %c0_90] : memref<27x8x128xf32, #tpu.memory_space<vmem>>, vector<1x8x128xf32>
    %141 = vector.shape_cast %140 : vector<1x8x128xf32> to vector<8x128xf32>
    %142 = arith.mulf %141, %139 : vector<8x128xf32>
    %143 = arith.addf %138, %142 : vector<8x128xf32>
    %c2_91 = arith.constant 2 : index
    %c0_92 = arith.constant 0 : index
    %c0_93 = arith.constant 0 : index
    %144 = vector.load %arg9[%c2_91, %c0_92, %c0_93] : memref<6x8x384xf32, #tpu.memory_space<vmem>>, vector<1x8x384xf32>
    %145 = vector.shape_cast %144 : vector<1x8x384xf32> to vector<8x384xf32>
    %146 = vector.extract_strided_slice %145 {offsets = [0, 111], sizes = [8, 128], strides = [1, 1]} : vector<8x384xf32> to vector<8x128xf32>
    %c18 = arith.constant 18 : index
    %c0_94 = arith.constant 0 : index
    %c0_95 = arith.constant 0 : index
    %147 = vector.load %arg4[%c18, %c0_94, %c0_95] : memref<27x8x128xf32, #tpu.memory_space<vmem>>, vector<1x8x128xf32>
    %148 = vector.shape_cast %147 : vector<1x8x128xf32> to vector<8x128xf32>
    %149 = arith.mulf %148, %146 : vector<8x128xf32>
    %150 = arith.addf %143, %149 : vector<8x128xf32>
    %151 = vector.extract_strided_slice %145 {offsets = [0, 112], sizes = [8, 128], strides = [1, 1]} : vector<8x384xf32> to vector<8x128xf32>
    %c19 = arith.constant 19 : index
    %c0_96 = arith.constant 0 : index
    %c0_97 = arith.constant 0 : index
    %152 = vector.load %arg4[%c19, %c0_96, %c0_97] : memref<27x8x128xf32, #tpu.memory_space<vmem>>, vector<1x8x128xf32>
    %153 = vector.shape_cast %152 : vector<1x8x128xf32> to vector<8x128xf32>
    %154 = arith.mulf %153, %151 : vector<8x128xf32>
    %155 = arith.addf %150, %154 : vector<8x128xf32>
    %156 = vector.extract_strided_slice %145 {offsets = [0, 113], sizes = [8, 128], strides = [1, 1]} : vector<8x384xf32> to vector<8x128xf32>
    %c20 = arith.constant 20 : index
    %c0_98 = arith.constant 0 : index
    %c0_99 = arith.constant 0 : index
    %157 = vector.load %arg4[%c20, %c0_98, %c0_99] : memref<27x8x128xf32, #tpu.memory_space<vmem>>, vector<1x8x128xf32>
    %158 = vector.shape_cast %157 : vector<1x8x128xf32> to vector<8x128xf32>
    %159 = arith.mulf %158, %156 : vector<8x128xf32>
    %160 = arith.addf %155, %159 : vector<8x128xf32>
    %161 = vector.extract_strided_slice %145 {offsets = [0, 127], sizes = [8, 128], strides = [1, 1]} : vector<8x384xf32> to vector<8x128xf32>
    %c21 = arith.constant 21 : index
    %c0_100 = arith.constant 0 : index
    %c0_101 = arith.constant 0 : index
    %162 = vector.load %arg4[%c21, %c0_100, %c0_101] : memref<27x8x128xf32, #tpu.memory_space<vmem>>, vector<1x8x128xf32>
    %163 = vector.shape_cast %162 : vector<1x8x128xf32> to vector<8x128xf32>
    %164 = arith.mulf %163, %161 : vector<8x128xf32>
    %165 = arith.addf %160, %164 : vector<8x128xf32>
    %166 = vector.extract_strided_slice %145 {offsets = [0, 128], sizes = [8, 128], strides = [1, 1]} : vector<8x384xf32> to vector<8x128xf32>
    %c22 = arith.constant 22 : index
    %c0_102 = arith.constant 0 : index
    %c0_103 = arith.constant 0 : index
    %167 = vector.load %arg4[%c22, %c0_102, %c0_103] : memref<27x8x128xf32, #tpu.memory_space<vmem>>, vector<1x8x128xf32>
    %168 = vector.shape_cast %167 : vector<1x8x128xf32> to vector<8x128xf32>
    %169 = arith.mulf %168, %166 : vector<8x128xf32>
    %170 = arith.addf %165, %169 : vector<8x128xf32>
    %171 = vector.extract_strided_slice %145 {offsets = [0, 129], sizes = [8, 128], strides = [1, 1]} : vector<8x384xf32> to vector<8x128xf32>
    %c23 = arith.constant 23 : index
    %c0_104 = arith.constant 0 : index
    %c0_105 = arith.constant 0 : index
    %172 = vector.load %arg4[%c23, %c0_104, %c0_105] : memref<27x8x128xf32, #tpu.memory_space<vmem>>, vector<1x8x128xf32>
    %173 = vector.shape_cast %172 : vector<1x8x128xf32> to vector<8x128xf32>
    %174 = arith.mulf %173, %171 : vector<8x128xf32>
    %175 = arith.addf %170, %174 : vector<8x128xf32>
    %176 = vector.extract_strided_slice %145 {offsets = [0, 143], sizes = [8, 128], strides = [1, 1]} : vector<8x384xf32> to vector<8x128xf32>
    %c24 = arith.constant 24 : index
    %c0_106 = arith.constant 0 : index
    %c0_107 = arith.constant 0 : index
    %177 = vector.load %arg4[%c24, %c0_106, %c0_107] : memref<27x8x128xf32, #tpu.memory_space<vmem>>, vector<1x8x128xf32>
    %178 = vector.shape_cast %177 : vector<1x8x128xf32> to vector<8x128xf32>
    %179 = arith.mulf %178, %176 : vector<8x128xf32>
    %180 = arith.addf %175, %179 : vector<8x128xf32>
    %181 = vector.extract_strided_slice %145 {offsets = [0, 144], sizes = [8, 128], strides = [1, 1]} : vector<8x384xf32> to vector<8x128xf32>
    %c25 = arith.constant 25 : index
    %c0_108 = arith.constant 0 : index
    %c0_109 = arith.constant 0 : index
    %182 = vector.load %arg4[%c25, %c0_108, %c0_109] : memref<27x8x128xf32, #tpu.memory_space<vmem>>, vector<1x8x128xf32>
    %183 = vector.shape_cast %182 : vector<1x8x128xf32> to vector<8x128xf32>
    %184 = arith.mulf %183, %181 : vector<8x128xf32>
    %185 = arith.addf %180, %184 : vector<8x128xf32>
    %186 = vector.extract_strided_slice %145 {offsets = [0, 145], sizes = [8, 128], strides = [1, 1]} : vector<8x384xf32> to vector<8x128xf32>
    %c26 = arith.constant 26 : index
    %c0_110 = arith.constant 0 : index
    %c0_111 = arith.constant 0 : index
    %187 = vector.load %arg4[%c26, %c0_110, %c0_111] : memref<27x8x128xf32, #tpu.memory_space<vmem>>, vector<1x8x128xf32>
    %188 = vector.shape_cast %187 : vector<1x8x128xf32> to vector<8x128xf32>
    %189 = arith.mulf %188, %186 : vector<8x128xf32>
    %190 = arith.addf %185, %189 : vector<8x128xf32>
    %191 = arith.addf %190, %44 : vector<8x128xf32>
    %cst_112 = arith.constant dense<0.000000e+00> : vector<16x128xf32>
    %192 = tpu.matmul %45, %191, %cst_112 {dimension_numbers = #tpu.dot_dimension_numbers<[1], [0], [0], [1], [0, 0, 1, 1], [], []>} : vector<16x8xf32>, vector<8x128xf32>, vector<16x128xf32> -> vector<16x128xf32>
    %193 = arith.addf %192, %48 : vector<16x128xf32>
    %c0_113 = arith.constant 0 : index
    %c0_114 = arith.constant 0 : index
    %c0_115 = arith.constant 0 : index
    %c0_116 = arith.constant 0 : index
    %194 = vector.load %arg1[%c0_113, %c0_114, %c0_115, %c0_116] : memref<1x4x16x128xf32, #tpu.memory_space<vmem>>, vector<1x1x16x128xf32>
    %195 = vector.shape_cast %194 : vector<1x1x16x128xf32> to vector<16x128xf32>
    %196 = arith.addf %193, %195 : vector<16x128xf32>
    %cst_117 = arith.constant 0.000000e+00 : f32
    %197 = vector.broadcast %cst_117 : f32 to vector<16x128xf32>
    %198 = arith.maximumf %196, %197 : vector<16x128xf32>
    %c0_118 = arith.constant 0 : index
    %c0_119 = arith.constant 0 : index
    %c0_120 = arith.constant 0 : index
    %c0_121 = arith.constant 0 : index
    %199 = vector.load %arg8[%c0_118, %c0_119, %c0_120, %c0_121] : memref<1x4x16x128xf32, #tpu.memory_space<vmem>>, vector<1x1x16x128xf32>
    %200 = vector.shape_cast %199 : vector<1x1x16x128xf32> to vector<16x128xf32>
    %201 = vector.shape_cast %198 : vector<16x128xf32> to vector<1x1x16x128xf32>
    tpu.vector_store %arg8[%c0_118, %c0_119, %c0_120, %c0_121], %201 {strides = array<i32>} : memref<1x4x16x128xf32, #tpu.memory_space<vmem>>, vector<1x1x16x128xf32>,
    %cst_122 = arith.constant 0.000000e+00 : f32
    %202 = vector.broadcast %cst_122 : f32 to vector<8x128xf32>
    %c1_123 = arith.constant 1 : index
    %c0_124 = arith.constant 0 : index
    %c0_125 = arith.constant 0 : index
    %203 = vector.load %arg9[%c1_123, %c0_124, %c0_125] : memref<6x8x384xf32, #tpu.memory_space<vmem>>, vector<1x8x384xf32>
    %204 = vector.shape_cast %203 : vector<1x8x384xf32> to vector<8x384xf32>
    %205 = vector.extract_strided_slice %204 {offsets = [0, 111], sizes = [8, 128], strides = [1, 1]} : vector<8x384xf32> to vector<8x128xf32>
    %c0_126 = arith.constant 0 : index
    %c0_127 = arith.constant 0 : index
    %c0_128 = arith.constant 0 : index
    %206 = vector.load %arg4[%c0_126, %c0_127, %c0_128] : memref<27x8x128xf32, #tpu.memory_space<vmem>>, vector<1x8x128xf32>
    %207 = vector.shape_cast %206 : vector<1x8x128xf32> to vector<8x128xf32>
    %208 = arith.mulf %207, %205 : vector<8x128xf32>
    %209 = arith.addf %202, %208 : vector<8x128xf32>
    %210 = vector.extract_strided_slice %204 {offsets = [0, 112], sizes = [8, 128], strides = [1, 1]} : vector<8x384xf32> to vector<8x128xf32>
    %c1_129 = arith.constant 1 : index
    %c0_130 = arith.constant 0 : index
    %c0_131 = arith.constant 0 : index
    %211 = vector.load %arg4[%c1_129, %c0_130, %c0_131] : memref<27x8x128xf32, #tpu.memory_space<vmem>>, vector<1x8x128xf32>
    %212 = vector.shape_cast %211 : vector<1x8x128xf32> to vector<8x128xf32>
    %213 = arith.mulf %212, %210 : vector<8x128xf32>
    %214 = arith.addf %209, %213 : vector<8x128xf32>
    %215 = vector.extract_strided_slice %204 {offsets = [0, 113], sizes = [8, 128], strides = [1, 1]} : vector<8x384xf32> to vector<8x128xf32>
    %c2_132 = arith.constant 2 : index
    %c0_133 = arith.constant 0 : index
    %c0_134 = arith.constant 0 : index
    %216 = vector.load %arg4[%c2_132, %c0_133, %c0_134] : memref<27x8x128xf32, #tpu.memory_space<vmem>>, vector<1x8x128xf32>
    %217 = vector.shape_cast %216 : vector<1x8x128xf32> to vector<8x128xf32>
    %218 = arith.mulf %217, %215 : vector<8x128xf32>
    %219 = arith.addf %214, %218 : vector<8x128xf32>
    %220 = vector.extract_strided_slice %204 {offsets = [0, 127], sizes = [8, 128], strides = [1, 1]} : vector<8x384xf32> to vector<8x128xf32>
    %c3_135 = arith.constant 3 : index
    %c0_136 = arith.constant 0 : index
    %c0_137 = arith.constant 0 : index
    %221 = vector.load %arg4[%c3_135, %c0_136, %c0_137] : memref<27x8x128xf32, #tpu.memory_space<vmem>>, vector<1x8x128xf32>
    %222 = vector.shape_cast %221 : vector<1x8x128xf32> to vector<8x128xf32>
    %223 = arith.mulf %222, %220 : vector<8x128xf32>
    %224 = arith.addf %219, %223 : vector<8x128xf32>
    %225 = vector.extract_strided_slice %204 {offsets = [0, 128], sizes = [8, 128], strides = [1, 1]} : vector<8x384xf32> to vector<8x128xf32>
    %c4_138 = arith.constant 4 : index
    %c0_139 = arith.constant 0 : index
    %c0_140 = arith.constant 0 : index
    %226 = vector.load %arg4[%c4_138, %c0_139, %c0_140] : memref<27x8x128xf32, #tpu.memory_space<vmem>>, vector<1x8x128xf32>
    %227 = vector.shape_cast %226 : vector<1x8x128xf32> to vector<8x128xf32>
    %228 = arith.mulf %227, %225 : vector<8x128xf32>
    %229 = arith.addf %224, %228 : vector<8x128xf32>
    %230 = vector.extract_strided_slice %204 {offsets = [0, 129], sizes = [8, 128], strides = [1, 1]} : vector<8x384xf32> to vector<8x128xf32>
    %c5_141 = arith.constant 5 : index
    %c0_142 = arith.constant 0 : index
    %c0_143 = arith.constant 0 : index
    %231 = vector.load %arg4[%c5_141, %c0_142, %c0_143] : memref<27x8x128xf32, #tpu.memory_space<vmem>>, vector<1x8x128xf32>
    %232 = vector.shape_cast %231 : vector<1x8x128xf32> to vector<8x128xf32>
    %233 = arith.mulf %232, %230 : vector<8x128xf32>
    %234 = arith.addf %229, %233 : vector<8x128xf32>
    %235 = vector.extract_strided_slice %204 {offsets = [0, 143], sizes = [8, 128], strides = [1, 1]} : vector<8x384xf32> to vector<8x128xf32>
    %c6_144 = arith.constant 6 : index
    %c0_145 = arith.constant 0 : index
    %c0_146 = arith.constant 0 : index
    %236 = vector.load %arg4[%c6_144, %c0_145, %c0_146] : memref<27x8x128xf32, #tpu.memory_space<vmem>>, vector<1x8x128xf32>
    %237 = vector.shape_cast %236 : vector<1x8x128xf32> to vector<8x128xf32>
    %238 = arith.mulf %237, %235 : vector<8x128xf32>
    %239 = arith.addf %234, %238 : vector<8x128xf32>
    %240 = vector.extract_strided_slice %204 {offsets = [0, 144], sizes = [8, 128], strides = [1, 1]} : vector<8x384xf32> to vector<8x128xf32>
    %c7_147 = arith.constant 7 : index
    %c0_148 = arith.constant 0 : index
    %c0_149 = arith.constant 0 : index
    %241 = vector.load %arg4[%c7_147, %c0_148, %c0_149] : memref<27x8x128xf32, #tpu.memory_space<vmem>>, vector<1x8x128xf32>
    %242 = vector.shape_cast %241 : vector<1x8x128xf32> to vector<8x128xf32>
    %243 = arith.mulf %242, %240 : vector<8x128xf32>
    %244 = arith.addf %239, %243 : vector<8x128xf32>
    %245 = vector.extract_strided_slice %204 {offsets = [0, 145], sizes = [8, 128], strides = [1, 1]} : vector<8x384xf32> to vector<8x128xf32>
    %c8_150 = arith.constant 8 : index
    %c0_151 = arith.constant 0 : index
    %c0_152 = arith.constant 0 : index
    %246 = vector.load %arg4[%c8_150, %c0_151, %c0_152] : memref<27x8x128xf32, #tpu.memory_space<vmem>>, vector<1x8x128xf32>
    %247 = vector.shape_cast %246 : vector<1x8x128xf32> to vector<8x128xf32>
    %248 = arith.mulf %247, %245 : vector<8x128xf32>
    %249 = arith.addf %244, %248 : vector<8x128xf32>
    %c2_153 = arith.constant 2 : index
    %c0_154 = arith.constant 0 : index
    %c0_155 = arith.constant 0 : index
    %250 = vector.load %arg9[%c2_153, %c0_154, %c0_155] : memref<6x8x384xf32, #tpu.memory_space<vmem>>, vector<1x8x384xf32>
    %251 = vector.shape_cast %250 : vector<1x8x384xf32> to vector<8x384xf32>
    %252 = vector.extract_strided_slice %251 {offsets = [0, 111], sizes = [8, 128], strides = [1, 1]} : vector<8x384xf32> to vector<8x128xf32>
    %c9_156 = arith.constant 9 : index
    %c0_157 = arith.constant 0 : index
    %c0_158 = arith.constant 0 : index
    %253 = vector.load %arg4[%c9_156, %c0_157, %c0_158] : memref<27x8x128xf32, #tpu.memory_space<vmem>>, vector<1x8x128xf32>
    %254 = vector.shape_cast %253 : vector<1x8x128xf32> to vector<8x128xf32>
    %255 = arith.mulf %254, %252 : vector<8x128xf32>
    %256 = arith.addf %249, %255 : vector<8x128xf32>
    %257 = vector.extract_strided_slice %251 {offsets = [0, 112], sizes = [8, 128], strides = [1, 1]} : vector<8x384xf32> to vector<8x128xf32>
    %c10_159 = arith.constant 10 : index
    %c0_160 = arith.constant 0 : index
    %c0_161 = arith.constant 0 : index
    %258 = vector.load %arg4[%c10_159, %c0_160, %c0_161] : memref<27x8x128xf32, #tpu.memory_space<vmem>>, vector<1x8x128xf32>
    %259 = vector.shape_cast %258 : vector<1x8x128xf32> to vector<8x128xf32>
    %260 = arith.mulf %259, %257 : vector<8x128xf32>
    %261 = arith.addf %256, %260 : vector<8x128xf32>
    %262 = vector.extract_strided_slice %251 {offsets = [0, 113], sizes = [8, 128], strides = [1, 1]} : vector<8x384xf32> to vector<8x128xf32>
    %c11_162 = arith.constant 11 : index
    %c0_163 = arith.constant 0 : index
    %c0_164 = arith.constant 0 : index
    %263 = vector.load %arg4[%c11_162, %c0_163, %c0_164] : memref<27x8x128xf32, #tpu.memory_space<vmem>>, vector<1x8x128xf32>
    %264 = vector.shape_cast %263 : vector<1x8x128xf32> to vector<8x128xf32>
    %265 = arith.mulf %264, %262 : vector<8x128xf32>
    %266 = arith.addf %261, %265 : vector<8x128xf32>
    %267 = vector.extract_strided_slice %251 {offsets = [0, 127], sizes = [8, 128], strides = [1, 1]} : vector<8x384xf32> to vector<8x128xf32>
    %c12_165 = arith.constant 12 : index
    %c0_166 = arith.constant 0 : index
    %c0_167 = arith.constant 0 : index
    %268 = vector.load %arg4[%c12_165, %c0_166, %c0_167] : memref<27x8x128xf32, #tpu.memory_space<vmem>>, vector<1x8x128xf32>
    %269 = vector.shape_cast %268 : vector<1x8x128xf32> to vector<8x128xf32>
    %270 = arith.mulf %269, %267 : vector<8x128xf32>
    %271 = arith.addf %266, %270 : vector<8x128xf32>
    %272 = vector.extract_strided_slice %251 {offsets = [0, 128], sizes = [8, 128], strides = [1, 1]} : vector<8x384xf32> to vector<8x128xf32>
    %c13_168 = arith.constant 13 : index
    %c0_169 = arith.constant 0 : index
    %c0_170 = arith.constant 0 : index
    %273 = vector.load %arg4[%c13_168, %c0_169, %c0_170] : memref<27x8x128xf32, #tpu.memory_space<vmem>>, vector<1x8x128xf32>
    %274 = vector.shape_cast %273 : vector<1x8x128xf32> to vector<8x128xf32>
    %275 = arith.mulf %274, %272 : vector<8x128xf32>
    %276 = arith.addf %271, %275 : vector<8x128xf32>
    %277 = vector.extract_strided_slice %251 {offsets = [0, 129], sizes = [8, 128], strides = [1, 1]} : vector<8x384xf32> to vector<8x128xf32>
    %c14_171 = arith.constant 14 : index
    %c0_172 = arith.constant 0 : index
    %c0_173 = arith.constant 0 : index
    %278 = vector.load %arg4[%c14_171, %c0_172, %c0_173] : memref<27x8x128xf32, #tpu.memory_space<vmem>>, vector<1x8x128xf32>
    %279 = vector.shape_cast %278 : vector<1x8x128xf32> to vector<8x128xf32>
    %280 = arith.mulf %279, %277 : vector<8x128xf32>
    %281 = arith.addf %276, %280 : vector<8x128xf32>
    %282 = vector.extract_strided_slice %251 {offsets = [0, 143], sizes = [8, 128], strides = [1, 1]} : vector<8x384xf32> to vector<8x128xf32>
    %c15_174 = arith.constant 15 : index
    %c0_175 = arith.constant 0 : index
    %c0_176 = arith.constant 0 : index
    %283 = vector.load %arg4[%c15_174, %c0_175, %c0_176] : memref<27x8x128xf32, #tpu.memory_space<vmem>>, vector<1x8x128xf32>
    %284 = vector.shape_cast %283 : vector<1x8x128xf32> to vector<8x128xf32>
    %285 = arith.mulf %284, %282 : vector<8x128xf32>
    %286 = arith.addf %281, %285 : vector<8x128xf32>
    %287 = vector.extract_strided_slice %251 {offsets = [0, 144], sizes = [8, 128], strides = [1, 1]} : vector<8x384xf32> to vector<8x128xf32>
    %c16_177 = arith.constant 16 : index
    %c0_178 = arith.constant 0 : index
    %c0_179 = arith.constant 0 : index
    %288 = vector.load %arg4[%c16_177, %c0_178, %c0_179] : memref<27x8x128xf32, #tpu.memory_space<vmem>>, vector<1x8x128xf32>
    %289 = vector.shape_cast %288 : vector<1x8x128xf32> to vector<8x128xf32>
    %290 = arith.mulf %289, %287 : vector<8x128xf32>
    %291 = arith.addf %286, %290 : vector<8x128xf32>
    %292 = vector.extract_strided_slice %251 {offsets = [0, 145], sizes = [8, 128], strides = [1, 1]} : vector<8x384xf32> to vector<8x128xf32>
    %c17_180 = arith.constant 17 : index
    %c0_181 = arith.constant 0 : index
    %c0_182 = arith.constant 0 : index
    %293 = vector.load %arg4[%c17_180, %c0_181, %c0_182] : memref<27x8x128xf32, #tpu.memory_space<vmem>>, vector<1x8x128xf32>
    %294 = vector.shape_cast %293 : vector<1x8x128xf32> to vector<8x128xf32>
    %295 = arith.mulf %294, %292 : vector<8x128xf32>
    %296 = arith.addf %291, %295 : vector<8x128xf32>
    %c3_183 = arith.constant 3 : index
    %c0_184 = arith.constant 0 : index
    %c0_185 = arith.constant 0 : index
    %297 = vector.load %arg9[%c3_183, %c0_184, %c0_185] : memref<6x8x384xf32, #tpu.memory_space<vmem>>, vector<1x8x384xf32>
    %298 = vector.shape_cast %297 : vector<1x8x384xf32> to vector<8x384xf32>
    %299 = vector.extract_strided_slice %298 {offsets = [0, 111], sizes = [8, 128], strides = [1, 1]} : vector<8x384xf32> to vector<8x128xf32>
    %c18_186 = arith.constant 18 : index
    %c0_187 = arith.constant 0 : index
    %c0_188 = arith.constant 0 : index
    %300 = vector.load %arg4[%c18_186, %c0_187, %c0_188] : memref<27x8x128xf32, #tpu.memory_space<vmem>>, vector<1x8x128xf32>
    %301 = vector.shape_cast %300 : vector<1x8x128xf32> to vector<8x128xf32>
    %302 = arith.mulf %301, %299 : vector<8x128xf32>
    %303 = arith.addf %296, %302 : vector<8x128xf32>
    %304 = vector.extract_strided_slice %298 {offsets = [0, 112], sizes = [8, 128], strides = [1, 1]} : vector<8x384xf32> to vector<8x128xf32>
    %c19_189 = arith.constant 19 : index
    %c0_190 = arith.constant 0 : index
    %c0_191 = arith.constant 0 : index
    %305 = vector.load %arg4[%c19_189, %c0_190, %c0_191] : memref<27x8x128xf32, #tpu.memory_space<vmem>>, vector<1x8x128xf32>
    %306 = vector.shape_cast %305 : vector<1x8x128xf32> to vector<8x128xf32>
    %307 = arith.mulf %306, %304 : vector<8x128xf32>
    %308 = arith.addf %303, %307 : vector<8x128xf32>
    %309 = vector.extract_strided_slice %298 {offsets = [0, 113], sizes = [8, 128], strides = [1, 1]} : vector<8x384xf32> to vector<8x128xf32>
    %c20_192 = arith.constant 20 : index
    %c0_193 = arith.constant 0 : index
    %c0_194 = arith.constant 0 : index
    %310 = vector.load %arg4[%c20_192, %c0_193, %c0_194] : memref<27x8x128xf32, #tpu.memory_space<vmem>>, vector<1x8x128xf32>
    %311 = vector.shape_cast %310 : vector<1x8x128xf32> to vector<8x128xf32>
    %312 = arith.mulf %311, %309 : vector<8x128xf32>
    %313 = arith.addf %308, %312 : vector<8x128xf32>
    %314 = vector.extract_strided_slice %298 {offsets = [0, 127], sizes = [8, 128], strides = [1, 1]} : vector<8x384xf32> to vector<8x128xf32>
    %c21_195 = arith.constant 21 : index
    %c0_196 = arith.constant 0 : index
    %c0_197 = arith.constant 0 : index
    %315 = vector.load %arg4[%c21_195, %c0_196, %c0_197] : memref<27x8x128xf32, #tpu.memory_space<vmem>>, vector<1x8x128xf32>
    %316 = vector.shape_cast %315 : vector<1x8x128xf32> to vector<8x128xf32>
    %317 = arith.mulf %316, %314 : vector<8x128xf32>
    %318 = arith.addf %313, %317 : vector<8x128xf32>
    %319 = vector.extract_strided_slice %298 {offsets = [0, 128], sizes = [8, 128], strides = [1, 1]} : vector<8x384xf32> to vector<8x128xf32>
    %c22_198 = arith.constant 22 : index
    %c0_199 = arith.constant 0 : index
    %c0_200 = arith.constant 0 : index
    %320 = vector.load %arg4[%c22_198, %c0_199, %c0_200] : memref<27x8x128xf32, #tpu.memory_space<vmem>>, vector<1x8x128xf32>
    %321 = vector.shape_cast %320 : vector<1x8x128xf32> to vector<8x128xf32>
    %322 = arith.mulf %321, %319 : vector<8x128xf32>
    %323 = arith.addf %318, %322 : vector<8x128xf32>
    %324 = vector.extract_strided_slice %298 {offsets = [0, 129], sizes = [8, 128], strides = [1, 1]} : vector<8x384xf32> to vector<8x128xf32>
    %c23_201 = arith.constant 23 : index
    %c0_202 = arith.constant 0 : index
    %c0_203 = arith.constant 0 : index
    %325 = vector.load %arg4[%c23_201, %c0_202, %c0_203] : memref<27x8x128xf32, #tpu.memory_space<vmem>>, vector<1x8x128xf32>
    %326 = vector.shape_cast %325 : vector<1x8x128xf32> to vector<8x128xf32>
    %327 = arith.mulf %326, %324 : vector<8x128xf32>
    %328 = arith.addf %323, %327 : vector<8x128xf32>
    %329 = vector.extract_strided_slice %298 {offsets = [0, 143], sizes = [8, 128], strides = [1, 1]} : vector<8x384xf32> to vector<8x128xf32>
    %c24_204 = arith.constant 24 : index
    %c0_205 = arith.constant 0 : index
    %c0_206 = arith.constant 0 : index
    %330 = vector.load %arg4[%c24_204, %c0_205, %c0_206] : memref<27x8x128xf32, #tpu.memory_space<vmem>>, vector<1x8x128xf32>
    %331 = vector.shape_cast %330 : vector<1x8x128xf32> to vector<8x128xf32>
    %332 = arith.mulf %331, %329 : vector<8x128xf32>
    %333 = arith.addf %328, %332 : vector<8x128xf32>
    %334 = vector.extract_strided_slice %298 {offsets = [0, 144], sizes = [8, 128], strides = [1, 1]} : vector<8x384xf32> to vector<8x128xf32>
    %c25_207 = arith.constant 25 : index
    %c0_208 = arith.constant 0 : index
    %c0_209 = arith.constant 0 : index
    %335 = vector.load %arg4[%c25_207, %c0_208, %c0_209] : memref<27x8x128xf32, #tpu.memory_space<vmem>>, vector<1x8x128xf32>
    %336 = vector.shape_cast %335 : vector<1x8x128xf32> to vector<8x128xf32>
    %337 = arith.mulf %336, %334 : vector<8x128xf32>
    %338 = arith.addf %333, %337 : vector<8x128xf32>
    %339 = vector.extract_strided_slice %298 {offsets = [0, 145], sizes = [8, 128], strides = [1, 1]} : vector<8x384xf32> to vector<8x128xf32>
    %c26_210 = arith.constant 26 : index
    %c0_211 = arith.constant 0 : index
    %c0_212 = arith.constant 0 : index
    %340 = vector.load %arg4[%c26_210, %c0_211, %c0_212] : memref<27x8x128xf32, #tpu.memory_space<vmem>>, vector<1x8x128xf32>
    %341 = vector.shape_cast %340 : vector<1x8x128xf32> to vector<8x128xf32>
    %342 = arith.mulf %341, %339 : vector<8x128xf32>
    %343 = arith.addf %338, %342 : vector<8x128xf32>
    %344 = arith.addf %343, %44 : vector<8x128xf32>
    %cst_213 = arith.constant dense<0.000000e+00> : vector<16x128xf32>
    %345 = tpu.matmul %45, %344, %cst_213 {dimension_numbers = #tpu.dot_dimension_numbers<[1], [0], [0], [1], [0, 0, 1, 1], [], []>} : vector<16x8xf32>, vector<8x128xf32>, vector<16x128xf32> -> vector<16x128xf32>
    %346 = arith.addf %345, %48 : vector<16x128xf32>
    %c0_214 = arith.constant 0 : index
    %c1_215 = arith.constant 1 : index
    %c0_216 = arith.constant 0 : index
    %c0_217 = arith.constant 0 : index
    %347 = vector.load %arg1[%c0_214, %c1_215, %c0_216, %c0_217] : memref<1x4x16x128xf32, #tpu.memory_space<vmem>>, vector<1x1x16x128xf32>
    %348 = vector.shape_cast %347 : vector<1x1x16x128xf32> to vector<16x128xf32>
    %349 = arith.addf %346, %348 : vector<16x128xf32>
    %cst_218 = arith.constant 0.000000e+00 : f32
    %350 = vector.broadcast %cst_218 : f32 to vector<16x128xf32>
    %351 = arith.maximumf %349, %350 : vector<16x128xf32>
    %c0_219 = arith.constant 0 : index
    %c1_220 = arith.constant 1 : index
    %c0_221 = arith.constant 0 : index
    %c0_222 = arith.constant 0 : index
    %352 = vector.load %arg8[%c0_219, %c1_220, %c0_221, %c0_222] : memref<1x4x16x128xf32, #tpu.memory_space<vmem>>, vector<1x1x16x128xf32>
    %353 = vector.shape_cast %352 : vector<1x1x16x128xf32> to vector<16x128xf32>
    %354 = vector.shape_cast %351 : vector<16x128xf32> to vector<1x1x16x128xf32>
    tpu.vector_store %arg8[%c0_219, %c1_220, %c0_221, %c0_222], %354 {strides = array<i32>} : memref<1x4x16x128xf32, #tpu.memory_space<vmem>>, vector<1x1x16x128xf32>,
    %cst_223 = arith.constant 0.000000e+00 : f32
    %355 = vector.broadcast %cst_223 : f32 to vector<8x128xf32>
    %c2_224 = arith.constant 2 : index
    %c0_225 = arith.constant 0 : index
    %c0_226 = arith.constant 0 : index
    %356 = vector.load %arg9[%c2_224, %c0_225, %c0_226] : memref<6x8x384xf32, #tpu.memory_space<vmem>>, vector<1x8x384xf32>
    %357 = vector.shape_cast %356 : vector<1x8x384xf32> to vector<8x384xf32>
    %358 = vector.extract_strided_slice %357 {offsets = [0, 111], sizes = [8, 128], strides = [1, 1]} : vector<8x384xf32> to vector<8x128xf32>
    %c0_227 = arith.constant 0 : index
    %c0_228 = arith.constant 0 : index
    %c0_229 = arith.constant 0 : index
    %359 = vector.load %arg4[%c0_227, %c0_228, %c0_229] : memref<27x8x128xf32, #tpu.memory_space<vmem>>, vector<1x8x128xf32>
    %360 = vector.shape_cast %359 : vector<1x8x128xf32> to vector<8x128xf32>
    %361 = arith.mulf %360, %358 : vector<8x128xf32>
    %362 = arith.addf %355, %361 : vector<8x128xf32>
    %363 = vector.extract_strided_slice %357 {offsets = [0, 112], sizes = [8, 128], strides = [1, 1]} : vector<8x384xf32> to vector<8x128xf32>
    %c1_230 = arith.constant 1 : index
    %c0_231 = arith.constant 0 : index
    %c0_232 = arith.constant 0 : index
    %364 = vector.load %arg4[%c1_230, %c0_231, %c0_232] : memref<27x8x128xf32, #tpu.memory_space<vmem>>, vector<1x8x128xf32>
    %365 = vector.shape_cast %364 : vector<1x8x128xf32> to vector<8x128xf32>
    %366 = arith.mulf %365, %363 : vector<8x128xf32>
    %367 = arith.addf %362, %366 : vector<8x128xf32>
    %368 = vector.extract_strided_slice %357 {offsets = [0, 113], sizes = [8, 128], strides = [1, 1]} : vector<8x384xf32> to vector<8x128xf32>
    %c2_233 = arith.constant 2 : index
    %c0_234 = arith.constant 0 : index
    %c0_235 = arith.constant 0 : index
    %369 = vector.load %arg4[%c2_233, %c0_234, %c0_235] : memref<27x8x128xf32, #tpu.memory_space<vmem>>, vector<1x8x128xf32>
    %370 = vector.shape_cast %369 : vector<1x8x128xf32> to vector<8x128xf32>
    %371 = arith.mulf %370, %368 : vector<8x128xf32>
    %372 = arith.addf %367, %371 : vector<8x128xf32>
    %373 = vector.extract_strided_slice %357 {offsets = [0, 127], sizes = [8, 128], strides = [1, 1]} : vector<8x384xf32> to vector<8x128xf32>
    %c3_236 = arith.constant 3 : index
    %c0_237 = arith.constant 0 : index
    %c0_238 = arith.constant 0 : index
    %374 = vector.load %arg4[%c3_236, %c0_237, %c0_238] : memref<27x8x128xf32, #tpu.memory_space<vmem>>, vector<1x8x128xf32>
    %375 = vector.shape_cast %374 : vector<1x8x128xf32> to vector<8x128xf32>
    %376 = arith.mulf %375, %373 : vector<8x128xf32>
    %377 = arith.addf %372, %376 : vector<8x128xf32>
    %378 = vector.extract_strided_slice %357 {offsets = [0, 128], sizes = [8, 128], strides = [1, 1]} : vector<8x384xf32> to vector<8x128xf32>
    %c4_239 = arith.constant 4 : index
    %c0_240 = arith.constant 0 : index
    %c0_241 = arith.constant 0 : index
    %379 = vector.load %arg4[%c4_239, %c0_240, %c0_241] : memref<27x8x128xf32, #tpu.memory_space<vmem>>, vector<1x8x128xf32>
    %380 = vector.shape_cast %379 : vector<1x8x128xf32> to vector<8x128xf32>
    %381 = arith.mulf %380, %378 : vector<8x128xf32>
    %382 = arith.addf %377, %381 : vector<8x128xf32>
    %383 = vector.extract_strided_slice %357 {offsets = [0, 129], sizes = [8, 128], strides = [1, 1]} : vector<8x384xf32> to vector<8x128xf32>
    %c5_242 = arith.constant 5 : index
    %c0_243 = arith.constant 0 : index
    %c0_244 = arith.constant 0 : index
    %384 = vector.load %arg4[%c5_242, %c0_243, %c0_244] : memref<27x8x128xf32, #tpu.memory_space<vmem>>, vector<1x8x128xf32>
    %385 = vector.shape_cast %384 : vector<1x8x128xf32> to vector<8x128xf32>
    %386 = arith.mulf %385, %383 : vector<8x128xf32>
    %387 = arith.addf %382, %386 : vector<8x128xf32>
    %388 = vector.extract_strided_slice %357 {offsets = [0, 143], sizes = [8, 128], strides = [1, 1]} : vector<8x384xf32> to vector<8x128xf32>
    %c6_245 = arith.constant 6 : index
    %c0_246 = arith.constant 0 : index
    %c0_247 = arith.constant 0 : index
    %389 = vector.load %arg4[%c6_245, %c0_246, %c0_247] : memref<27x8x128xf32, #tpu.memory_space<vmem>>, vector<1x8x128xf32>
    %390 = vector.shape_cast %389 : vector<1x8x128xf32> to vector<8x128xf32>
    %391 = arith.mulf %390, %388 : vector<8x128xf32>
    %392 = arith.addf %387, %391 : vector<8x128xf32>
    %393 = vector.extract_strided_slice %357 {offsets = [0, 144], sizes = [8, 128], strides = [1, 1]} : vector<8x384xf32> to vector<8x128xf32>
    %c7_248 = arith.constant 7 : index
    %c0_249 = arith.constant 0 : index
    %c0_250 = arith.constant 0 : index
    %394 = vector.load %arg4[%c7_248, %c0_249, %c0_250] : memref<27x8x128xf32, #tpu.memory_space<vmem>>, vector<1x8x128xf32>
    %395 = vector.shape_cast %394 : vector<1x8x128xf32> to vector<8x128xf32>
    %396 = arith.mulf %395, %393 : vector<8x128xf32>
    %397 = arith.addf %392, %396 : vector<8x128xf32>
    %398 = vector.extract_strided_slice %357 {offsets = [0, 145], sizes = [8, 128], strides = [1, 1]} : vector<8x384xf32> to vector<8x128xf32>
    %c8_251 = arith.constant 8 : index
    %c0_252 = arith.constant 0 : index
    %c0_253 = arith.constant 0 : index
    %399 = vector.load %arg4[%c8_251, %c0_252, %c0_253] : memref<27x8x128xf32, #tpu.memory_space<vmem>>, vector<1x8x128xf32>
    %400 = vector.shape_cast %399 : vector<1x8x128xf32> to vector<8x128xf32>
    %401 = arith.mulf %400, %398 : vector<8x128xf32>
    %402 = arith.addf %397, %401 : vector<8x128xf32>
    %c3_254 = arith.constant 3 : index
    %c0_255 = arith.constant 0 : index
    %c0_256 = arith.constant 0 : index
    %403 = vector.load %arg9[%c3_254, %c0_255, %c0_256] : memref<6x8x384xf32, #tpu.memory_space<vmem>>, vector<1x8x384xf32>
    %404 = vector.shape_cast %403 : vector<1x8x384xf32> to vector<8x384xf32>
    %405 = vector.extract_strided_slice %404 {offsets = [0, 111], sizes = [8, 128], strides = [1, 1]} : vector<8x384xf32> to vector<8x128xf32>
    %c9_257 = arith.constant 9 : index
    %c0_258 = arith.constant 0 : index
    %c0_259 = arith.constant 0 : index
    %406 = vector.load %arg4[%c9_257, %c0_258, %c0_259] : memref<27x8x128xf32, #tpu.memory_space<vmem>>, vector<1x8x128xf32>
    %407 = vector.shape_cast %406 : vector<1x8x128xf32> to vector<8x128xf32>
    %408 = arith.mulf %407, %405 : vector<8x128xf32>
    %409 = arith.addf %402, %408 : vector<8x128xf32>
    %410 = vector.extract_strided_slice %404 {offsets = [0, 112], sizes = [8, 128], strides = [1, 1]} : vector<8x384xf32> to vector<8x128xf32>
    %c10_260 = arith.constant 10 : index
    %c0_261 = arith.constant 0 : index
    %c0_262 = arith.constant 0 : index
    %411 = vector.load %arg4[%c10_260, %c0_261, %c0_262] : memref<27x8x128xf32, #tpu.memory_space<vmem>>, vector<1x8x128xf32>
    %412 = vector.shape_cast %411 : vector<1x8x128xf32> to vector<8x128xf32>
    %413 = arith.mulf %412, %410 : vector<8x128xf32>
    %414 = arith.addf %409, %413 : vector<8x128xf32>
    %415 = vector.extract_strided_slice %404 {offsets = [0, 113], sizes = [8, 128], strides = [1, 1]} : vector<8x384xf32> to vector<8x128xf32>
    %c11_263 = arith.constant 11 : index
    %c0_264 = arith.constant 0 : index
    %c0_265 = arith.constant 0 : index
    %416 = vector.load %arg4[%c11_263, %c0_264, %c0_265] : memref<27x8x128xf32, #tpu.memory_space<vmem>>, vector<1x8x128xf32>
    %417 = vector.shape_cast %416 : vector<1x8x128xf32> to vector<8x128xf32>
    %418 = arith.mulf %417, %415 : vector<8x128xf32>
    %419 = arith.addf %414, %418 : vector<8x128xf32>
    %420 = vector.extract_strided_slice %404 {offsets = [0, 127], sizes = [8, 128], strides = [1, 1]} : vector<8x384xf32> to vector<8x128xf32>
    %c12_266 = arith.constant 12 : index
    %c0_267 = arith.constant 0 : index
    %c0_268 = arith.constant 0 : index
    %421 = vector.load %arg4[%c12_266, %c0_267, %c0_268] : memref<27x8x128xf32, #tpu.memory_space<vmem>>, vector<1x8x128xf32>
    %422 = vector.shape_cast %421 : vector<1x8x128xf32> to vector<8x128xf32>
    %423 = arith.mulf %422, %420 : vector<8x128xf32>
    %424 = arith.addf %419, %423 : vector<8x128xf32>
    %425 = vector.extract_strided_slice %404 {offsets = [0, 128], sizes = [8, 128], strides = [1, 1]} : vector<8x384xf32> to vector<8x128xf32>
    %c13_269 = arith.constant 13 : index
    %c0_270 = arith.constant 0 : index
    %c0_271 = arith.constant 0 : index
    %426 = vector.load %arg4[%c13_269, %c0_270, %c0_271] : memref<27x8x128xf32, #tpu.memory_space<vmem>>, vector<1x8x128xf32>
    %427 = vector.shape_cast %426 : vector<1x8x128xf32> to vector<8x128xf32>
    %428 = arith.mulf %427, %425 : vector<8x128xf32>
    %429 = arith.addf %424, %428 : vector<8x128xf32>
    %430 = vector.extract_strided_slice %404 {offsets = [0, 129], sizes = [8, 128], strides = [1, 1]} : vector<8x384xf32> to vector<8x128xf32>
    %c14_272 = arith.constant 14 : index
    %c0_273 = arith.constant 0 : index
    %c0_274 = arith.constant 0 : index
    %431 = vector.load %arg4[%c14_272, %c0_273, %c0_274] : memref<27x8x128xf32, #tpu.memory_space<vmem>>, vector<1x8x128xf32>
    %432 = vector.shape_cast %431 : vector<1x8x128xf32> to vector<8x128xf32>
    %433 = arith.mulf %432, %430 : vector<8x128xf32>
    %434 = arith.addf %429, %433 : vector<8x128xf32>
    %435 = vector.extract_strided_slice %404 {offsets = [0, 143], sizes = [8, 128], strides = [1, 1]} : vector<8x384xf32> to vector<8x128xf32>
    %c15_275 = arith.constant 15 : index
    %c0_276 = arith.constant 0 : index
    %c0_277 = arith.constant 0 : index
    %436 = vector.load %arg4[%c15_275, %c0_276, %c0_277] : memref<27x8x128xf32, #tpu.memory_space<vmem>>, vector<1x8x128xf32>
    %437 = vector.shape_cast %436 : vector<1x8x128xf32> to vector<8x128xf32>
    %438 = arith.mulf %437, %435 : vector<8x128xf32>
    %439 = arith.addf %434, %438 : vector<8x128xf32>
    %440 = vector.extract_strided_slice %404 {offsets = [0, 144], sizes = [8, 128], strides = [1, 1]} : vector<8x384xf32> to vector<8x128xf32>
    %c16_278 = arith.constant 16 : index
    %c0_279 = arith.constant 0 : index
    %c0_280 = arith.constant 0 : index
    %441 = vector.load %arg4[%c16_278, %c0_279, %c0_280] : memref<27x8x128xf32, #tpu.memory_space<vmem>>, vector<1x8x128xf32>
    %442 = vector.shape_cast %441 : vector<1x8x128xf32> to vector<8x128xf32>
    %443 = arith.mulf %442, %440 : vector<8x128xf32>
    %444 = arith.addf %439, %443 : vector<8x128xf32>
    %445 = vector.extract_strided_slice %404 {offsets = [0, 145], sizes = [8, 128], strides = [1, 1]} : vector<8x384xf32> to vector<8x128xf32>
    %c17_281 = arith.constant 17 : index
    %c0_282 = arith.constant 0 : index
    %c0_283 = arith.constant 0 : index
    %446 = vector.load %arg4[%c17_281, %c0_282, %c0_283] : memref<27x8x128xf32, #tpu.memory_space<vmem>>, vector<1x8x128xf32>
    %447 = vector.shape_cast %446 : vector<1x8x128xf32> to vector<8x128xf32>
    %448 = arith.mulf %447, %445 : vector<8x128xf32>
    %449 = arith.addf %444, %448 : vector<8x128xf32>
    %c4_284 = arith.constant 4 : index
    %c0_285 = arith.constant 0 : index
    %c0_286 = arith.constant 0 : index
    %450 = vector.load %arg9[%c4_284, %c0_285, %c0_286] : memref<6x8x384xf32, #tpu.memory_space<vmem>>, vector<1x8x384xf32>
    %451 = vector.shape_cast %450 : vector<1x8x384xf32> to vector<8x384xf32>
    %452 = vector.extract_strided_slice %451 {offsets = [0, 111], sizes = [8, 128], strides = [1, 1]} : vector<8x384xf32> to vector<8x128xf32>
    %c18_287 = arith.constant 18 : index
    %c0_288 = arith.constant 0 : index
    %c0_289 = arith.constant 0 : index
    %453 = vector.load %arg4[%c18_287, %c0_288, %c0_289] : memref<27x8x128xf32, #tpu.memory_space<vmem>>, vector<1x8x128xf32>
    %454 = vector.shape_cast %453 : vector<1x8x128xf32> to vector<8x128xf32>
    %455 = arith.mulf %454, %452 : vector<8x128xf32>
    %456 = arith.addf %449, %455 : vector<8x128xf32>
    %457 = vector.extract_strided_slice %451 {offsets = [0, 112], sizes = [8, 128], strides = [1, 1]} : vector<8x384xf32> to vector<8x128xf32>
    %c19_290 = arith.constant 19 : index
    %c0_291 = arith.constant 0 : index
    %c0_292 = arith.constant 0 : index
    %458 = vector.load %arg4[%c19_290, %c0_291, %c0_292] : memref<27x8x128xf32, #tpu.memory_space<vmem>>, vector<1x8x128xf32>
    %459 = vector.shape_cast %458 : vector<1x8x128xf32> to vector<8x128xf32>
    %460 = arith.mulf %459, %457 : vector<8x128xf32>
    %461 = arith.addf %456, %460 : vector<8x128xf32>
    %462 = vector.extract_strided_slice %451 {offsets = [0, 113], sizes = [8, 128], strides = [1, 1]} : vector<8x384xf32> to vector<8x128xf32>
    %c20_293 = arith.constant 20 : index
    %c0_294 = arith.constant 0 : index
    %c0_295 = arith.constant 0 : index
    %463 = vector.load %arg4[%c20_293, %c0_294, %c0_295] : memref<27x8x128xf32, #tpu.memory_space<vmem>>, vector<1x8x128xf32>
    %464 = vector.shape_cast %463 : vector<1x8x128xf32> to vector<8x128xf32>
    %465 = arith.mulf %464, %462 : vector<8x128xf32>
    %466 = arith.addf %461, %465 : vector<8x128xf32>
    %467 = vector.extract_strided_slice %451 {offsets = [0, 127], sizes = [8, 128], strides = [1, 1]} : vector<8x384xf32> to vector<8x128xf32>
    %c21_296 = arith.constant 21 : index
    %c0_297 = arith.constant 0 : index
    %c0_298 = arith.constant 0 : index
    %468 = vector.load %arg4[%c21_296, %c0_297, %c0_298] : memref<27x8x128xf32, #tpu.memory_space<vmem>>, vector<1x8x128xf32>
    %469 = vector.shape_cast %468 : vector<1x8x128xf32> to vector<8x128xf32>
    %470 = arith.mulf %469, %467 : vector<8x128xf32>
    %471 = arith.addf %466, %470 : vector<8x128xf32>
    %472 = vector.extract_strided_slice %451 {offsets = [0, 128], sizes = [8, 128], strides = [1, 1]} : vector<8x384xf32> to vector<8x128xf32>
    %c22_299 = arith.constant 22 : index
    %c0_300 = arith.constant 0 : index
    %c0_301 = arith.constant 0 : index
    %473 = vector.load %arg4[%c22_299, %c0_300, %c0_301] : memref<27x8x128xf32, #tpu.memory_space<vmem>>, vector<1x8x128xf32>
    %474 = vector.shape_cast %473 : vector<1x8x128xf32> to vector<8x128xf32>
    %475 = arith.mulf %474, %472 : vector<8x128xf32>
    %476 = arith.addf %471, %475 : vector<8x128xf32>
    %477 = vector.extract_strided_slice %451 {offsets = [0, 129], sizes = [8, 128], strides = [1, 1]} : vector<8x384xf32> to vector<8x128xf32>
    %c23_302 = arith.constant 23 : index
    %c0_303 = arith.constant 0 : index
    %c0_304 = arith.constant 0 : index
    %478 = vector.load %arg4[%c23_302, %c0_303, %c0_304] : memref<27x8x128xf32, #tpu.memory_space<vmem>>, vector<1x8x128xf32>
    %479 = vector.shape_cast %478 : vector<1x8x128xf32> to vector<8x128xf32>
    %480 = arith.mulf %479, %477 : vector<8x128xf32>
    %481 = arith.addf %476, %480 : vector<8x128xf32>
    %482 = vector.extract_strided_slice %451 {offsets = [0, 143], sizes = [8, 128], strides = [1, 1]} : vector<8x384xf32> to vector<8x128xf32>
    %c24_305 = arith.constant 24 : index
    %c0_306 = arith.constant 0 : index
    %c0_307 = arith.constant 0 : index
    %483 = vector.load %arg4[%c24_305, %c0_306, %c0_307] : memref<27x8x128xf32, #tpu.memory_space<vmem>>, vector<1x8x128xf32>
    %484 = vector.shape_cast %483 : vector<1x8x128xf32> to vector<8x128xf32>
    %485 = arith.mulf %484, %482 : vector<8x128xf32>
    %486 = arith.addf %481, %485 : vector<8x128xf32>
    %487 = vector.extract_strided_slice %451 {offsets = [0, 144], sizes = [8, 128], strides = [1, 1]} : vector<8x384xf32> to vector<8x128xf32>
    %c25_308 = arith.constant 25 : index
    %c0_309 = arith.constant 0 : index
    %c0_310 = arith.constant 0 : index
    %488 = vector.load %arg4[%c25_308, %c0_309, %c0_310] : memref<27x8x128xf32, #tpu.memory_space<vmem>>, vector<1x8x128xf32>
    %489 = vector.shape_cast %488 : vector<1x8x128xf32> to vector<8x128xf32>
    %490 = arith.mulf %489, %487 : vector<8x128xf32>
    %491 = arith.addf %486, %490 : vector<8x128xf32>
    %492 = vector.extract_strided_slice %451 {offsets = [0, 145], sizes = [8, 128], strides = [1, 1]} : vector<8x384xf32> to vector<8x128xf32>
    %c26_311 = arith.constant 26 : index
    %c0_312 = arith.constant 0 : index
    %c0_313 = arith.constant 0 : index
    %493 = vector.load %arg4[%c26_311, %c0_312, %c0_313] : memref<27x8x128xf32, #tpu.memory_space<vmem>>, vector<1x8x128xf32>
    %494 = vector.shape_cast %493 : vector<1x8x128xf32> to vector<8x128xf32>
    %495 = arith.mulf %494, %492 : vector<8x128xf32>
    %496 = arith.addf %491, %495 : vector<8x128xf32>
    %497 = arith.addf %496, %44 : vector<8x128xf32>
    %cst_314 = arith.constant dense<0.000000e+00> : vector<16x128xf32>
    %498 = tpu.matmul %45, %497, %cst_314 {dimension_numbers = #tpu.dot_dimension_numbers<[1], [0], [0], [1], [0, 0, 1, 1], [], []>} : vector<16x8xf32>, vector<8x128xf32>, vector<16x128xf32> -> vector<16x128xf32>
    %499 = arith.addf %498, %48 : vector<16x128xf32>
    %c0_315 = arith.constant 0 : index
    %c2_316 = arith.constant 2 : index
    %c0_317 = arith.constant 0 : index
    %c0_318 = arith.constant 0 : index
    %500 = vector.load %arg1[%c0_315, %c2_316, %c0_317, %c0_318] : memref<1x4x16x128xf32, #tpu.memory_space<vmem>>, vector<1x1x16x128xf32>
    %501 = vector.shape_cast %500 : vector<1x1x16x128xf32> to vector<16x128xf32>
    %502 = arith.addf %499, %501 : vector<16x128xf32>
    %cst_319 = arith.constant 0.000000e+00 : f32
    %503 = vector.broadcast %cst_319 : f32 to vector<16x128xf32>
    %504 = arith.maximumf %502, %503 : vector<16x128xf32>
    %c0_320 = arith.constant 0 : index
    %c2_321 = arith.constant 2 : index
    %c0_322 = arith.constant 0 : index
    %c0_323 = arith.constant 0 : index
    %505 = vector.load %arg8[%c0_320, %c2_321, %c0_322, %c0_323] : memref<1x4x16x128xf32, #tpu.memory_space<vmem>>, vector<1x1x16x128xf32>
    %506 = vector.shape_cast %505 : vector<1x1x16x128xf32> to vector<16x128xf32>
    %507 = vector.shape_cast %504 : vector<16x128xf32> to vector<1x1x16x128xf32>
    tpu.vector_store %arg8[%c0_320, %c2_321, %c0_322, %c0_323], %507 {strides = array<i32>} : memref<1x4x16x128xf32, #tpu.memory_space<vmem>>, vector<1x1x16x128xf32>,
    %cst_324 = arith.constant 0.000000e+00 : f32
    %508 = vector.broadcast %cst_324 : f32 to vector<8x128xf32>
    %c3_325 = arith.constant 3 : index
    %c0_326 = arith.constant 0 : index
    %c0_327 = arith.constant 0 : index
    %509 = vector.load %arg9[%c3_325, %c0_326, %c0_327] : memref<6x8x384xf32, #tpu.memory_space<vmem>>, vector<1x8x384xf32>
    %510 = vector.shape_cast %509 : vector<1x8x384xf32> to vector<8x384xf32>
    %511 = vector.extract_strided_slice %510 {offsets = [0, 111], sizes = [8, 128], strides = [1, 1]} : vector<8x384xf32> to vector<8x128xf32>
    %c0_328 = arith.constant 0 : index
    %c0_329 = arith.constant 0 : index
    %c0_330 = arith.constant 0 : index
    %512 = vector.load %arg4[%c0_328, %c0_329, %c0_330] : memref<27x8x128xf32, #tpu.memory_space<vmem>>, vector<1x8x128xf32>
    %513 = vector.shape_cast %512 : vector<1x8x128xf32> to vector<8x128xf32>
    %514 = arith.mulf %513, %511 : vector<8x128xf32>
    %515 = arith.addf %508, %514 : vector<8x128xf32>
    %516 = vector.extract_strided_slice %510 {offsets = [0, 112], sizes = [8, 128], strides = [1, 1]} : vector<8x384xf32> to vector<8x128xf32>
    %c1_331 = arith.constant 1 : index
    %c0_332 = arith.constant 0 : index
    %c0_333 = arith.constant 0 : index
    %517 = vector.load %arg4[%c1_331, %c0_332, %c0_333] : memref<27x8x128xf32, #tpu.memory_space<vmem>>, vector<1x8x128xf32>
    %518 = vector.shape_cast %517 : vector<1x8x128xf32> to vector<8x128xf32>
    %519 = arith.mulf %518, %516 : vector<8x128xf32>
    %520 = arith.addf %515, %519 : vector<8x128xf32>
    %521 = vector.extract_strided_slice %510 {offsets = [0, 113], sizes = [8, 128], strides = [1, 1]} : vector<8x384xf32> to vector<8x128xf32>
    %c2_334 = arith.constant 2 : index
    %c0_335 = arith.constant 0 : index
    %c0_336 = arith.constant 0 : index
    %522 = vector.load %arg4[%c2_334, %c0_335, %c0_336] : memref<27x8x128xf32, #tpu.memory_space<vmem>>, vector<1x8x128xf32>
    %523 = vector.shape_cast %522 : vector<1x8x128xf32> to vector<8x128xf32>
    %524 = arith.mulf %523, %521 : vector<8x128xf32>
    %525 = arith.addf %520, %524 : vector<8x128xf32>
    %526 = vector.extract_strided_slice %510 {offsets = [0, 127], sizes = [8, 128], strides = [1, 1]} : vector<8x384xf32> to vector<8x128xf32>
    %c3_337 = arith.constant 3 : index
    %c0_338 = arith.constant 0 : index
    %c0_339 = arith.constant 0 : index
    %527 = vector.load %arg4[%c3_337, %c0_338, %c0_339] : memref<27x8x128xf32, #tpu.memory_space<vmem>>, vector<1x8x128xf32>
    %528 = vector.shape_cast %527 : vector<1x8x128xf32> to vector<8x128xf32>
    %529 = arith.mulf %528, %526 : vector<8x128xf32>
    %530 = arith.addf %525, %529 : vector<8x128xf32>
    %531 = vector.extract_strided_slice %510 {offsets = [0, 128], sizes = [8, 128], strides = [1, 1]} : vector<8x384xf32> to vector<8x128xf32>
    %c4_340 = arith.constant 4 : index
    %c0_341 = arith.constant 0 : index
    %c0_342 = arith.constant 0 : index
    %532 = vector.load %arg4[%c4_340, %c0_341, %c0_342] : memref<27x8x128xf32, #tpu.memory_space<vmem>>, vector<1x8x128xf32>
    %533 = vector.shape_cast %532 : vector<1x8x128xf32> to vector<8x128xf32>
    %534 = arith.mulf %533, %531 : vector<8x128xf32>
    %535 = arith.addf %530, %534 : vector<8x128xf32>
    %536 = vector.extract_strided_slice %510 {offsets = [0, 129], sizes = [8, 128], strides = [1, 1]} : vector<8x384xf32> to vector<8x128xf32>
    %c5_343 = arith.constant 5 : index
    %c0_344 = arith.constant 0 : index
    %c0_345 = arith.constant 0 : index
    %537 = vector.load %arg4[%c5_343, %c0_344, %c0_345] : memref<27x8x128xf32, #tpu.memory_space<vmem>>, vector<1x8x128xf32>
    %538 = vector.shape_cast %537 : vector<1x8x128xf32> to vector<8x128xf32>
    %539 = arith.mulf %538, %536 : vector<8x128xf32>
    %540 = arith.addf %535, %539 : vector<8x128xf32>
    %541 = vector.extract_strided_slice %510 {offsets = [0, 143], sizes = [8, 128], strides = [1, 1]} : vector<8x384xf32> to vector<8x128xf32>
    %c6_346 = arith.constant 6 : index
    %c0_347 = arith.constant 0 : index
    %c0_348 = arith.constant 0 : index
    %542 = vector.load %arg4[%c6_346, %c0_347, %c0_348] : memref<27x8x128xf32, #tpu.memory_space<vmem>>, vector<1x8x128xf32>
    %543 = vector.shape_cast %542 : vector<1x8x128xf32> to vector<8x128xf32>
    %544 = arith.mulf %543, %541 : vector<8x128xf32>
    %545 = arith.addf %540, %544 : vector<8x128xf32>
    %546 = vector.extract_strided_slice %510 {offsets = [0, 144], sizes = [8, 128], strides = [1, 1]} : vector<8x384xf32> to vector<8x128xf32>
    %c7_349 = arith.constant 7 : index
    %c0_350 = arith.constant 0 : index
    %c0_351 = arith.constant 0 : index
    %547 = vector.load %arg4[%c7_349, %c0_350, %c0_351] : memref<27x8x128xf32, #tpu.memory_space<vmem>>, vector<1x8x128xf32>
    %548 = vector.shape_cast %547 : vector<1x8x128xf32> to vector<8x128xf32>
    %549 = arith.mulf %548, %546 : vector<8x128xf32>
    %550 = arith.addf %545, %549 : vector<8x128xf32>
    %551 = vector.extract_strided_slice %510 {offsets = [0, 145], sizes = [8, 128], strides = [1, 1]} : vector<8x384xf32> to vector<8x128xf32>
    %c8_352 = arith.constant 8 : index
    %c0_353 = arith.constant 0 : index
    %c0_354 = arith.constant 0 : index
    %552 = vector.load %arg4[%c8_352, %c0_353, %c0_354] : memref<27x8x128xf32, #tpu.memory_space<vmem>>, vector<1x8x128xf32>
    %553 = vector.shape_cast %552 : vector<1x8x128xf32> to vector<8x128xf32>
    %554 = arith.mulf %553, %551 : vector<8x128xf32>
    %555 = arith.addf %550, %554 : vector<8x128xf32>
    %c4_355 = arith.constant 4 : index
    %c0_356 = arith.constant 0 : index
    %c0_357 = arith.constant 0 : index
    %556 = vector.load %arg9[%c4_355, %c0_356, %c0_357] : memref<6x8x384xf32, #tpu.memory_space<vmem>>, vector<1x8x384xf32>
    %557 = vector.shape_cast %556 : vector<1x8x384xf32> to vector<8x384xf32>
    %558 = vector.extract_strided_slice %557 {offsets = [0, 111], sizes = [8, 128], strides = [1, 1]} : vector<8x384xf32> to vector<8x128xf32>
    %c9_358 = arith.constant 9 : index
    %c0_359 = arith.constant 0 : index
    %c0_360 = arith.constant 0 : index
    %559 = vector.load %arg4[%c9_358, %c0_359, %c0_360] : memref<27x8x128xf32, #tpu.memory_space<vmem>>, vector<1x8x128xf32>
    %560 = vector.shape_cast %559 : vector<1x8x128xf32> to vector<8x128xf32>
    %561 = arith.mulf %560, %558 : vector<8x128xf32>
    %562 = arith.addf %555, %561 : vector<8x128xf32>
    %563 = vector.extract_strided_slice %557 {offsets = [0, 112], sizes = [8, 128], strides = [1, 1]} : vector<8x384xf32> to vector<8x128xf32>
    %c10_361 = arith.constant 10 : index
    %c0_362 = arith.constant 0 : index
    %c0_363 = arith.constant 0 : index
    %564 = vector.load %arg4[%c10_361, %c0_362, %c0_363] : memref<27x8x128xf32, #tpu.memory_space<vmem>>, vector<1x8x128xf32>
    %565 = vector.shape_cast %564 : vector<1x8x128xf32> to vector<8x128xf32>
    %566 = arith.mulf %565, %563 : vector<8x128xf32>
    %567 = arith.addf %562, %566 : vector<8x128xf32>
    %568 = vector.extract_strided_slice %557 {offsets = [0, 113], sizes = [8, 128], strides = [1, 1]} : vector<8x384xf32> to vector<8x128xf32>
    %c11_364 = arith.constant 11 : index
    %c0_365 = arith.constant 0 : index
    %c0_366 = arith.constant 0 : index
    %569 = vector.load %arg4[%c11_364, %c0_365, %c0_366] : memref<27x8x128xf32, #tpu.memory_space<vmem>>, vector<1x8x128xf32>
    %570 = vector.shape_cast %569 : vector<1x8x128xf32> to vector<8x128xf32>
    %571 = arith.mulf %570, %568 : vector<8x128xf32>
    %572 = arith.addf %567, %571 : vector<8x128xf32>
    %573 = vector.extract_strided_slice %557 {offsets = [0, 127], sizes = [8, 128], strides = [1, 1]} : vector<8x384xf32> to vector<8x128xf32>
    %c12_367 = arith.constant 12 : index
    %c0_368 = arith.constant 0 : index
    %c0_369 = arith.constant 0 : index
    %574 = vector.load %arg4[%c12_367, %c0_368, %c0_369] : memref<27x8x128xf32, #tpu.memory_space<vmem>>, vector<1x8x128xf32>
    %575 = vector.shape_cast %574 : vector<1x8x128xf32> to vector<8x128xf32>
    %576 = arith.mulf %575, %573 : vector<8x128xf32>
    %577 = arith.addf %572, %576 : vector<8x128xf32>
    %578 = vector.extract_strided_slice %557 {offsets = [0, 128], sizes = [8, 128], strides = [1, 1]} : vector<8x384xf32> to vector<8x128xf32>
    %c13_370 = arith.constant 13 : index
    %c0_371 = arith.constant 0 : index
    %c0_372 = arith.constant 0 : index
    %579 = vector.load %arg4[%c13_370, %c0_371, %c0_372] : memref<27x8x128xf32, #tpu.memory_space<vmem>>, vector<1x8x128xf32>
    %580 = vector.shape_cast %579 : vector<1x8x128xf32> to vector<8x128xf32>
    %581 = arith.mulf %580, %578 : vector<8x128xf32>
    %582 = arith.addf %577, %581 : vector<8x128xf32>
    %583 = vector.extract_strided_slice %557 {offsets = [0, 129], sizes = [8, 128], strides = [1, 1]} : vector<8x384xf32> to vector<8x128xf32>
    %c14_373 = arith.constant 14 : index
    %c0_374 = arith.constant 0 : index
    %c0_375 = arith.constant 0 : index
    %584 = vector.load %arg4[%c14_373, %c0_374, %c0_375] : memref<27x8x128xf32, #tpu.memory_space<vmem>>, vector<1x8x128xf32>
    %585 = vector.shape_cast %584 : vector<1x8x128xf32> to vector<8x128xf32>
    %586 = arith.mulf %585, %583 : vector<8x128xf32>
    %587 = arith.addf %582, %586 : vector<8x128xf32>
    %588 = vector.extract_strided_slice %557 {offsets = [0, 143], sizes = [8, 128], strides = [1, 1]} : vector<8x384xf32> to vector<8x128xf32>
    %c15_376 = arith.constant 15 : index
    %c0_377 = arith.constant 0 : index
    %c0_378 = arith.constant 0 : index
    %589 = vector.load %arg4[%c15_376, %c0_377, %c0_378] : memref<27x8x128xf32, #tpu.memory_space<vmem>>, vector<1x8x128xf32>
    %590 = vector.shape_cast %589 : vector<1x8x128xf32> to vector<8x128xf32>
    %591 = arith.mulf %590, %588 : vector<8x128xf32>
    %592 = arith.addf %587, %591 : vector<8x128xf32>
    %593 = vector.extract_strided_slice %557 {offsets = [0, 144], sizes = [8, 128], strides = [1, 1]} : vector<8x384xf32> to vector<8x128xf32>
    %c16_379 = arith.constant 16 : index
    %c0_380 = arith.constant 0 : index
    %c0_381 = arith.constant 0 : index
    %594 = vector.load %arg4[%c16_379, %c0_380, %c0_381] : memref<27x8x128xf32, #tpu.memory_space<vmem>>, vector<1x8x128xf32>
    %595 = vector.shape_cast %594 : vector<1x8x128xf32> to vector<8x128xf32>
    %596 = arith.mulf %595, %593 : vector<8x128xf32>
    %597 = arith.addf %592, %596 : vector<8x128xf32>
    %598 = vector.extract_strided_slice %557 {offsets = [0, 145], sizes = [8, 128], strides = [1, 1]} : vector<8x384xf32> to vector<8x128xf32>
    %c17_382 = arith.constant 17 : index
    %c0_383 = arith.constant 0 : index
    %c0_384 = arith.constant 0 : index
    %599 = vector.load %arg4[%c17_382, %c0_383, %c0_384] : memref<27x8x128xf32, #tpu.memory_space<vmem>>, vector<1x8x128xf32>
    %600 = vector.shape_cast %599 : vector<1x8x128xf32> to vector<8x128xf32>
    %601 = arith.mulf %600, %598 : vector<8x128xf32>
    %602 = arith.addf %597, %601 : vector<8x128xf32>
    %c5_385 = arith.constant 5 : index
    %c0_386 = arith.constant 0 : index
    %c0_387 = arith.constant 0 : index
    %603 = vector.load %arg9[%c5_385, %c0_386, %c0_387] : memref<6x8x384xf32, #tpu.memory_space<vmem>>, vector<1x8x384xf32>
    %604 = vector.shape_cast %603 : vector<1x8x384xf32> to vector<8x384xf32>
    %605 = vector.extract_strided_slice %604 {offsets = [0, 111], sizes = [8, 128], strides = [1, 1]} : vector<8x384xf32> to vector<8x128xf32>
    %c18_388 = arith.constant 18 : index
    %c0_389 = arith.constant 0 : index
    %c0_390 = arith.constant 0 : index
    %606 = vector.load %arg4[%c18_388, %c0_389, %c0_390] : memref<27x8x128xf32, #tpu.memory_space<vmem>>, vector<1x8x128xf32>
    %607 = vector.shape_cast %606 : vector<1x8x128xf32> to vector<8x128xf32>
    %608 = arith.mulf %607, %605 : vector<8x128xf32>
    %609 = arith.addf %602, %608 : vector<8x128xf32>
    %610 = vector.extract_strided_slice %604 {offsets = [0, 112], sizes = [8, 128], strides = [1, 1]} : vector<8x384xf32> to vector<8x128xf32>
    %c19_391 = arith.constant 19 : index
    %c0_392 = arith.constant 0 : index
    %c0_393 = arith.constant 0 : index
    %611 = vector.load %arg4[%c19_391, %c0_392, %c0_393] : memref<27x8x128xf32, #tpu.memory_space<vmem>>, vector<1x8x128xf32>
    %612 = vector.shape_cast %611 : vector<1x8x128xf32> to vector<8x128xf32>
    %613 = arith.mulf %612, %610 : vector<8x128xf32>
    %614 = arith.addf %609, %613 : vector<8x128xf32>
    %615 = vector.extract_strided_slice %604 {offsets = [0, 113], sizes = [8, 128], strides = [1, 1]} : vector<8x384xf32> to vector<8x128xf32>
    %c20_394 = arith.constant 20 : index
    %c0_395 = arith.constant 0 : index
    %c0_396 = arith.constant 0 : index
    %616 = vector.load %arg4[%c20_394, %c0_395, %c0_396] : memref<27x8x128xf32, #tpu.memory_space<vmem>>, vector<1x8x128xf32>
    %617 = vector.shape_cast %616 : vector<1x8x128xf32> to vector<8x128xf32>
    %618 = arith.mulf %617, %615 : vector<8x128xf32>
    %619 = arith.addf %614, %618 : vector<8x128xf32>
    %620 = vector.extract_strided_slice %604 {offsets = [0, 127], sizes = [8, 128], strides = [1, 1]} : vector<8x384xf32> to vector<8x128xf32>
    %c21_397 = arith.constant 21 : index
    %c0_398 = arith.constant 0 : index
    %c0_399 = arith.constant 0 : index
    %621 = vector.load %arg4[%c21_397, %c0_398, %c0_399] : memref<27x8x128xf32, #tpu.memory_space<vmem>>, vector<1x8x128xf32>
    %622 = vector.shape_cast %621 : vector<1x8x128xf32> to vector<8x128xf32>
    %623 = arith.mulf %622, %620 : vector<8x128xf32>
    %624 = arith.addf %619, %623 : vector<8x128xf32>
    %625 = vector.extract_strided_slice %604 {offsets = [0, 128], sizes = [8, 128], strides = [1, 1]} : vector<8x384xf32> to vector<8x128xf32>
    %c22_400 = arith.constant 22 : index
    %c0_401 = arith.constant 0 : index
    %c0_402 = arith.constant 0 : index
    %626 = vector.load %arg4[%c22_400, %c0_401, %c0_402] : memref<27x8x128xf32, #tpu.memory_space<vmem>>, vector<1x8x128xf32>
    %627 = vector.shape_cast %626 : vector<1x8x128xf32> to vector<8x128xf32>
    %628 = arith.mulf %627, %625 : vector<8x128xf32>
    %629 = arith.addf %624, %628 : vector<8x128xf32>
    %630 = vector.extract_strided_slice %604 {offsets = [0, 129], sizes = [8, 128], strides = [1, 1]} : vector<8x384xf32> to vector<8x128xf32>
    %c23_403 = arith.constant 23 : index
    %c0_404 = arith.constant 0 : index
    %c0_405 = arith.constant 0 : index
    %631 = vector.load %arg4[%c23_403, %c0_404, %c0_405] : memref<27x8x128xf32, #tpu.memory_space<vmem>>, vector<1x8x128xf32>
    %632 = vector.shape_cast %631 : vector<1x8x128xf32> to vector<8x128xf32>
    %633 = arith.mulf %632, %630 : vector<8x128xf32>
    %634 = arith.addf %629, %633 : vector<8x128xf32>
    %635 = vector.extract_strided_slice %604 {offsets = [0, 143], sizes = [8, 128], strides = [1, 1]} : vector<8x384xf32> to vector<8x128xf32>
    %c24_406 = arith.constant 24 : index
    %c0_407 = arith.constant 0 : index
    %c0_408 = arith.constant 0 : index
    %636 = vector.load %arg4[%c24_406, %c0_407, %c0_408] : memref<27x8x128xf32, #tpu.memory_space<vmem>>, vector<1x8x128xf32>
    %637 = vector.shape_cast %636 : vector<1x8x128xf32> to vector<8x128xf32>
    %638 = arith.mulf %637, %635 : vector<8x128xf32>
    %639 = arith.addf %634, %638 : vector<8x128xf32>
    %640 = vector.extract_strided_slice %604 {offsets = [0, 144], sizes = [8, 128], strides = [1, 1]} : vector<8x384xf32> to vector<8x128xf32>
    %c25_409 = arith.constant 25 : index
    %c0_410 = arith.constant 0 : index
    %c0_411 = arith.constant 0 : index
    %641 = vector.load %arg4[%c25_409, %c0_410, %c0_411] : memref<27x8x128xf32, #tpu.memory_space<vmem>>, vector<1x8x128xf32>
    %642 = vector.shape_cast %641 : vector<1x8x128xf32> to vector<8x128xf32>
    %643 = arith.mulf %642, %640 : vector<8x128xf32>
    %644 = arith.addf %639, %643 : vector<8x128xf32>
    %645 = vector.extract_strided_slice %604 {offsets = [0, 145], sizes = [8, 128], strides = [1, 1]} : vector<8x384xf32> to vector<8x128xf32>
    %c26_412 = arith.constant 26 : index
    %c0_413 = arith.constant 0 : index
    %c0_414 = arith.constant 0 : index
    %646 = vector.load %arg4[%c26_412, %c0_413, %c0_414] : memref<27x8x128xf32, #tpu.memory_space<vmem>>, vector<1x8x128xf32>
    %647 = vector.shape_cast %646 : vector<1x8x128xf32> to vector<8x128xf32>
    %648 = arith.mulf %647, %645 : vector<8x128xf32>
    %649 = arith.addf %644, %648 : vector<8x128xf32>
    %650 = arith.addf %649, %44 : vector<8x128xf32>
    %cst_415 = arith.constant dense<0.000000e+00> : vector<16x128xf32>
    %651 = tpu.matmul %45, %650, %cst_415 {dimension_numbers = #tpu.dot_dimension_numbers<[1], [0], [0], [1], [0, 0, 1, 1], [], []>} : vector<16x8xf32>, vector<8x128xf32>, vector<16x128xf32> -> vector<16x128xf32>
    %652 = arith.addf %651, %48 : vector<16x128xf32>
    %c0_416 = arith.constant 0 : index
    %c3_417 = arith.constant 3 : index
    %c0_418 = arith.constant 0 : index
    %c0_419 = arith.constant 0 : index
    %653 = vector.load %arg1[%c0_416, %c3_417, %c0_418, %c0_419] : memref<1x4x16x128xf32, #tpu.memory_space<vmem>>, vector<1x1x16x128xf32>
    %654 = vector.shape_cast %653 : vector<1x1x16x128xf32> to vector<16x128xf32>
    %655 = arith.addf %652, %654 : vector<16x128xf32>
    %cst_420 = arith.constant 0.000000e+00 : f32
    %656 = vector.broadcast %cst_420 : f32 to vector<16x128xf32>
    %657 = arith.maximumf %655, %656 : vector<16x128xf32>
    %c0_421 = arith.constant 0 : index
    %c3_422 = arith.constant 3 : index
    %c0_423 = arith.constant 0 : index
    %c0_424 = arith.constant 0 : index
    %658 = vector.load %arg8[%c0_421, %c3_422, %c0_423, %c0_424] : memref<1x4x16x128xf32, #tpu.memory_space<vmem>>, vector<1x1x16x128xf32>
    %659 = vector.shape_cast %658 : vector<1x1x16x128xf32> to vector<16x128xf32>
    %660 = vector.shape_cast %657 : vector<16x128xf32> to vector<1x1x16x128xf32>
    tpu.vector_store %arg8[%c0_421, %c3_422, %c0_423, %c0_424], %660 {strides = array<i32>} : memref<1x4x16x128xf32, #tpu.memory_space<vmem>>, vector<1x1x16x128xf32>,
    return
  }
  func.func @transform_0(%arg0: i32) -> (i32, i32, i32, i32) {
    %c0_i32 = arith.constant 0 : i32
    %c0_i32_0 = arith.constant 0 : i32
    %c0_i32_1 = arith.constant 0 : i32
    %c0_i32_2 = arith.constant 0 : i32
    return %arg0, %c0_i32, %c0_i32_0, %c0_i32_1 : i32, i32, i32, i32
  }
  func.func @transform_1(%arg0: i32) -> (i32, i32) {
    %c0_i32 = arith.constant 0 : i32
    %c0_i32_0 = arith.constant 0 : i32
    %c0_i32_1 = arith.constant 0 : i32
    return %c0_i32, %c0_i32_0 : i32, i32
  }
  func.func @transform_2(%arg0: i32) -> (i32, i32) {
    %c0_i32 = arith.constant 0 : i32
    %c0_i32_0 = arith.constant 0 : i32
    %c0_i32_1 = arith.constant 0 : i32
    return %c0_i32, %c0_i32_0 : i32, i32
  }
  func.func @transform_3(%arg0: i32) -> (i32, i32, i32) {
    %c0_i32 = arith.constant 0 : i32
    %c0_i32_0 = arith.constant 0 : i32
    %c0_i32_1 = arith.constant 0 : i32
    %c0_i32_2 = arith.constant 0 : i32
    return %c0_i32, %c0_i32_0, %c0_i32_1 : i32, i32, i32
  }
  func.func @transform_4(%arg0: i32) -> (i32, i32) {
    %c0_i32 = arith.constant 0 : i32
    %c0_i32_0 = arith.constant 0 : i32
    %c0_i32_1 = arith.constant 0 : i32
    return %c0_i32, %c0_i32_0 : i32, i32
  }
  func.func @transform_5(%arg0: i32) -> (i32, i32) {
    %c0_i32 = arith.constant 0 : i32
    %c0_i32_0 = arith.constant 0 : i32
    %c0_i32_1 = arith.constant 0 : i32
    return %c0_i32, %c0_i32_0 : i32, i32
  }
  func.func @transform_6(%arg0: i32) -> (i32, i32) {
    %c0_i32 = arith.constant 0 : i32
    %c0_i32_0 = arith.constant 0 : i32
    %c0_i32_1 = arith.constant 0 : i32
    return %c0_i32, %c0_i32_0 : i32, i32
  }
  func.func @transform_7(%arg0: i32) -> (i32, i32, i32, i32) {
    %c0_i32 = arith.constant 0 : i32
    %c0_i32_0 = arith.constant 0 : i32
    %c0_i32_1 = arith.constant 0 : i32
    %c0_i32_2 = arith.constant 0 : i32
    return %arg0, %c0_i32, %c0_i32_0, %c0_i32_1 : i32, i32, i32, i32
  }
}

</mosaic_0001>

<bundles_post_ra>
// kernel: tpu_custom_call.1
= control target key start
LH: loop header
LB: loop body
LE: loop exit
PB: predicated region body
PF: predicated region fallthrough
CT: control target
= control target key end

     0   :  { %12 = vsyncpa [#allocation4], 0  ;;  %s3925_s0 = inlined_call_operand.hbm [shape: f32[2,4,16,128], index: 0, kind: input, shape index: {}]   ;;  %s3926_s1 = inlined_call_operand.vmem [shape: f32[8,16], index: 1, kind: input, shape index: {}]   ;;  %s3927_s2 = inlined_call_operand.vmem [shape: f32[8,1], index: 2, kind: input, shape index: {}]   ;;  %s3928_s3 = inlined_call_operand.hbm [shape: f32[27,8,128], index: 3, kind: input, shape index: {}]   ;;  %s3929_s4 = inlined_call_operand.vmem [shape: f32[8,1], index: 4, kind: input, shape index: {}]   ;;  %s3930_s5 = inlined_call_operand.vmem [shape: f32[16,8], index: 5, kind: input, shape index: {}]   ;;  %s3931_s6 = inlined_call_operand.vmem [shape: f32[16,1], index: 6, kind: input, shape index: {}]   ;;  %s3932_s7 = inlined_call_operand.hbm [shape: f32[2,4,16,128], index: 7, kind: output, shape index: {}]  }
   0x1   :  { %14 = vsyncpa [#allocation4 + $0x1], 0 }
   0x2   :  { %15 = vsyncpa [#allocation7], 0 }
   0x3   :  { %16 = vsyncpa [#allocation5], 0 }
   0x4   :  { %18 = vsyncpa [#allocation5 + $0x1], 0  ;;  %s2789_s24 = smov 0   ;;  %s2791_s25 = smov 0  }
   0x5   :  { %s2793_s26 = smov 0   ;;  %s2795_s27 = smov 0  }
   0x6 LB: > { %s2810_s28 = sadd.s32 4294967295, %s2728_s27   ;;  %s2113_s29 = sadd.s32 4294967294, %s2728_s27   ;;  %s2728_s27 = sphi %s2795_s27, %s4015_s27   ;;  %s2724_s26 = sphi %s2793_s26, %s4014_s26   ;;  %s2720_s25 = sphi %s2791_s25, %s4013_s25   ;;  %s2716_s24 = sphi %s2789_s24, %s4012_s24  }
   0x7   : > { %p44_p0 = scmp.ne.s32.totalorder %s2720_s25, %s2716_s24  ;;  %p3933_p1 = scmp.eq.s32.totalorder %s2810_s28, 0 }
   0x8   : > { %p200_p3 = scmp.eq.s32.totalorder %s2113_s29, 1  ;;  %p2114_p5 = scmp.ge.s32.totalorder %s2728_s27, 1 }
   0x9   : > { %p2819_p4 = por %p3933_p1, %p44_p0  ;;  %p207_p7 = scmp.lt.s32.totalorder %s2728_s27, 3 }
   0xa   : > { %p2824_p6 = por %p200_p3, %p44_p0  ;;  %s2730_s10 = smov [#allocation6]  }
   0xb   : > { %s3961_s30 = scalar_select %p2819_p4, 1, 0 }
   0xc   : > { %s3962_s8 = scalar_select %p2824_p6, 1, 0 }
   0xd   : > { %p2829_p8 = pnand %p2114_p5, %p207_p7  ;;  %s225_s11 = sshll.u32 %s2730_s10, 4  ;;  %s2833_s11 = int_to_ptr.vmem [resolvable:$true] %s225_s11 }
   0xe   : > { %s2845_s13 = sadd.s32 1, %s2728_s27   ;;  %s31_s14 = sadd.s32 1, %s2724_s26 }
   0xf   : > { %s3963_s9 = scalar_select %p2829_p8, 1, 0 }
  0x10   : > { %p2253_p9 = pneg %p2829_p8  ;;  %s28_s15 = ssub.s32 %s2728_s27, %s2845_s13 }
  0x11   : > { %s2600_s18 = scalar_lea.hbm %s3928_s3, 3456 }
  0x12   : > { %p2840_p11 = pnand %p2253_p9, %p3933_p1  ;;  %p2601_p12 = scmp.ne.s32.totalorder %s3928_s3, %s2600_s18 }
  0x13   : > { %p2607_p5 = scmp.lt.u32.totalorder %s2600_s18, %s3928_s3 }
  0x14   : > { %p2602_p13 = pneg %p2840_p11 }
  0x16   : > { %p2603_p0 = pnand %p2602_p13, %p2601_p12 }
  0x18   : > { %p2604_p3 = pneg %p2603_p0 }
  0x1a   : > { %p2609_p7 = pnand %p2607_p5, %p2604_p3 }
  0x1c   : > { %2612 = shalt.err (!%p2609_p7)
}
  0x1d   : > { %s2613_s23 = scalar_lea.vmem %s2833_s11, 3456  ;;  %p2621_p2 = scmp.lt.s32.totalorder %s2833_s11, %s2833_s11 }
  0x1e   : > { %p2614_p9 = scmp.ne.s32.totalorder %s2833_s11, %s2613_s23  ;;  %p2622_p6 = scmp.lt.s32.totalorder %s2613_s23, %s2613_s23 }
  0x20   : > { %p2616_p10 = pnand %p2614_p9, %p2602_p13  ;;  %p2623_p4 = por %p2622_p6, %p2621_p2 }
  0x22   : > { %p2617_p1 = pneg %p2616_p10 }
  0x24   : > { %p2624_p8 = pnand %p2623_p4, %p2617_p1 }
  0x26   : > { %2627 = shalt.err (!%p2624_p8)
}
  0x27   : > { %s3936_s29 = smov 128   ;;  %s2732_s10 = smov 8  }
  0x28   : > { %2256 = dma.hbm_to_vmem [thread:$0]  (!%p2840_p11), %s3928_s3, 3456, %s2833_s11, [#allocation7], %s3936_s29, %s3936_s29, %s2732_s10  }
  0x29   : > { %p29_p1 = scmp.eq.s32.totalorder %s28_s15, 0  ;;  %p38_p2 = scmp.ne.s32.totalorder %s2724_s26, %s2720_s25 }
  0x2a   : > { %p39_p4 = scmp.eq.s32.totalorder %s2728_s27, 0  ;;  %p2266_p6 = scmp.lt.s32.totalorder %s2728_s27, 2 }
  0x2b   : > { %s2879_s18 = scalar_select %p29_p1, %s2724_s26, %s31_s14  }
  0x2c   : > { %p40_p8 = por %p39_p4, %p38_p2  ;;  %p3965_p10 = scmp.eq.s32.totalorder %s2810_s28, 1 }
  0x2d   : > { %s248_s12 = sand.u32 1, %s2724_s26   ;;  %s2159_s20 = sshll.u32 %s2728_s27, 10 }
  0x2e   : > { %p2883_p12 = por %p3965_p10, %p38_p2  ;;  %s2117_s21 = sshll.u32 %s248_s12, 6 }
  0x2f   : > { %s2892_s16 = scalar_lea.hbm %s3925_s0, %s2159_s20  ;;  %s252_s11 = scalar_lea.vmem [#allocation3], %s2117_s21 }
  0x30   : > { %s259_s14 = sshll.u32 %s252_s11, 4  ;;  %p2894_p11 = pnand %p2266_p6, %p40_p8  ;;  %s2898_s14 = int_to_ptr.vmem [resolvable:$true] %s259_s14 }
  0x31   : > { %s2900_s17 = scalar_lea.sflag [#allocation4], %s248_s12  ;;  %s2628_s29 = scalar_lea.hbm %s2892_s16, 1024 }
  0x32   : > { %p2629_p13 = scmp.ne.s32.totalorder %s2892_s16, %s2628_s29  ;;  %p2630_p0 = pneg %p2894_p11 }
  0x33   : > { %s2633_s22 = scalar_lea.hbm %s3925_s0, 2048  ;;  %p2634_p7 = scmp.lt.u32.totalorder %s2892_s16, %s3925_s0 }
  0x34   : > { %p2631_p3 = pnand %p2630_p0, %p2629_p13  ;;  %p2635_p9 = scmp.lt.u32.totalorder %s2633_s22, %s2628_s29 }
  0x35   : > { %p2637_p2 = scmp.lt.u32.totalorder %s2628_s29, %s2892_s16 }
  0x36   : > { %p2632_p5 = pneg %p2631_p3  ;;  %p2636_p1 = por %p2635_p9, %p2634_p7 }
  0x38   : > { %p2638_p4 = por %p2637_p2, %p2636_p1 }
  0x3a   : > { %p2639_p6 = pnand %p2638_p4, %p2632_p5 }
  0x3c   : > { %2642 = shalt.err (!%p2639_p6)
}
  0x3d   : > { %s2643_s12 = scalar_lea.vmem %s2898_s14, 1024  ;;  %s2733_s20 = smov [#allocation3]  }
  0x3e   : > { %p2644_p8 = scmp.ne.s32.totalorder %s2898_s14, %s2643_s12  ;;  %s2648_s21 = sshll.u32 %s2733_s20, 4  ;;  %s2649_s21 = int_to_ptr.vmem [resolvable:$false] %s2648_s21 }
  0x3f   : > { %s2650_s23 = scalar_lea.vmem %s2649_s21, 2048  ;;  %p2651_p3 = scmp.lt.s32.totalorder %s2898_s14, %s2649_s21 }
  0x40   : > { %p2646_p10 = pnand %p2644_p8, %p2630_p0  ;;  %p2652_p7 = scmp.lt.s32.totalorder %s2650_s23, %s2643_s12 }
  0x42   : > { %p2647_p13 = pneg %p2646_p10  ;;  %p2653_p9 = por %p2652_p7, %p2651_p3 }
  0x44   : > { %p2654_p1 = pnand %p2653_p9, %p2647_p13 }
  0x46   : > { %2657 = shalt.err (!%p2654_p1)
}
  0x47   : > { %s3968_s29 = smov 128   ;;  %p3969_p0 = scmp.ne.s32.totalorder %s3963_s9, 0 }
  0x48   : > { %2260 = dma.hbm_to_vmem [thread:$0]  (!%p2894_p11), %s2892_s16, 1024, %s2898_s14, %s2900_s17, %s3968_s29, %s3968_s29, %s2732_s10  }
  0x49   : > { %271 = sbr.rel (%p3969_p0) target bundleno = 865 (0x361), region = 48 }
  0x50   : > { %s2934_s22 = sand.u32 1, %s2720_s25   ;;  %p3970_p5 = scmp.ne.s32.totalorder %s3961_s30, 0 }
  0x51   : > { %s2121_s11 = sshll.u32 %s2934_s22, 6  ;;  %s274_s12 = scalar_lea.sflag [#allocation4], %s2934_s22 }
  0x52   : > { %s2940_s15 = scalar_lea.vmem [#allocation3], %s2121_s11 }
  0x53   : > { %2703 = dma.done.wait (%p3970_p5), %s274_s12, 1024  }
  0x54   : > { %2705 = vsyncadd (%p3970_p5), %s274_s12, 4294966272  ;;  %p3971_p11 = scmp.eq.s32.totalorder %s2810_s28, 0 }
  0x56   : > { %2707 = dma.done.wait (%p3971_p11), [#allocation7], 3456   ;;  %p3972_p2 = pmov %p3971_p11 }
  0x57   : > { %v2734_v0 = vmov 0.0|0.0   ;;  %vm2735_vm0 = vmmov 0   ;;  %v3937_v1 = vmov 0.0   ;;  %s2737_s30 = smov 17   ;;  %s2738_s9 = smov 16   ;;  %v2739_v2 = vmov 0  }
  0x58   : > { %2709 = vsyncadd (%p3972_p2), [#allocation7], 4294963840  ;;  %2233 = vmatprep.subr.bf16.mxu0 %v2734_v0  ;;  %2236 = vmatprep.subr.bf16.mxu1 %v2734_v0  ;;  %v337_v3 = vld [vmem:[%s2940_s15] sm:$0xff]  ;;  %v338_v4 = vld [vmem:[%s2940_s15 + $0x8] sm:$0xff]  ;;  %vm339_vm1 = vcmask 130048   ;;  %s2740_s16 = smov 15  }
  0x59   : > { %2189 = vmatprep.mubr.msk.f32.mxu0 %vm2735_vm0, %v3937_v1  ;;  %2196 = vmatprep.mubr.msk.f32.mxu1 %vm2735_vm0, %v3937_v1  ;;  %v2125_v5 = vld [vmem:[%s2940_s15 + $0x10] sm:$0xff]  ;;  %v2234_v6 = vpack.c.bf16 %v338_v4, %v337_v3  ;;  %v2126_v7 = vld [vmem:[%s2940_s15 + $0x18] sm:$0xff]  ;;  %v2128_v8 = vld [vmem:[%s2940_s15 + $0x20] sm:$0xff]  ;;  %s2741_s14 = smov 1   ;;  %s2742_s17 = smov 127   ;;  %vm674_vm2 = vcmask 138240  }
  0x5a   : > { %2319 = vrot.lane.b32.xlu0 %v3937_v1, %s2737_s30  ;;  %2324 = vrot.lane.b32.xlu1 %v3937_v1, %s2738_s9  ;;  %v2237_v9 = vpack.c.bf16 %v2126_v7, %v2125_v5  ;;  %v2129_v10 = vld [vmem:[%s2940_s15 + $0x28] sm:$0xff]  ;;  %v2131_v11 = vld [vmem:[%s2940_s15 + $0x30] sm:$0xff]  ;;  %s2743_s20 = smov 113   ;;  %s2744_s21 = smov 112   ;;  %vm695_vm3 = vcmask 121856   ;;  %vm706_vm4 = vcmask 7168  }
  0x5b   : > { %2328 = vset.pattern.permute.xlu0 %v2739_v2  ;;  %2334 = vset.pattern.permute.xlu1 %v2739_v2  ;;  %v2132_v12 = vld [vmem:[%s2940_s15 + $0x38] sm:$0xff]  ;;  %v330_v13 = vld [vmem:[%s3926_s1] sm:$0xff]  ;;  %v2240_v14 = vpack.c.bf16 %v2129_v10, %v2128_v8  ;;  %v653_v19 = vld [vmem:[%s3931_s6 + $0x8] sm:$0xff]  ;;  %s2745_s23 = smov 111   ;;  %vm722_vm5 = vcmask 1039360   ;;  %vm733_vm6 = vcmask 924672  }
  0x5c   : > { %2235 = vmatpush3.bf16.msra.mxu0 %v2234_v6  ;;  %v331_v15 = vld [vmem:[%s3927_s2] sm:$0xff]  ;;  %2238 = vmatpush3.bf16.msra.mxu1 %v2237_v9  ;;  %v2243_v17 = vpack.c.bf16 %v2132_v12, %v2131_v11  ;;  %vm744_vm7 = vcmask 916480   ;;  %vm755_vm8 = vcmask 908288   ;;  %vm941_vm9 = vcmask 64512   ;;  %s3852_s10 = scalar_lea.vmem [#allocation8], %s2121_s11 }
  0x5d   : > { %v652_v16 = vld [vmem:[%s3931_s6] sm:$0xff]  ;;  %2239 = vmatprep.subr.bf16.mxu0 %v2734_v0  ;;  %2242 = vmatprep.subr.bf16.mxu1 %v2734_v0  ;;  %s2030_s11 = sshll.u32 %s3852_s10, 4  ;;  %s3874_s11 = int_to_ptr.vmem [resolvable:$true] %s2030_s11 }
  0x5e   : > { %334 = vperm.xlu0 %2328, %v331_v15   ;;  %656 = vperm.xlu1 %2334, %v652_v16   ;;  %v644_v18 = vld [vmem:[%s3929_s4] sm:$0xff] }
  0x5f   : > { %2190 = vmatmul.mubr.msk.f32.vlgmr.msra.gmra.mrb[0].mxu0 %vm339_vm1, %v330_v13  ;;  %2197 = vmatmul.mubr.msk.f32.vlgmr.msra.gmra.mrb[0].mxu1 %vm339_vm1, %v330_v13 }
  0x60   : > { %2241 = vmatpush3.bf16.msra.mxu0 %v2240_v14  ;;  %2244 = vmatpush3.bf16.msra.mxu1 %v2243_v17 }
  0x61   : > { %2203 = vmatprep.mubr.msk.f32.mxu0 %vm2735_vm0, %v3937_v1  ;;  %2210 = vmatprep.mubr.msk.f32.mxu1 %vm2735_vm0, %v3937_v1 }
  0x62   : > { %647 = vperm.xlu0 %2328, %v644_v18   ;;  %661 = vperm.xlu1 %2334, %v653_v19   ;;  %v3264_v18 = vld [vmem:[#allocation6] sm:$0xff] }
  0x63   : > { %2204 = vmatmul.mubr.msk.f32.vlgmr.msra.gmra.mrb[2].mxu0 %vm339_vm1, %v330_v13  ;;  %2211 = vmatmul.mubr.msk.f32.vlgmr.msra.gmra.mrb[2].mxu1 %vm339_vm1, %v330_v13 }
  0x66   : > { %2330 = vrot.lane.b32.xlu0 %v3937_v1, %s2740_s16  ;;  %2336 = vrot.lane.b32.xlu1 %v3937_v1, %s2741_s14 }
  0x6a   : > { %2341 = vrot.lane.b32.xlu0 %v3937_v1, %s2742_s17  ;;  %2346 = vrot.lane.b32.xlu1 %v3937_v1, %s2743_s20 }
  0x6e   : > { %2351 = vrot.lane.b32.xlu0 %v3937_v1, %s2744_s21  ;;  %2356 = vrot.lane.b32.xlu1 %v3937_v1, %s2745_s23 }
  0x72   : > { %2361 = vrot.lane.b32.xlu0 %v3937_v1, %s2737_s30  ;;  %2376 = vrot.lane.b32.xlu1 %v3937_v1, %s2741_s14 }
  0x76   : > { %2366 = vrot.lane.b32.xlu0 %v3937_v1, %s2738_s9  ;;  %2381 = vrot.lane.b32.xlu1 %v3937_v1, %s2737_s30 }
  0x7a   : > { %2371 = vrot.lane.b32.xlu0 %v3937_v1, %s2740_s16  ;;  %2386 = vrot.lane.b32.xlu1 %v3937_v1, %s2738_s9 }
  0x7e   : > { %2406 = vrot.lane.b32.xlu0 %v3937_v1, %s2743_s20  ;;  %2391 = vrot.lane.b32.xlu1 %v3937_v1, %s2740_s16 }
  0x82   : > { %2411 = vrot.lane.b32.xlu0 %v3937_v1, %s2744_s21  ;;  %2396 = vrot.lane.b32.xlu1 %v3937_v1, %s2742_s17 }
  0x86   : > { %2426 = vrot.lane.b32.xlu0 %v3937_v1, %s2743_s20  ;;  %2401 = vrot.lane.b32.xlu1 %v3937_v1, %s2741_s14 }
  0x8a   : > { %2441 = vrot.lane.b32.xlu0 %v3937_v1, %s2738_s9  ;;  %2416 = vrot.lane.b32.xlu1 %v3937_v1, %s2742_s17 }
  0x8e   : > { %2446 = vrot.lane.b32.xlu0 %v3937_v1, %s2745_s23  ;;  %2421 = vrot.lane.b32.xlu1 %v3937_v1, %s2745_s23 }
  0x92   : > { %2456 = vrot.lane.b32.xlu0 %v3937_v1, %s2737_s30  ;;  %2431 = vrot.lane.b32.xlu1 %v3937_v1, %s2737_s30 }
  0x96   : > { %2466 = vrot.lane.b32.xlu0 %v3937_v1, %s2738_s9  ;;  %2436 = vrot.lane.b32.xlu1 %v3937_v1, %s2744_s21 }
  0x9a   : > { %2491 = vrot.lane.b32.xlu0 %v3937_v1, %s2744_s21  ;;  %2451 = vrot.lane.b32.xlu1 %v3937_v1, %s2740_s16 }
  0x9e   : > { %2501 = vrot.lane.b32.xlu0 %v3937_v1, %s2745_s23  ;;  %2461 = vrot.lane.b32.xlu1 %v3937_v1, %s2741_s14 }
  0xa2   : > { %2536 = vrot.lane.b32.xlu0 %v3937_v1, %s2737_s30  ;;  %2471 = vrot.lane.b32.xlu1 %v3937_v1, %s2740_s16 }
  0xa6   : > { %2476 = vrot.lane.b32.xlu1 %v3937_v1, %s2742_s17  ;;  %2541 = vrot.lane.b32.xlu0 %v3937_v1, %s2741_s14 }
  0xaa   : > { %2481 = vrot.lane.b32.xlu1 %v3937_v1, %s2741_s14 }
  0xae   : > { %2486 = vrot.lane.b32.xlu1 %v3937_v1, %s2743_s20 }
  0xb2   : > { %2496 = vrot.lane.b32.xlu1 %v3937_v1, %s2742_s17 }
  0xb6   : > { %2506 = vrot.lane.b32.xlu1 %v3937_v1, %s2743_s20 }
  0xba   : > { %2511 = vrot.lane.b32.xlu1 %v3937_v1, %s2737_s30 }
  0xbe   : > { %2516 = vrot.lane.b32.xlu1 %v3937_v1, %s2744_s21 }
  0xc2   : > { %2521 = vrot.lane.b32.xlu1 %v3937_v1, %s2738_s9 }
  0xc6   : > { %2526 = vrot.lane.b32.xlu1 %v3937_v1, %s2745_s23 }
  0xca   : > { %2531 = vrot.lane.b32.xlu1 %v3937_v1, %s2740_s16 }
  0xcc   : > { %v3079_v20 = vpop.permute.xlu1 %2324  ;;  %v3101_v31 = vpop.permute.xlu0 %2319 }
  0xcd   : > { %v2322_v14 = vunpack.i.h.bf16 %v3101_v31  ;;  %v2321_v15 = vunpack.i.l.bf16 %v3101_v31  ;;  %v2327_v16 = vunpack.i.h.bf16 %v3079_v20  ;;  %v2326_v17 = vunpack.i.l.bf16 %v3079_v20 }
  0xce   : > { %2546 = vrot.lane.b32.xlu1 %v3937_v1, %s2738_s9 }
  0xcf   : > { %v675_v19 = vsel %vm674_vm2, %v2321_v15, %v2322_v14  ;;  %v3296_v14 = vld [vmem:[#allocation6 + $0x18] sm:$0xff] }
  0xd2   : > { %2551 = vrot.lane.b32.xlu1 %v3937_v1, %s2740_s16 }
  0xdd   : > { %v3081_v21 = vpop.permute.xlu1 %656  ;;  %v3105_v33 = vpop.permute.xlu0 %334 }
  0xde   : > { %3973 = vst [vmem:[#allocation12_spill] sm:$0xff] %v3081_v21  ;;  %v3363_v21 = vld [vmem:[#allocation6 + $0x48] sm:$0xff] }
  0xe1   : > { %v3083_v22 = vpop.permute.xlu1 %661  ;;  %v3129_v47 = vpop.permute.xlu0 %647 }
  0xe2   : > { %3974 = vst [vmem:[#allocation13_spill] sm:$0xff] %v3083_v22  ;;  %3975 = vst [vmem:[#allocation14_spill] sm:$0xff] %v3129_v47 }
  0xe5   : > { %v3085_v23 = vpop.permute.xlu1 %2336  ;;  %v3139_v50 = vpop.permute.xlu0 %2330 }
  0xe6   : > { %v2333_v31 = vunpack.i.h.bf16 %v3139_v50 }
  0xe9   : > { %v3087_v24 = vpop.permute.xlu1 %2346  ;;  %v3147_v52 = vpop.permute.xlu0 %2341 }
  0xed   : > { %v3089_v25 = vpop.permute.xlu1 %2356  ;;  %v3159_v54 = vpop.permute.xlu0 %2351 }
  0xf1   : > { %v3091_v26 = vpop.permute.xlu1 %2376  ;;  %v3167_v56 = vpop.permute.xlu0 %2361 }
  0xf5   : > { %v3093_v27 = vpop.permute.xlu1 %2381  ;;  %v3179_v58 = vpop.permute.xlu0 %2366 }
  0xf9   : > { %v3095_v28 = vpop.permute.xlu1 %2386  ;;  %v3187_v60 = vpop.permute.xlu0 %2371 }
  0xfd   : > { %v3097_v29 = vpop.permute.xlu1 %2391  ;;  %v3199_v62 = vpop.permute.xlu0 %2406 }
 0x101   : > { %v3099_v30 = vpop.permute.xlu1 %2396  ;;  %v3210_v3 = vpop.permute.xlu0 %2411 }
 0x105   : > { %v3103_v32 = vpop.permute.xlu1 %2401  ;;  %v3222_v5 = vpop.permute.xlu0 %2426 }
 0x109   : > { %v3110_v41 = vpop.permute.xlu1 %2416  ;;  %v3230_v7 = vpop.permute.xlu0 %2441 }
 0x10d   : > { %v3123_v46 = vpop.permute.xlu1 %2421  ;;  %v3244_v10 = vpop.permute.xlu0 %2446 }
 0x111   : > { %v3137_v49 = vpop.permute.xlu1 %2431  ;;  %v3254_v13 = vpop.permute.xlu0 %2456 }
 0x115   : > { %v3145_v51 = vpop.permute.xlu1 %2436 }
 0x119   : > { %v3157_v53 = vpop.permute.xlu1 %2451 }
 0x11d   : > { %v3165_v55 = vpop.permute.xlu1 %2461 }
 0x121   : > { %v3177_v57 = vpop.permute.xlu1 %2471 }
 0x125   : > { %v3185_v59 = vpop.permute.xlu1 %2476 }
 0x129   : > { %v3197_v61 = vpop.permute.xlu1 %2481 }
 0x12d   : > { %v3208_v2 = vpop.permute.xlu1 %2486 }
 0x131   : > { %v3220_v4 = vpop.permute.xlu1 %2496 }
 0x132   : > { %v409_v34 = vpop.f32.mrb[0].mxu0  ;;  %v485_v36 = vpop.f32.mrb[0].mxu1 }
 0x133   : > { %v410_v35 = vadd.f32 %v409_v34, %v3105_v33  ;;  %v2191_v37 = vpop.f32.mrb[1].mxu0  ;;  %v2198_v38 = vpop.f32.mrb[1].mxu1  ;;  %v486_v45 = vadd.f32 %v485_v36, %v3105_v33  ;;  %v685_v34 = vsel %vm339_vm1, %v2326_v17, %v2327_v16  ;;  %v3304_v17 = vld [vmem:[#allocation6 + $0x20] sm:$0xff] }
 0x134   : > { %v3278_v36 = vpop.permute.xlu0 %2466  ;;  %v677_v37 = vmul.f32 %v675_v19, %v3264_v18  ;;  %v2344_v19 = vunpack.i.h.bf16 %v3147_v52 }
 0x135   : > { %v3108_v39 = vmax.f32 %v410_v35, 0.0  ;;  %v3131_v48 = vmax.f32 %v486_v45, 0.0  ;;  %v3228_v6 = vpop.permute.xlu1 %2506  ;;  %v2332_v35 = vunpack.i.l.bf16 %v3139_v50 }
 0x136   : > { %v561_v40 = vpop.f32.mrb[2].mxu0  ;;  %v3112_v42 = vpop.f32.mrb[2].mxu1 }
 0x137   : > { %1039 = vrot.lane.b32.xlu0 %v3108_v39, %s2737_s30  ;;  %769 = vrot.lane.b32.xlu1 %v3108_v39, %s2737_s30  ;;  %v2205_v43 = vpop.f32.mrb[3].mxu0  ;;  %v2212_v44 = vpop.f32.mrb[3].mxu1  ;;  %3976 = vst [vmem:[#allocation15_spill] sm:$0xff] %v3131_v48  ;;  %v562_v63 = vadd.f32 %v561_v40, %v3105_v33  ;;  %v638_v8 = vadd.f32 %v3112_v42, %v3105_v33  ;;  %v3267_v33 = vld [vmem:[#allocation6 + $0x8] sm:$0xff]  ;;  %v3282_v40 = vld [vmem:[#allocation6 + $0x10] sm:$0xff] }
 0x138   : > { %v687_v38 = vmul.f32 %v685_v34, %v3267_v33  ;;  %v696_v42 = vsel %vm695_vm3, %v2332_v35, %v2333_v31  ;;  %v2339_v43 = vunpack.i.h.bf16 %v3085_v23  ;;  %v2338_v44 = vunpack.i.l.bf16 %v3085_v23 }
 0x139   : > { %v3206_v0 = vmax.f32 %v562_v63, 0.0  ;;  %v3242_v9 = vpop.permute.xlu1 %2511  ;;  %v3246_v11 = vmax.f32 %v638_v8, 0.0  ;;  %v698_v50 = vmul.f32 %v696_v42, %v3282_v40  ;;  %v3294_v8 = vpop.permute.xlu0 %2491  ;;  %v2343_v34 = vunpack.i.l.bf16 %v3147_v52  ;;  %v3317_v42 = vld [vmem:[#allocation6 + $0x28] sm:$0xff] }
 0x13a   : > { %v688_v45 = vadd.f32 %v687_v38, %v677_v37  ;;  %v707_v15 = vsel %vm706_vm4, %v2338_v44, %v2339_v43  ;;  %v713_v38 = vmul.f32 0.0, %v3304_v17  ;;  %v2349_v52 = vunpack.i.h.bf16 %v3087_v24 }
 0x13b   : > { %1057 = vrot.lane.b32.xlu0 %v3108_v39, %s2740_s16  ;;  %779 = vrot.lane.b32.xlu1 %v3108_v39, %s2738_s9  ;;  %v709_v16 = vmul.f32 %v707_v15, %v3296_v14  ;;  %v723_v43 = vsel %vm722_vm5, %v2343_v34, %v2344_v19  ;;  %v2348_v44 = vunpack.i.l.bf16 %v3087_v24  ;;  %v2354_v24 = vunpack.i.h.bf16 %v3159_v54 }
 0x13c   : > { %v699_v23 = vadd.f32 %v698_v50, %v688_v45  ;;  %v725_v50 = vmul.f32 %v723_v43, %v3317_v42  ;;  %v2353_v34 = vunpack.i.l.bf16 %v3159_v54  ;;  %v3341_v43 = vld [vmem:[#allocation6 + $0x38] sm:$0xff] }
 0x13d   : > { %v3252_v12 = vpop.permute.xlu1 %2516  ;;  %v3314_v35 = vpop.permute.xlu0 %2501  ;;  %v734_v19 = vsel %vm733_vm6, %v2348_v44, %v2349_v52  ;;  %v2359_v52 = vunpack.i.h.bf16 %v3089_v25  ;;  %v2358_v44 = vunpack.i.l.bf16 %v3089_v25  ;;  %v2363_v25 = vunpack.i.l.bf16 %v3167_v56 }
 0x13e   : > { %3977 = vst [vmem:[#allocation16_spill] sm:$0xff] %v3252_v12  ;;  %v710_v37 = vadd.f32 %v709_v16, %v699_v23  ;;  %v3331_v16 = vld [vmem:[#allocation6 + $0x30] sm:$0xff]  ;;  %v745_v1 = vsel %vm744_vm7, %v2353_v34, %v2354_v24  ;;  %v3356_v34 = vld [vmem:[#allocation6 + $0x40] sm:$0xff] }
 0x13f   : > { %1066 = vrot.lane.b32.xlu0 %v3108_v39, %s2741_s14  ;;  %789 = vrot.lane.b32.xlu1 %v3108_v39, %s2740_s16  ;;  %v756_v24 = vsel %vm755_vm8, %v2358_v44, %v2359_v52  ;;  %v2368_v52 = vunpack.i.l.bf16 %v3179_v58  ;;  %v3373_v44 = vld [vmem:[#allocation6 + $0x50] sm:$0xff] }
 0x140   : > { %v714_v45 = vadd.f32 %v713_v38, %v710_v37  ;;  %v736_v38 = vmul.f32 %v734_v19, %v3331_v16 }
 0x141   : > { %v3276_v20 = vpop.permute.xlu1 %2521  ;;  %v3329_v23 = vpop.permute.xlu0 %2536 }
 0x142   : > { %3978 = vst [vmem:[#allocation17_spill] sm:$0xff] %v3276_v20  ;;  %3982 = vst [vmem:[#allocation21_spill] sm:$0xff] %v3329_v23  ;;  %v726_v37 = vadd.f32 %v725_v50, %v714_v45  ;;  %v747_v50 = vmul.f32 %v745_v1, %v3341_v43 }
 0x143   : > { %1367 = vrot.lane.b32.xlu0 %v3131_v48, %s2737_s30  ;;  %1048 = vrot.lane.b32.xlu1 %v3108_v39, %s2738_s9 }
 0x144   : > { %v737_v19 = vadd.f32 %v736_v38, %v726_v37 }
 0x145   : > { %v3292_v63 = vpop.permute.xlu1 %2526  ;;  %v3352_v45 = vpop.permute.xlu0 %2541 }
 0x146   : > { %3979 = vst [vmem:[#allocation18_spill] sm:$0xff] %v3292_v63  ;;  %3984 = vst [vmem:[#allocation23_spill] sm:$0xff] %v3352_v45  ;;  %v748_v47 = vadd.f32 %v747_v50, %v737_v19  ;;  %v758_v45 = vmul.f32 %v756_v24, %v3356_v34 }
 0x147   : > { %1376 = vrot.lane.b32.xlu0 %v3131_v48, %s2738_s9  ;;  %1086 = vrot.lane.b32.xlu1 %v3108_v39, %s2743_s20 }
 0x149   : > { %v3312_v31 = vpop.permute.xlu1 %2531 }
 0x14a   : > { %3980 = vst [vmem:[#allocation19_spill] sm:$0xff] %v3312_v31 }
 0x14b   : > { %1385 = vrot.lane.b32.xlu0 %v3131_v48, %s2740_s16  ;;  %1095 = vrot.lane.b32.xlu1 %v3108_v39, %s2744_s21 }
 0x14d   : > { %v3327_v15 = vpop.permute.xlu1 %2546 }
 0x14e   : > { %3981 = vst [vmem:[#allocation20_spill] sm:$0xff] %v3327_v15 }
 0x14f   : > { %1077 = vrot.lane.b32.xlu0 %v3108_v39, %s2742_s17  ;;  %1405 = vrot.lane.b32.xlu1 %v3131_v48, %s2742_s17 }
 0x151   : > { %v3350_v54 = vpop.permute.xlu1 %2551 }
 0x152   : > { %3983 = vst [vmem:[#allocation22_spill] sm:$0xff] %v3350_v54  ;;  %v759_v54 = vadd.f32 %v758_v45, %v748_v47  ;;  %v2364_v45 = vunpack.i.h.bf16 %v3167_v56 }
 0x153   : > { %1394 = vrot.lane.b32.xlu0 %v3131_v48, %s2741_s14  ;;  %1423 = vrot.lane.b32.xlu1 %v3131_v48, %s2744_s21 }
 0x157   : > { %1104 = vrot.lane.b32.xlu0 %v3108_v39, %s2745_s23  ;;  %1129 = vrot.lane.b32.xlu1 %v3131_v48, %s2738_s9 }
 0x15b   : > { %1414 = vrot.lane.b32.xlu0 %v3131_v48, %s2743_s20  ;;  %812 = vrot.lane.b32.xlu1 %v3108_v39, %s2742_s17 }
 0x15f   : > { %1120 = vrot.lane.b32.xlu0 %v3131_v48, %s2737_s30  ;;  %822 = vrot.lane.b32.xlu1 %v3108_v39, %s2743_s20 }
 0x163   : > { %1432 = vrot.lane.b32.xlu0 %v3131_v48, %s2745_s23  ;;  %1176 = vrot.lane.b32.xlu1 %v3131_v48, %s2744_s21 }
 0x167   : > { %1138 = vrot.lane.b32.xlu0 %v3131_v48, %s2740_s16  ;;  %1185 = vrot.lane.b32.xlu1 %v3131_v48, %s2745_s23 }
 0x16b   : > { %799 = vrot.lane.b32.xlu0 %v3108_v39, %s2741_s14  ;;  %889 = vrot.lane.b32.xlu1 %v3131_v48, %s2741_s14 }
 0x16f   : > { %1147 = vrot.lane.b32.xlu0 %v3131_v48, %s2741_s14  ;;  %1695 = vrot.lane.b32.xlu1 %v3206_v0, %s2737_s30 }
 0x173   : > { %1158 = vrot.lane.b32.xlu0 %v3131_v48, %s2742_s17  ;;  %1713 = vrot.lane.b32.xlu1 %v3206_v0, %s2740_s16 }
 0x177   : > { %1167 = vrot.lane.b32.xlu0 %v3131_v48, %s2743_s20  ;;  %1742 = vrot.lane.b32.xlu1 %v3206_v0, %s2743_s20 }
 0x17b   : > { %832 = vrot.lane.b32.xlu0 %v3108_v39, %s2744_s21  ;;  %1760 = vrot.lane.b32.xlu1 %v3206_v0, %s2745_s23 }
 0x17f   : > { %842 = vrot.lane.b32.xlu0 %v3108_v39, %s2745_s23  ;;  %1448 = vrot.lane.b32.xlu1 %v3206_v0, %s2737_s30 }
 0x183   : > { %859 = vrot.lane.b32.xlu0 %v3131_v48, %s2737_s30  ;;  %1776 = vrot.lane.b32.xlu1 %v3246_v11, %s2737_s30 }
 0x187   : > { %869 = vrot.lane.b32.xlu0 %v3131_v48, %s2738_s9  ;;  %1457 = vrot.lane.b32.xlu1 %v3206_v0, %s2738_s9 }
 0x18b   : > { %879 = vrot.lane.b32.xlu0 %v3131_v48, %s2740_s16  ;;  %1785 = vrot.lane.b32.xlu1 %v3246_v11, %s2738_s9 }
 0x18f   : > { %1704 = vrot.lane.b32.xlu0 %v3206_v0, %s2738_s9  ;;  %1486 = vrot.lane.b32.xlu1 %v3206_v0, %s2742_s17 }
 0x193   : > { %1722 = vrot.lane.b32.xlu0 %v3206_v0, %s2741_s14  ;;  %1495 = vrot.lane.b32.xlu1 %v3206_v0, %s2743_s20 }
 0x197   : > { %1733 = vrot.lane.b32.xlu0 %v3206_v0, %s2742_s17  ;;  %1504 = vrot.lane.b32.xlu1 %v3206_v0, %s2744_s21 }
 0x19b   : > { %1751 = vrot.lane.b32.xlu0 %v3206_v0, %s2744_s21  ;;  %1513 = vrot.lane.b32.xlu1 %v3206_v0, %s2745_s23 }
 0x19f   : > { %1466 = vrot.lane.b32.xlu0 %v3206_v0, %s2740_s16  ;;  %1529 = vrot.lane.b32.xlu1 %v3246_v11, %s2737_s30 }
 0x1a3   : > { %1794 = vrot.lane.b32.xlu0 %v3246_v11, %s2740_s16  ;;  %1228 = vrot.lane.b32.xlu1 %v3206_v0, %s2741_s14 }
 0x1a7   : > { %1475 = vrot.lane.b32.xlu0 %v3206_v0, %s2741_s14  ;;  %1239 = vrot.lane.b32.xlu1 %v3206_v0, %s2742_s17 }
 0x1a9   : > { %v1040_v22 = vpop.permute.xlu0 %1039  ;;  %v770_v1 = vpop.permute.xlu1 %769 }
 0x1aa   : > { %v771_v37 = vsel %vm674_vm2, %v2363_v25, %v770_v1  ;;  %v2373_v1 = vunpack.i.l.bf16 %v3187_v60 }
 0x1ab   : > { %v773_v38 = vmul.f32 %v771_v37, %v3363_v21  ;;  %1803 = vrot.lane.b32.xlu0 %v3246_v11, %s2741_s14  ;;  %1556 = vrot.lane.b32.xlu1 %v3246_v11, %s2741_s14  ;;  %v3382_v37 = vld [vmem:[#allocation6 + $0x58] sm:$0xff] }
 0x1ad   : > { %v1058_v31 = vpop.permute.xlu0 %1057  ;;  %v780_v50 = vpop.permute.xlu1 %779  ;;  %v774_v24 = vadd.f32 %v773_v38, %v759_v54  ;;  %v3985_v38 = vmov 0.0  }
 0x1ae   : > { %v781_v19 = vsel %vm339_vm1, %v2368_v52, %v780_v50  ;;  %v2369_v50 = vunpack.i.h.bf16 %v3179_v58 }
 0x1af   : > { %v783_v25 = vmul.f32 %v781_v19, %v3373_v44  ;;  %1814 = vrot.lane.b32.xlu0 %v3246_v11, %s2742_s17  ;;  %912 = vrot.lane.b32.xlu1 %v3131_v48, %s2743_s20  ;;  %v2374_v19 = vunpack.i.h.bf16 %v3187_v60 }
 0x1b1   : > { %v784_v15 = vadd.f32 %v783_v25, %v774_v24  ;;  %v1067_v63 = vpop.permute.xlu0 %1066  ;;  %v790_v47 = vpop.permute.xlu1 %789  ;;  %v1041_v24 = vsel %vm674_vm2, %v2364_v45, %v1040_v22  ;;  %v2378_v25 = vunpack.i.l.bf16 %v3091_v26  ;;  %v2388_v22 = vunpack.i.l.bf16 %v3095_v28 }
 0x1b2   : > { %v791_v52 = vsel %vm695_vm3, %v2373_v1, %v790_v47  ;;  %v2383_v47 = vunpack.i.l.bf16 %v3093_v27  ;;  %v1043_v12 = vmul.f32 %v1041_v24, %v3264_v18 }
 0x1b3   : > { %v793_v54 = vmul.f32 %v791_v52, %v3382_v37  ;;  %1823 = vrot.lane.b32.xlu0 %v3246_v11, %s2743_s20  ;;  %2566 = vrot.lane.b32.xlu1 %v3985_v38, %s2743_s20  ;;  %v1059_v52 = vsel %vm695_vm3, %v2374_v19, %v1058_v31  ;;  %v1068_v58 = vsel %vm706_vm4, %v2378_v25, %v1067_v63 }
 0x1b4   : > { %v1061_v31 = vmul.f32 %v1059_v52, %v3282_v40  ;;  %v1070_v19 = vmul.f32 %v1068_v58, %v3296_v14 }
 0x1b5   : > { %v3395_v23 = vadd.f32 %v793_v54, %v784_v15  ;;  %v1368_v56 = vpop.permute.xlu0 %1367  ;;  %v1049_v1 = vpop.permute.xlu1 %1048 }
 0x1b6   : > { %v1050_v20 = vsel %vm339_vm1, %v2369_v50, %v1049_v1  ;;  %v1369_v15 = vsel %vm674_vm2, %v2383_v47, %v1368_v56  ;;  %v2393_v56 = vunpack.i.l.bf16 %v3097_v29 }
 0x1b7   : > { %v1052_v60 = vmul.f32 %v1050_v20, %v3267_v33  ;;  %1201 = vrot.lane.b32.xlu0 %v3206_v0, %s2737_s30  ;;  %1257 = vrot.lane.b32.xlu1 %v3206_v0, %s2744_s21  ;;  %v1371_v20 = vmul.f32 %v1369_v15, %v3264_v18 }
 0x1b9   : > { %v1053_v45 = vadd.f32 %v1052_v60, %v1043_v12  ;;  %v1377_v54 = vpop.permute.xlu0 %1376  ;;  %v1087_v50 = vpop.permute.xlu1 %1086 }
 0x1ba   : > { %v1378_v63 = vsel %vm339_vm1, %v2388_v22, %v1377_v54  ;;  %v2408_v22 = vunpack.i.l.bf16 %v3199_v62 }
 0x1bb   : > { %v1062_v24 = vadd.f32 %v1061_v31, %v1053_v45  ;;  %v1380_v25 = vmul.f32 %v1378_v63, %v3267_v33  ;;  %1832 = vrot.lane.b32.xlu0 %v3246_v11, %s2744_s21  ;;  %1567 = vrot.lane.b32.xlu1 %v3246_v11, %s2742_s17  ;;  %v2398_v33 = vunpack.i.l.bf16 %v3099_v30  ;;  %v1073_v45 = vmul.f32 %v3304_v17, %v3108_v39 }
 0x1bc   : > { %v1090_v63 = vsel %vm733_vm6, %v1087_v50, %v2408_v22 }
 0x1bd   : > { %v1381_v12 = vadd.f32 %v1380_v25, %v1371_v20  ;;  %v1386_v1 = vpop.permute.xlu0 %1385  ;;  %v1096_v47 = vpop.permute.xlu1 %1095  ;;  %v1071_v52 = vadd.f32 %v1070_v19, %v1062_v24  ;;  %v2413_v19 = vunpack.i.l.bf16 %v3210_v3 }
 0x1be   : > { %v1387_v58 = vsel %vm695_vm3, %v2393_v56, %v1386_v1  ;;  %v2379_v56 = vunpack.i.h.bf16 %v3091_v26  ;;  %v1092_v1 = vmul.f32 %v1090_v63, %v3331_v16  ;;  %v2423_v26 = vunpack.i.l.bf16 %v3123_v46 }
 0x1bf   : > { %v1389_v60 = vmul.f32 %v1387_v58, %v3282_v40  ;;  %1210 = vrot.lane.b32.xlu0 %v3206_v0, %s2738_s9  ;;  %932 = vrot.lane.b32.xlu1 %v3131_v48, %s2745_s23  ;;  %v1074_v24 = vadd.f32 %v1073_v45, %v1071_v52 }
 0x1c1   : > { %v1390_v15 = vadd.f32 %v1389_v60, %v1381_v12  ;;  %v1078_v31 = vpop.permute.xlu0 %1077  ;;  %v1406_v54 = vpop.permute.xlu1 %1405  ;;  %v1099_v12 = vsel %vm744_vm7, %v1096_v47, %v2413_v19 }
 0x1c2   : > { %v1081_v20 = vsel %vm722_vm5, %v1078_v31, %v2398_v33  ;;  %v2399_v33 = vunpack.i.h.bf16 %v3099_v30  ;;  %v1101_v22 = vmul.f32 %v1099_v12, %v3341_v43  ;;  %v1401_v30 = vmul.f32 %v3304_v17, %v3131_v48 }
 0x1c3   : > { %v1083_v25 = vmul.f32 %v1081_v20, %v3317_v42  ;;  %1841 = vrot.lane.b32.xlu0 %v3246_v11, %s2745_s23  ;;  %2581 = vrot.lane.b32.xlu1 %v3985_v38, %s2745_s23  ;;  %v2414_v17 = vunpack.i.h.bf16 %v3210_v3  ;;  %v2443_v3 = vunpack.i.l.bf16 %v3230_v7 }
 0x1c4   : > { %v1409_v47 = vsel %vm722_vm5, %v1406_v54, %v2399_v33  ;;  %v2409_v54 = vunpack.i.h.bf16 %v3199_v62  ;;  %v2433_v62 = vunpack.i.l.bf16 %v3137_v49 }
 0x1c5   : > { %v1084_v58 = vadd.f32 %v1083_v25, %v1074_v24  ;;  %v1395_v60 = vpop.permute.xlu0 %1394  ;;  %v1424_v50 = vpop.permute.xlu1 %1423 }
 0x1c6   : > { %v1396_v52 = vsel %vm706_vm4, %v2379_v56, %v1395_v60  ;;  %v1427_v33 = vsel %vm744_vm7, %v1424_v50, %v2414_v17 }
 0x1c7   : > { %v1093_v31 = vadd.f32 %v1092_v1, %v1084_v58  ;;  %v1398_v45 = vmul.f32 %v1396_v52, %v3296_v14  ;;  %1219 = vrot.lane.b32.xlu0 %v3206_v0, %s2740_s16  ;;  %2586 = vrot.lane.b32.xlu1 %v3985_v38, %s2743_s20  ;;  %v1411_v14 = vmul.f32 %v1409_v47, %v3317_v42 }
 0x1c9   : > { %v1399_v19 = vadd.f32 %v1398_v45, %v1390_v15  ;;  %v1105_v63 = vpop.permute.xlu0 %1104  ;;  %v1102_v20 = vadd.f32 %v1101_v22, %v1093_v31  ;;  %v1130_v24 = vpop.permute.xlu1 %1129  ;;  %v1429_v22 = vmul.f32 %v1427_v33, %v3341_v43  ;;  %v2404_v33 = vunpack.i.h.bf16 %v3103_v32 }
 0x1ca   : > { %v1108_v25 = vsel %vm755_vm8, %v1105_v63, %v2423_v26  ;;  %v1131_v50 = vsel %vm339_vm1, %v2443_v3, %v1130_v24  ;;  %v2424_v63 = vunpack.i.h.bf16 %v3123_v46 }
 0x1cb   : > { %v1402_v56 = vadd.f32 %v1401_v30, %v1399_v19  ;;  %v1110_v12 = vmul.f32 %v1108_v25, %v3356_v34  ;;  %1538 = vrot.lane.b32.xlu0 %v3246_v11, %s2738_s9  ;;  %2591 = vrot.lane.b32.xlu1 %v3985_v38, %s2744_s21 }
 0x1cd   : > { %v1111_v15 = vadd.f32 %v1110_v12, %v1102_v20  ;;  %v1415_v1 = vpop.permute.xlu0 %1414  ;;  %v1412_v58 = vadd.f32 %v1411_v14, %v1402_v56  ;;  %v813_v60 = vpop.permute.xlu1 %812  ;;  %v1133_v20 = vmul.f32 %v1131_v50, %v3373_v44 }
 0x1ce   : > { %v1418_v42 = vsel %vm733_vm6, %v1415_v1, %v2409_v54  ;;  %v2453_v54 = vunpack.i.l.bf16 %v3157_v53 }
 0x1cf   : > { %v1420_v52 = vmul.f32 %v1418_v42, %v3331_v16  ;;  %1547 = vrot.lane.b32.xlu0 %v3246_v11, %s2740_s16  ;;  %2596 = vrot.lane.b32.xlu1 %v3985_v38, %s2745_s23  ;;  %v3490_v42 = vld [vmem:[#allocation6 + $0x60] sm:$0xff]  ;;  %s2160_s16 = sshll.u32 %s2810_s28, 10  ;;  %s2746_s28 = smov [#allocation8]  }
 0x1d1   : > { %v1421_v31 = vadd.f32 %v1420_v52, %v1412_v58  ;;  %v1121_v45 = vpop.permute.xlu0 %1120  ;;  %v823_v26 = vpop.permute.xlu1 %822 }
 0x1d2   : > { %v1122_v47 = vsel %vm674_vm2, %v2433_v62, %v1121_v45 }
 0x1d3   : > { %v1124_v30 = vmul.f32 %v1122_v47, %v3363_v21  ;;  %902 = vrot.lane.b32.xlu0 %v3131_v48, %s2742_s17  ;;  %v1430_v19 = vadd.f32 %v1429_v22, %v1421_v31  ;;  %v2419_v22 = vunpack.i.h.bf16 %v3110_v41  ;;  %v3495_v31 = vld [vmem:[#allocation6 + $0x68] sm:$0xff]  ;;  %v2463_v47 = vunpack.i.l.bf16 %v3165_v55 }
 0x1d5   : > { %v1125_v25 = vadd.f32 %v1124_v30, %v1111_v15  ;;  %v1433_v14 = vpop.permute.xlu0 %1432  ;;  %v1177_v43 = vpop.permute.xlu1 %1176  ;;  %v2429_v30 = vunpack.i.h.bf16 %v3222_v5 }
 0x1d6   : > { %v1436_v56 = vsel %vm755_vm8, %v1433_v14, %v2424_v63  ;;  %v816_v63 = vsel %vm722_vm5, %v813_v60, %v2419_v22 }
 0x1d7   : > { %v1438_v12 = vmul.f32 %v1436_v56, %v3356_v34  ;;  %2556 = vrot.lane.b32.xlu0 %v3985_v38, %s2742_s17  ;;  %v1134_v24 = vadd.f32 %v1133_v20, %v1125_v25  ;;  %v807_v25 = vmul.f32 %v3495_v31, %v3108_v39 }
 0x1d9   : > { %v3483_v17 = vadd.f32 %v1438_v12, %v1430_v19  ;;  %v1139_v1 = vpop.permute.xlu0 %1138  ;;  %v1186_v58 = vpop.permute.xlu1 %1185  ;;  %v3503_v19 = vld [vmem:[#allocation6 + $0x70] sm:$0xff]  ;;  %v3514_v12 = vld [vmem:[%s3930_s5] sm:$0xff] }
 0x1da   : > { %v1140_v46 = vsel %vm695_vm3, %v2453_v54, %v1139_v1  ;;  %3986 = vst [vmem:[#allocation24_spill] sm:$0xff] %v3514_v12  ;;  %v826_v54 = vsel %vm733_vm6, %v823_v26, %v2429_v30  ;;  %2215 = vmatprep.mubr.msk.f32.mxu0 %vm941_vm9, %v3514_v12  ;;  %2220 = vmatprep.mubr.msk.f32.mxu1 %vm941_vm9, %v3514_v12  ;;  %v3596_v12 = vld [vmem:[#allocation6 + $0xa8] sm:$0xff] }
 0x1db   : > { %v1142_v15 = vmul.f32 %v1140_v46, %v3382_v37  ;;  %2561 = vrot.lane.b32.xlu0 %v3985_v38, %s2741_s14  ;;  %v818_v39 = vmul.f32 %v816_v63, %v3503_v19  ;;  %v2478_v46 = vunpack.i.l.bf16 %v3185_v59  ;;  %3991 = vst [vmem:[#allocation29_spill] sm:$0xff] %v3596_v12 }
 0x1dd   : > { %v1143_v52 = vadd.f32 %v1142_v15, %v1134_v24  ;;  %v800_v62 = vpop.permute.xlu0 %799  ;;  %v3492_v3 = vpop.permute.xlu1 %889  ;;  %v3516_v24 = vld [vmem:[#allocation6 + $0x78] sm:$0xff] }
 0x1de   : > { %v801_v45 = vsel %vm706_vm4, %v2404_v33, %v800_v62  ;;  %v828_v26 = vmul.f32 %v826_v54, %v3516_v24  ;;  %v1154_v33 = vmul.f32 %v3495_v31, %v3131_v48 }
 0x1df   : > { %v803_v50 = vmul.f32 %v801_v45, %v3490_v42  ;;  %1248 = vrot.lane.b32.xlu0 %v3206_v0, %s2743_s20 }
 0x1e1   : > { %v804_v20 = vadd.f32 %v803_v50, %v3395_v23  ;;  %v1148_v14 = vpop.permute.xlu0 %1147  ;;  %v3509_v56 = vpop.permute.xlu1 %1695 }
 0x1e2   : > { %v1149_v60 = vsel %vm706_vm4, %v2463_v47, %v1148_v14 }
 0x1e3   : > { %v808_v23 = vadd.f32 %v807_v25, %v804_v20  ;;  %v1151_v1 = vmul.f32 %v1149_v60, %v3490_v42  ;;  %922 = vrot.lane.b32.xlu0 %v3131_v48, %s2744_s21  ;;  %v2488_v20 = vunpack.i.l.bf16 %v3208_v2  ;;  %v2503_v60 = vunpack.i.l.bf16 %v3314_v35 }
 0x1e4   : > { %v2389_v48 = vunpack.i.h.bf16 %v3095_v28 }
 0x1e5   : > { %v1152_v15 = vadd.f32 %v1151_v1, %v1143_v52  ;;  %v1159_v62 = vpop.permute.xlu0 %1158  ;;  %v3532_v22 = vpop.permute.xlu1 %1713  ;;  %v819_v45 = vadd.f32 %v818_v39, %v808_v23  ;;  %v2493_v52 = vunpack.i.l.bf16 %v3294_v8  ;;  %v3543_v39 = vld [vmem:[#allocation6 + $0x80] sm:$0xff] }
 0x1e6   : > { %v1162_v50 = vsel %vm722_vm5, %v1159_v62, %v2478_v46 }
 0x1e7   : > { %v1155_v47 = vadd.f32 %v1154_v33, %v1152_v15  ;;  %v1164_v30 = vmul.f32 %v1162_v50, %v3503_v19  ;;  %2571 = vrot.lane.b32.xlu0 %v3985_v38, %s2744_s21  ;;  %v829_v63 = vadd.f32 %v828_v26, %v819_v45  ;;  %v1180_v23 = vsel %vm744_vm7, %v1177_v43, %v2493_v52  ;;  %v3551_v15 = vld [vmem:[#allocation6 + $0x88] sm:$0xff] }
 0x1e8   : > { %v2439_v26 = vunpack.i.h.bf16 %v3145_v51  ;;  %3987 = vst [vmem:[#allocation25_spill] sm:$0xff] %v3551_v15  ;;  %v1189_v33 = vsel %vm755_vm8, %v1186_v58, %v2503_v60  ;;  %v1182_v62 = vmul.f32 %v1180_v23, %v3543_v39 }
 0x1e9   : > { %v1165_v25 = vadd.f32 %v1164_v30, %v1155_v47  ;;  %v1168_v14 = vpop.permute.xlu0 %1167  ;;  %v3540_v54 = vpop.permute.xlu1 %1742  ;;  %v1191_v30 = vmul.f32 %v1189_v33, %v3551_v15 }
 0x1ea   : > { %v1171_v1 = vsel %vm733_vm6, %v1168_v14, %v2488_v20 }
 0x1eb   : > { %v1173_v46 = vmul.f32 %v1171_v1, %v3516_v24  ;;  %2576 = vrot.lane.b32.xlu0 %v3985_v38, %s2742_s17  ;;  %v2449_v38 = vunpack.i.h.bf16 %v3244_v10 }
 0x1ed   : > { %v1174_v45 = vadd.f32 %v1173_v46, %v1165_v25  ;;  %v833_v50 = vpop.permute.xlu0 %832  ;;  %v3555_v47 = vpop.permute.xlu1 %1760  ;;  %v2459_v46 = vunpack.i.h.bf16 %v3254_v13 }
 0x1ee   : > { %v836_v43 = vsel %vm744_vm7, %v833_v50, %v2439_v26 }
 0x1ef   : > { %v1183_v20 = vadd.f32 %v1182_v62, %v1174_v45  ;;  %v838_v52 = vmul.f32 %v3543_v39, %v836_v43  ;;  %1266 = vrot.lane.b32.xlu0 %v3206_v0, %s2745_s23  ;;  %v3574_v45 = vld [vmem:[#allocation6 + $0x90] sm:$0xff]  ;;  %v2469_v43 = vunpack.i.h.bf16 %v3278_v36 }
 0x1f0   : > { %3989 = vst [vmem:[#allocation27_spill] sm:$0xff] %v3574_v45 }
 0x1f1   : > { %v839_v14 = vadd.f32 %v838_v52, %v829_v63  ;;  %v843_v58 = vpop.permute.xlu0 %842  ;;  %v3563_v60 = vpop.permute.xlu1 %1448  ;;  %v3565_v25 = vadd.f32 %v1191_v30, %v1183_v20 }
 0x1f2   : > { %v846_v23 = vsel %vm755_vm8, %v843_v58, %v2449_v38  ;;  %v3583_v38 = vld [vmem:[#allocation6 + $0x98] sm:$0xff] }
 0x1f3   : > { %3988 = vst [vmem:[#allocation26_spill] sm:$0xff] %v3565_v25  ;;  %v848_v1 = vmul.f32 %v3551_v15, %v846_v23  ;;  %1576 = vrot.lane.b32.xlu0 %v3246_v11, %s2743_s20  ;;  %3990 = vst [vmem:[#allocation28_spill] sm:$0xff] %v3583_v38  ;;  %v2474_v23 = vunpack.i.h.bf16 %v3177_v57  ;;  %s3879_s20 = scalar_lea.hbm %s3932_s7, %s2160_s16 }
 0x1f5   : > { %v849_v26 = vadd.f32 %v848_v1, %v839_v14  ;;  %v860_v33 = vpop.permute.xlu0 %859  ;;  %v3572_v62 = vpop.permute.xlu1 %1776  ;;  %v2484_v1 = vunpack.i.h.bf16 %v3197_v61 }
 0x1f6   : > { %v861_v63 = vsel %vm674_vm2, %v2459_v46, %v860_v33 }
 0x1f7   : > { %v863_v50 = vmul.f32 %v861_v63, %v3574_v45  ;;  %1585 = vrot.lane.b32.xlu0 %v3246_v11, %s2744_s21  ;;  %s2658_s21 = scalar_lea.vmem %s3874_s11, 1024 }
 0x1f8   : > { %p2659_p4 = scmp.ne.s32.totalorder %s3874_s11, %s2658_s21 }
 0x1f9   : > { %v864_v30 = vadd.f32 %v863_v50, %v849_v26  ;;  %v870_v20 = vpop.permute.xlu0 %869  ;;  %v3581_v52 = vpop.permute.xlu1 %1457  ;;  %v2384_v26 = vunpack.i.h.bf16 %v3093_v27  ;;  %v3594_v50 = vld [vmem:[#allocation6 + $0xa0] sm:$0xff] }
 0x1fa   : > { %v871_v14 = vsel %vm339_vm1, %v2469_v43, %v870_v20  ;;  %v891_v43 = vsel %vm706_vm4, %v2484_v1, %v3492_v3  ;;  %p2660_p6 = pnand %p2659_p4, %p2883_p12 }
 0x1fb   : > { %v873_v58 = vmul.f32 %v3583_v38, %v871_v14  ;;  %1594 = vrot.lane.b32.xlu0 %v3246_v11, %s2745_s23  ;;  %v1701_v38 = vld [vmem:[#allocation6 + $0x8] sm:$0xff]  ;;  %v893_v27 = vmul.f32 %v891_v43, %v3596_v12  ;;  %v1728_v12 = vld [vmem:[#allocation6 + $0x20] sm:$0xff]  ;;  %s2662_s23 = sshll.u32 %s2746_s28, 4  ;;  %s2663_s23 = int_to_ptr.vmem [resolvable:$false] %s2662_s23 }
 0x1fc   : > { %p2661_p8 = pneg %p2660_p6  ;;  %s2664_s30 = scalar_lea.vmem %s2663_s23, 2048 }
 0x1fd   : > { %v874_v46 = vadd.f32 %v873_v58, %v864_v30  ;;  %v880_v33 = vpop.permute.xlu0 %879  ;;  %v3591_v63 = vpop.permute.xlu1 %1785  ;;  %v2394_v30 = vunpack.i.h.bf16 %v3097_v29  ;;  %v1697_v58 = vsel %vm674_vm2, %v2384_v26, %v3509_v56  ;;  %v1719_v56 = vld [vmem:[#allocation6 + $0x18] sm:$0xff]  ;;  %p2665_p10 = scmp.lt.s32.totalorder %s3874_s11, %s2663_s23  ;;  %p2666_p13 = scmp.lt.s32.totalorder %s2664_s30, %s2658_s21 }
 0x1fe   : > { %v881_v20 = vsel %vm695_vm3, %v2474_v23, %v880_v33  ;;  %v1699_v1 = vmul.f32 %v1697_v58, %v3264_v18  ;;  %v2403_v33 = vunpack.i.l.bf16 %v3103_v32  ;;  %v2428_v18 = vunpack.i.l.bf16 %v3222_v5 }
 0x1ff   : > { %v883_v14 = vmul.f32 %v3594_v50, %v881_v20  ;;  %v1715_v3 = vsel %vm695_vm3, %v2394_v30, %v3532_v22  ;;  %v1729_v32 = vmul.f32 %v1728_v12, %v3206_v0  ;;  %v2434_v12 = vunpack.i.h.bf16 %v3137_v49  ;;  %p2667_p3 = por %p2666_p13, %p2665_p10 }
 0x200   : > { %v1717_v26 = vmul.f32 %v1715_v3, %v3282_v40  ;;  %v1746_v40 = vsel %vm733_vm6, %v3540_v54, %v2428_v18  ;;  %v2454_v49 = vunpack.i.h.bf16 %v3157_v53  ;;  %v2473_v53 = vunpack.i.l.bf16 %v3177_v57 }
 0x201   : > { %v884_v25 = vadd.f32 %v883_v14, %v874_v46  ;;  %v1705_v45 = vpop.permute.xlu0 %1704  ;;  %v3607_v15 = vpop.permute.xlu1 %1486  ;;  %v1748_v5 = vmul.f32 %v1746_v40, %v3331_v16  ;;  %p2668_p7 = pnand %p2667_p3, %p2661_p8 }
 0x202   : > { %v1706_v23 = vsel %vm339_vm1, %v2389_v48, %v1705_v45  ;;  %v2418_v48 = vunpack.i.l.bf16 %v3110_v41  ;;  %v2448_v41 = vunpack.i.l.bf16 %v3244_v10  ;;  %v1450_v10 = vsel %vm674_vm2, %v2434_v12, %v3563_v60 }
 0x203   : > { %v3613_v28 = vadd.f32 %v893_v27, %v884_v25  ;;  %v1708_v29 = vmul.f32 %v1706_v23, %v1701_v38  ;;  %v1731_v25 = vld [vmem:[#allocation6 + $0x28] sm:$0xff] }
 0x205   : > { %v1709_v43 = vadd.f32 %v1708_v29, %v1699_v1  ;;  %v1723_v46 = vpop.permute.xlu0 %1722  ;;  %v3617_v20 = vpop.permute.xlu1 %1495  ;;  %v2438_v1 = vunpack.i.l.bf16 %v3145_v51  ;;  %v1750_v29 = vld [vmem:[#allocation6 + $0x38] sm:$0xff]  ;;  %v2458_v51 = vunpack.i.l.bf16 %v3254_v13  ;;  %v2468_v13 = vunpack.i.l.bf16 %v3278_v36 }
 0x206   : > { %v1724_v14 = vsel %vm706_vm4, %v2403_v33, %v1723_v46  ;;  %v2464_v36 = vunpack.i.h.bf16 %v3165_v55  ;;  %v2483_v55 = vunpack.i.l.bf16 %v3197_v61 }
 0x207   : > { %v1718_v22 = vadd.f32 %v1717_v26, %v1709_v43  ;;  %v1726_v30 = vmul.f32 %v1724_v14, %v1719_v56  ;;  %v1764_v26 = vsel %vm755_vm8, %v3555_v47, %v2448_v41  ;;  %v1778_v47 = vsel %vm674_vm2, %v2458_v51, %v3572_v62 }
 0x208   : > { %v1766_v16 = vmul.f32 %v1764_v26, %v3356_v34  ;;  %v1780_v60 = vmul.f32 %v1778_v47, %v3363_v21  ;;  %v1787_v62 = vsel %vm339_vm1, %v2468_v13, %v3591_v63  ;;  %v2479_v41 = vunpack.i.h.bf16 %v3185_v59 }
 0x209   : > { %v1727_v45 = vadd.f32 %v1726_v30, %v1718_v22  ;;  %v1734_v38 = vpop.permute.xlu0 %1733  ;;  %v3623_v58 = vpop.permute.xlu1 %1504  ;;  %v2444_v22 = vunpack.i.h.bf16 %v3230_v7  ;;  %v1482_v59 = vmul.f32 %v3495_v31, %v3206_v0  ;;  %v2504_v51 = vunpack.i.h.bf16 %v3314_v35 }
 0x20a   : > { %v1737_v27 = vsel %vm722_vm5, %v1734_v38, %v2418_v48  ;;  %v2514_v47 = vunpack.i.h.bf16 %v3242_v9  ;;  %v2508_v13 = vunpack.i.l.bf16 %v3228_v6 }
 0x20b   : > { %v1730_v3 = vadd.f32 %v1729_v32, %v1727_v45  ;;  %v1739_v23 = vmul.f32 %v1737_v27, %v1731_v25  ;;  %v1459_v18 = vsel %vm339_vm1, %v2444_v22, %v3581_v52  ;;  %v1452_v25 = vmul.f32 %v1450_v10, %v3363_v21 }
 0x20c   : > { %v1461_v34 = vmul.f32 %v1459_v18, %v3373_v44  ;;  %v1789_v21 = vmul.f32 %v1787_v62, %v3373_v44  ;;  %v1490_v44 = vsel %vm722_vm5, %v3607_v15, %v2479_v41  ;;  %v2498_v15 = vunpack.i.l.bf16 %v3220_v4  ;;  %v3993_v62 = vld [vmem:[#allocation27_spill] sm:$0xff]  ;;  %v3994_v41 = vld [vmem:[#allocation16_spill] sm:$0xff] }
 0x20d   : > { %v1740_v33 = vadd.f32 %v1739_v23, %v1730_v3  ;;  %v1752_v56 = vpop.permute.xlu0 %1751  ;;  %v1514_v14 = vpop.permute.xlu1 %1513  ;;  %v1453_v52 = vadd.f32 %v1452_v25, %v3483_v17 }
 0x20e   : > { %v1755_v54 = vsel %vm744_vm7, %v1752_v56, %v2438_v1  ;;  %v2489_v56 = vunpack.i.h.bf16 %v3208_v2 }
 0x20f   : > { %v1749_v43 = vadd.f32 %v1748_v5, %v1740_v33  ;;  %v1757_v46 = vmul.f32 %v1755_v54, %v1750_v29  ;;  %v1462_v23 = vadd.f32 %v1461_v34, %v1453_v52  ;;  %v2494_v54 = vunpack.i.h.bf16 %v3294_v8 }
 0x211   : > { %v1758_v30 = vadd.f32 %v1757_v46, %v1749_v43  ;;  %v1467_v48 = vpop.permute.xlu0 %1466  ;;  %v1530_v38 = vpop.permute.xlu1 %1529  ;;  %v1492_v46 = vmul.f32 %v1490_v44, %v3503_v19  ;;  %v1508_v10 = vsel %vm744_vm7, %v3623_v58, %v2494_v54 }
 0x212   : > { %v1468_v45 = vsel %vm695_vm3, %v2454_v49, %v1467_v48  ;;  %v1810_v48 = vmul.f32 %v3495_v31, %v3246_v11  ;;  %v1510_v35 = vmul.f32 %v1508_v10, %v3543_v39 }
 0x213   : > { %v1767_v7 = vadd.f32 %v1766_v16, %v1758_v30  ;;  %v1470_v40 = vmul.f32 %v1468_v45, %v3382_v37  ;;  %v1531_v45 = vsel %vm674_vm2, %v2514_v47, %v1530_v38 }
 0x215   : > { %v1795_v32 = vpop.permute.xlu0 %1794  ;;  %v1781_v27 = vadd.f32 %v1780_v60, %v1767_v7  ;;  %v1471_v29 = vadd.f32 %v1470_v40, %v1462_v23  ;;  %v3661_v17 = vpop.permute.xlu1 %1228  ;;  %v3992_v60 = vld [vmem:[#allocation25_spill] sm:$0xff] }
 0x216   : > { %v1796_v3 = vsel %vm695_vm3, %v2473_v53, %v1795_v32 }
 0x217   : > { %v1790_v5 = vadd.f32 %v1789_v21, %v1781_v27  ;;  %v1798_v63 = vmul.f32 %v1796_v3, %v3382_v37  ;;  %v1499_v37 = vsel %vm733_vm6, %v3617_v20, %v2489_v56  ;;  %v3996_v56 = vld [vmem:[#allocation17_spill] sm:$0xff] }
 0x218   : > { %v1501_v8 = vmul.f32 %v1499_v37, %v3516_v24  ;;  %v2523_v44 = vunpack.i.l.bf16 %v3996_v56 }
 0x219   : > { %v1476_v1 = vpop.permute.xlu0 %1475  ;;  %v1799_v61 = vadd.f32 %v1798_v63, %v1790_v5  ;;  %v3681_v30 = vpop.permute.xlu1 %1239  ;;  %v3995_v5 = vld [vmem:[#allocation26_spill] sm:$0xff] }
 0x21a   : > { %v1477_v57 = vsel %vm706_vm4, %v2464_v36, %v1476_v1 }
 0x21b   : > { %v1479_v33 = vmul.f32 %v1477_v57, %v3490_v42  ;;  %v2518_v57 = vunpack.i.l.bf16 %v3994_v41 }
 0x21d   : > { %v1480_v12 = vadd.f32 %v1479_v33, %v1471_v29  ;;  %v1804_v26 = vpop.permute.xlu0 %1803  ;;  %v3695_v52 = vpop.permute.xlu1 %1556 }
 0x21e   : > { %v1805_v43 = vsel %vm706_vm4, %v2483_v55, %v1804_v26 }
 0x21f   : > { %v1483_v22 = vadd.f32 %v1482_v59, %v1480_v12  ;;  %v1807_v2 = vmul.f32 %v1805_v43, %v3490_v42  ;;  %v1517_v42 = vsel %vm755_vm8, %v1514_v14, %v2504_v51  ;;  %v1533_v14 = vmul.f32 %v1531_v45, %v3993_v62  ;;  %v3997_v59 = vld [vmem:[#allocation21_spill] sm:$0xff] }
 0x220   : > { %v1519_v34 = vmul.f32 %v1517_v42, %v3992_v60  ;;  %v2539_v26 = vunpack.i.h.bf16 %v3997_v59  ;;  %v2538_v54 = vunpack.i.l.bf16 %v3997_v59 }
 0x221   : > { %v1493_v16 = vadd.f32 %v1492_v46, %v1483_v22  ;;  %v1808_v20 = vadd.f32 %v1807_v2, %v1799_v61  ;;  %v1815_v49 = vpop.permute.xlu0 %1814  ;;  %v913_v29 = vpop.permute.xlu1 %912  ;;  %v3998_v46 = vld [vmem:[#allocation28_spill] sm:$0xff]  ;;  %v3999_v22 = vld [vmem:[#allocation18_spill] sm:$0xff] }
 0x222   : > { %v1818_v18 = vsel %vm722_vm5, %v1815_v49, %v2498_v15  ;;  %v2528_v2 = vunpack.i.l.bf16 %v3999_v22  ;;  %v4000_v15 = vld [vmem:[#allocation20_spill] sm:$0xff]  ;;  %v4001_v49 = vld [vmem:[#allocation19_spill] sm:$0xff] }
 0x223   : > { %v1502_v25 = vadd.f32 %v1501_v8, %v1493_v16  ;;  %v1811_v58 = vadd.f32 %v1810_v48, %v1808_v20  ;;  %v1820_v7 = vmul.f32 %v1818_v18, %v3503_v19  ;;  %v2513_v19 = vunpack.i.l.bf16 %v3242_v9 }
 0x224   : > { %v2549_v51 = vunpack.i.h.bf16 %v4000_v15  ;;  %v1860_v16 = vsel %vm674_vm2, %v2538_v54, %v2539_v26  ;;  %v2533_v47 = vunpack.i.l.bf16 %v4001_v49 }
 0x225   : > { %v1824_v31 = vpop.permute.xlu0 %1823  ;;  %v1511_v32 = vadd.f32 %v1510_v35, %v1502_v25  ;;  %v1821_v40 = vadd.f32 %v1820_v7, %v1811_v58  ;;  %v3709_v43 = vpop.permute.xlu1 %2566  ;;  %v1862_v35 = vmul.f32 %v1860_v16, %v3993_v62  ;;  %v2519_v16 = vunpack.i.h.bf16 %v3994_v41 }
 0x226   : > { %v1827_v53 = vsel %vm733_vm6, %v1824_v31, %v2508_v13  ;;  %v2524_v31 = vunpack.i.h.bf16 %v3996_v56  ;;  %v3746_v56 = vld [vmem:[#allocation6 + $0xc0] sm:$0xff] }
 0x227   : > { %v1829_v27 = vmul.f32 %v1827_v53, %v3516_v24  ;;  %v1520_v36 = vadd.f32 %v1519_v34, %v1511_v32 }
 0x229   : > { %v1830_v3 = vadd.f32 %v1829_v27, %v1821_v40  ;;  %v1202_v23 = vpop.permute.xlu0 %1201  ;;  %v1534_v21 = vadd.f32 %v1533_v14, %v1520_v36  ;;  %v3720_v18 = vpop.permute.xlu1 %1257  ;;  %v2534_v27 = vunpack.i.h.bf16 %v4001_v49 }
 0x22a   : > { %v1203_v38 = vsel %vm674_vm2, %v2513_v19, %v1202_v23  ;;  %v3735_v23 = vld [vmem:[#allocation6 + $0xb0] sm:$0xff] }
 0x22b   : > { %v1205_v1 = vmul.f32 %v1203_v38, %v3993_v62 }
 0x22d   : > { %v1206_v63 = vadd.f32 %v1205_v1, %v3995_v5  ;;  %v1833_v33 = vpop.permute.xlu0 %1832  ;;  %v3730_v40 = vpop.permute.xlu1 %1567  ;;  %v2499_v1 = vunpack.i.h.bf16 %v3220_v4  ;;  %v3740_v5 = vld [vmem:[#allocation6 + $0xb8] sm:$0xff] }
 0x22e   : > { %v1836_v55 = vsel %vm744_vm7, %v1833_v33, %v2518_v57  ;;  %v2509_v57 = vunpack.i.h.bf16 %v3228_v6 }
 0x22f   : > { %v1838_v24 = vmul.f32 %v1836_v55, %v3543_v39  ;;  %v2548_v39 = vunpack.i.l.bf16 %v4000_v15  ;;  %v4002_v55 = vld [vmem:[#allocation15_spill] sm:$0xff] }
 0x231   : > { %v1839_v9 = vadd.f32 %v1838_v24, %v1830_v3  ;;  %v1211_v12 = vpop.permute.xlu0 %1210  ;;  %v1869_v42 = vsel %vm339_vm1, %v2548_v39, %v2549_v51  ;;  %v897_v24 = vmul.f32 %v3735_v23, %v4002_v55  ;;  %v4004_v39 = vld [vmem:[#allocation23_spill] sm:$0xff]  ;;  %v1892_v55 = vmul.f32 0.0, %v3735_v23 }
 0x232   : > { %v1212_v37 = vsel %vm339_vm1, %v2523_v44, %v1211_v12  ;;  %v1871_v13 = vmul.f32 %v1869_v42, %v3998_v46  ;;  %v916_v44 = vsel %vm733_vm6, %v913_v29, %v2509_v57  ;;  %v1235_v57 = vmul.f32 %v3735_v23, %v3206_v0 }
 0x233   : > { %v1214_v61 = vmul.f32 %v3998_v46, %v1212_v37  ;;  %v898_v12 = vadd.f32 %v897_v24, %v3613_v28  ;;  %v918_v6 = vmul.f32 %v916_v44, %v3746_v56 }
 0x235   : > { %v1215_v10 = vadd.f32 %v1214_v61, %v1206_v63  ;;  %v1842_v8 = vpop.permute.xlu0 %1841  ;;  %v933_v63 = vpop.permute.xlu1 %932 }
 0x236   : > { %v1845_v20 = vsel %vm755_vm8, %v1842_v8, %v2528_v2  ;;  %v4003_v2 = vld [vmem:[#allocation22_spill] sm:$0xff] }
 0x237   : > { %v1847_v48 = vmul.f32 %v1845_v20, %v3992_v60  ;;  %v2554_v15 = vunpack.i.h.bf16 %v4003_v2  ;;  %v2553_v29 = vunpack.i.l.bf16 %v4003_v2  ;;  %v2529_v20 = vunpack.i.h.bf16 %v3999_v22 }
 0x239   : > { %v1848_v25 = vadd.f32 %v1847_v48, %v1839_v9  ;;  %v1220_v58 = vpop.permute.xlu0 %1219  ;;  %v3755_v54 = vpop.permute.xlu1 %2581  ;;  %v1878_v42 = vsel %vm695_vm3, %v2553_v29, %v2554_v15  ;;  %v3800_v29 = vld [vmem:[%s3930_s5 + $0x8] sm:$0xff] }
 0x23a   : > { %v1221_v7 = vsel %vm695_vm3, %v2533_v47, %v1220_v58  ;;  %v3765_v47 = vld [vmem:[#allocation6 + $0xc8] sm:$0xff]  ;;  %v2568_v58 = vunpack.i.l.bf16 %v3709_v43 }
 0x23b   : > { %v1863_v45 = vadd.f32 %v1862_v35, %v1848_v25  ;;  %v1223_v34 = vmul.f32 %v3594_v50, %v1221_v7  ;;  %v3769_v7 = vld [vmem:[#allocation6 + $0xd0] sm:$0xff] }
 0x23d   : > { %v3727_v60 = vadd.f32 %v1871_v13, %v1863_v45  ;;  %v1224_v32 = vadd.f32 %v1223_v34, %v1215_v10  ;;  %v1539_v53 = vpop.permute.xlu0 %1538  ;;  %v2587_v61 = vpop.permute.xlu1 %2586  ;;  %v2543_v10 = vunpack.i.l.bf16 %v4004_v39  ;;  %v936_v13 = vsel %vm755_vm8, %v933_v63, %v2529_v20  ;;  %v4005_v45 = vld [vmem:[#allocation29_spill] sm:$0xff] }
 0x23e   : > { %v1540_v14 = vsel %vm339_vm1, %v2524_v31, %v1539_v53  ;;  %v1880_v53 = vmul.f32 %v1878_v42, %v3594_v50 }
 0x23f   : > { %v1542_v62 = vmul.f32 %v3998_v46, %v1540_v14  ;;  %v1230_v48 = vsel %vm706_vm4, %v2543_v10, %v3661_v17  ;;  %v2544_v17 = vunpack.i.h.bf16 %v4004_v39 }
 0x240   : > { %v1232_v34 = vmul.f32 %v1230_v48, %v4005_v45 }
 0x241   : > { %v1543_v36 = vadd.f32 %v1542_v62, %v1534_v21  ;;  %v1548_v19 = vpop.permute.xlu0 %1547  ;;  %v2592_v25 = vpop.permute.xlu1 %2591  ;;  %v2589_v62 = vunpack.i.h.bf16 %v2587_v61  ;;  %v1558_v39 = vsel %vm706_vm4, %v2544_v17, %v3695_v52 }
 0x242   : > { %v1549_v3 = vsel %vm695_vm3, %v2534_v27, %v1548_v19  ;;  %v2588_v27 = vunpack.i.l.bf16 %v2587_v61  ;;  %v1233_v19 = vadd.f32 %v1232_v34, %v1224_v32  ;;  %v2583_v32 = vunpack.i.l.bf16 %v3755_v54  ;;  %v4006_v61 = vld [vmem:[#allocation14_spill] sm:$0xff] }
 0x243   : > { %v1551_v38 = vmul.f32 %v3594_v50, %v1549_v3  ;;  %v2594_v0 = vunpack.i.h.bf16 %v2592_v25  ;;  %v1560_v52 = vmul.f32 %v1558_v39, %v4005_v45  ;;  %v2138_v39 = vld [vmem:[%s2940_s15 + $0x10] sm:$0xff] }
 0x245   : > { %v3742_v33 = vadd.f32 %v1551_v38, %v1543_v36  ;;  %v903_v21 = vpop.permute.xlu0 %902  ;;  %v938_v36 = vmul.f32 %v936_v13, %v3769_v7  ;;  %v2597_v44 = vpop.permute.xlu1 %2596  ;;  %v4007_v13 = vld [vmem:[#allocation24_spill] sm:$0xff] }
 0x246   : > { %v906_v9 = vsel %vm722_vm5, %v903_v21, %v2499_v1 }
 0x247   : > { %v908_v4 = vmul.f32 %v906_v9, %v3740_v5 }
 0x249   : > { %v909_v59 = vadd.f32 %v908_v4, %v898_v12  ;;  %v3753_v26 = vpop.permute.xlu0 %2556  ;;  %v1909_v12 = vsel %vm733_vm6, %v2588_v27, %v2589_v62  ;;  %v2593_v4 = vunpack.i.l.bf16 %v2592_v25 }
 0x24a   : > { %v2558_v49 = vunpack.i.l.bf16 %v3753_v26 }
 0x24b   : > { %v919_v37 = vadd.f32 %v918_v6, %v909_v59  ;;  %v1236_v59 = vadd.f32 %v1235_v57, %v1233_v19  ;;  %v1918_v20 = vsel %vm744_vm7, %v2593_v4, %v2594_v0  ;;  %v4008_v0 = vld [vmem:[#allocation13_spill] sm:$0xff] }
 0x24c   : > { %v1243_v14 = vsel %vm722_vm5, %v3681_v30, %v2558_v49  ;;  %v1881_v30 = vadd.f32 %v1880_v53, %v3727_v60  ;;  %v1911_v49 = vmul.f32 %v1909_v12, %v3746_v56  ;;  %v1024_v12 = vld [vmem:[%s2940_s15 + $0x8] sm:$0xff] }
 0x24d   : > { %v2562_v46 = vpop.permute.xlu0 %2561  ;;  %v1245_v24 = vmul.f32 %v1243_v14, %v3740_v5 }
 0x24e   : > { %v2564_v28 = vunpack.i.h.bf16 %v2562_v46  ;;  %v2563_v8 = vunpack.i.l.bf16 %v2562_v46 }
 0x24f   : > { %v1246_v10 = vadd.f32 %v1245_v24, %v1236_v59  ;;  %v4009_v59 = vld [vmem:[#allocation12_spill] sm:$0xff] }
 0x250   : > { %v1887_v41 = vsel %vm706_vm4, %v2563_v8, %v2564_v28  ;;  %v2559_v8 = vunpack.i.h.bf16 %v3753_v26 }
 0x251   : > { %v1249_v51 = vpop.permute.xlu0 %1248  ;;  %v1889_v3 = vmul.f32 %v1887_v41, %v4005_v45  ;;  %v1561_v45 = vadd.f32 %v1560_v52, %v3742_v33 }
 0x252   : > { %v1252_v63 = vsel %vm733_vm6, %v1249_v51, %v2568_v58  ;;  %v2599_v51 = vunpack.i.h.bf16 %v2597_v44  ;;  %v1571_v53 = vsel %vm722_vm5, %v3730_v40, %v2559_v8 }
 0x253   : > { %v1890_v6 = vadd.f32 %v1889_v3, %v1881_v30  ;;  %v1573_v3 = vmul.f32 %v1571_v53, %v3740_v5  ;;  %v2144_v53 = vld [vmem:[%s2940_s15 + $0x20] sm:$0xff] }
 0x255   : > { %v923_v35 = vpop.permute.xlu0 %922  ;;  %v1893_v42 = vadd.f32 %v1892_v55, %v1890_v6 }
 0x256   : > { %v926_v22 = vsel %vm744_vm7, %v923_v35, %v2519_v16 }
 0x257   : > { %v928_v31 = vmul.f32 %v926_v22, %v3765_v47  ;;  %v1920_v22 = vmul.f32 %v1918_v20, %v3765_v47  ;;  %v2151_v20 = vld [vmem:[%s2940_s15 + $0x38] sm:$0xff] }
 0x259   : > { %v929_v38 = vadd.f32 %v928_v31, %v919_v37  ;;  %v3782_v1 = vpop.permute.xlu0 %2571  ;;  %v1254_v37 = vmul.f32 %v1252_v63, %v3746_v56  ;;  %v2569_v31 = vunpack.i.h.bf16 %v3709_v43 }
 0x25a   : > { %v2573_v50 = vunpack.i.l.bf16 %v3782_v1  ;;  %v2574_v63 = vunpack.i.h.bf16 %v3782_v1 }
 0x25b   : > { %v939_v21 = vadd.f32 %v938_v36, %v929_v38  ;;  %v1255_v48 = vadd.f32 %v1254_v37, %v1246_v10  ;;  %v1563_v38 = vmul.f32 %v3735_v23, %v3246_v11  ;;  %v2584_v23 = vunpack.i.h.bf16 %v3755_v54 }
 0x25c   : > { %v1261_v9 = vsel %vm744_vm7, %v3720_v18, %v2573_v50  ;;  %v2598_v18 = vunpack.i.l.bf16 %v2597_v44 }
 0x25d   : > { %v2577_v46 = vpop.permute.xlu0 %2576  ;;  %v940_v60 = vadd.f32 %v939_v21, %v4006_v61  ;;  %v1263_v28 = vmul.f32 %v1261_v9, %v3765_v47  ;;  %v1564_v40 = vadd.f32 %v1563_v38, %v1561_v45 }
 0x25e   : > { %v2579_v2 = vunpack.i.h.bf16 %v2577_v46  ;;  %v2578_v15 = vunpack.i.l.bf16 %v2577_v46  ;;  %v1927_v26 = vsel %vm755_vm8, %v2598_v18, %v2599_v51 }
 0x25f   : > { %2213 = vmatprep.subr.mxu0 %v940_v60  ;;  %v1264_v17 = vadd.f32 %v1263_v28, %v1255_v48  ;;  %v1929_v62 = vmul.f32 %v1927_v26, %v3769_v7  ;;  %v1574_v24 = vadd.f32 %v1573_v3, %v1564_v40 }
 0x260   : > { %v1900_v16 = vsel %vm722_vm5, %v2578_v15, %v2579_v2  ;;  %2214 = vmatpush3.msra.mxu0 %v940_v60 }
 0x261   : > { %v1902_v35 = vmul.f32 %v1900_v16, %v3740_v5  ;;  %v1267_v25 = vpop.permute.xlu0 %1266  ;;  %2216 = vmatmul.mubr.msk.f32.vlgmr.msra.gmra.mrb[4].mxu0 %vm941_vm9, %v3800_v29 }
 0x262   : > { %v1270_v58 = vsel %vm755_vm8, %v1267_v25, %v2583_v32  ;;  %2225 = vmatprep.mubr.msk.f32.mxu0 %vm941_vm9, %v4007_v13 }
 0x263   : > { %v1903_v41 = vadd.f32 %v1902_v35, %v1893_v42  ;;  %v1272_v34 = vmul.f32 %v1270_v58, %v3769_v7  ;;  %v2150_v35 = vld [vmem:[%s2940_s15 + $0x30] sm:$0xff] }
 0x265   : > { %v1273_v14 = vadd.f32 %v1272_v34, %v1264_v17  ;;  %v1577_v27 = vpop.permute.xlu0 %1576  ;;  %v1912_v36 = vadd.f32 %v1911_v49, %v1903_v41  ;;  %v2145_v17 = vld [vmem:[%s2940_s15 + $0x28] sm:$0xff] }
 0x266   : > { %v1580_v19 = vsel %vm733_vm6, %v1577_v27, %v2569_v31 }
 0x267   : > { %v1274_v57 = vadd.f32 %v1273_v14, %v4006_v61  ;;  %v1921_v43 = vadd.f32 %v1920_v22, %v1912_v36  ;;  %v1582_v33 = vmul.f32 %v1580_v19, %v3746_v56 }
 0x269   : > { %v1586_v50 = vpop.permute.xlu0 %1585  ;;  %2218 = vmatprep.subr.mxu1 %v1274_v57  ;;  %v1930_v55 = vadd.f32 %v1929_v62, %v1921_v43  ;;  %v1583_v56 = vadd.f32 %v1582_v33, %v1574_v24 }
 0x26a   : > { %v1589_v30 = vsel %vm744_vm7, %v1586_v50, %v2574_v63  ;;  %2219 = vmatpush3.msra.mxu1 %v1274_v57 }
 0x26b   : > { %v1591_v5 = vmul.f32 %v1589_v30, %v3765_v47  ;;  %2221 = vmatmul.mubr.msk.f32.vlgmr.msra.gmra.mrb[4].mxu1 %vm941_vm9, %v3800_v29  ;;  %v1931_v11 = vadd.f32 %v1930_v55, %v4006_v61 }
 0x26c   : > { %2230 = vmatprep.mubr.msk.f32.mxu1 %vm941_vm9, %v4007_v13 }
 0x26d   : > { %v1595_v1 = vpop.permute.xlu0 %1594  ;;  %2228 = vmatprep.subr.mxu1 %v1931_v11  ;;  %v1592_v21 = vadd.f32 %v1591_v5, %v1583_v56 }
 0x26e   : > { %v1598_v32 = vsel %vm755_vm8, %v1595_v1, %v2584_v23  ;;  %2229 = vmatpush3.msra.mxu1 %v1931_v11 }
 0x26f   : > { %v1600_v47 = vmul.f32 %v1598_v32, %v3769_v7  ;;  %2231 = vmatmul.mubr.msk.f32.vlgmr.msra.gmra.mrb[6].mxu1 %vm941_vm9, %v3800_v29  ;;  %v1023_v7 = vld [vmem:[%s2940_s15] sm:$0xff] }
 0x271   : > { %v1601_v44 = vadd.f32 %v1600_v47, %v1592_v21 }
 0x273   : > { %v1602_v54 = vadd.f32 %v1601_v44, %v4006_v61 }
 0x275   : > { %2223 = vmatprep.subr.mxu0 %v1602_v54 }
 0x276   : > { %2224 = vmatpush3.msra.mxu0 %v1602_v54 }
 0x277   : > { %2226 = vmatmul.mubr.msk.f32.vlgmr.msra.gmra.mrb[6].mxu0 %vm941_vm9, %v3800_v29  ;;  %v2139_v29 = vld [vmem:[%s2940_s15 + $0x18] sm:$0xff]  ;;  %s2017_s15 = scalar_lea.sflag [#allocation5], %s2934_s22 }
 0x334   : > { %v2217_v9 = vpop.f32.mrb[4].mxu0 }
 0x335   : > { %v1020_v4 = vadd.f32 %v2217_v9, %v4008_v0  ;;  %v1014_v6 = vpop.f32.mrb[5].mxu0 }
 0x336   : > { %v1015_v37 = vadd.f32 %v1014_v6, %v4009_v59 }
 0x337   : > { %v1026_v46 = vadd.f32 %v1024_v12, %v1020_v4 }
 0x338   : > { %v1025_v60 = vadd.f32 %v1023_v7, %v1015_v37 }
 0x339   : > { %v1028_v2 = vmax.f32 %v1026_v46, 0.0 }
 0x33a   : > { %v1027_v61 = vmax.f32 %v1025_v60, 0.0 }
 0x33b   : > { %1030 = vst [vmem:[%s3852_s10 + $0x8] sm:$0xff] %v1028_v2 }
 0x33c   : > { %1029 = vst [vmem:[%s3852_s10] sm:$0xff] %v1027_v61 }
 0x33e   : > { %v2222_v15 = vpop.f32.mrb[4].mxu1 }
 0x33f   : > { %v1347_v51 = vadd.f32 %v2222_v15, %v4008_v0  ;;  %v1341_v18 = vpop.f32.mrb[5].mxu1 }
 0x340   : > { %v1342_v10 = vadd.f32 %v1341_v18, %v4009_v59 }
 0x341   : > { %v1353_v28 = vadd.f32 %v2139_v29, %v1347_v51 }
 0x342   : > { %v1352_v8 = vadd.f32 %v2138_v39, %v1342_v10  ;;  %v2232_v16 = vpop.f32.mrb[6].mxu1 }
 0x343   : > { %v1355_v48 = vmax.f32 %v1353_v28, 0.0  ;;  %v2004_v49 = vadd.f32 %v2232_v16, %v4008_v0  ;;  %v1998_v42 = vpop.f32.mrb[7].mxu1 }
 0x344   : > { %v1354_v25 = vmax.f32 %v1352_v8, 0.0  ;;  %v1999_v52 = vadd.f32 %v1998_v42, %v4009_v59 }
 0x345   : > { %2141 = vst [vmem:[%s3852_s10 + $0x18] sm:$0xff] %v1355_v48  ;;  %v2010_v58 = vadd.f32 %v2151_v20, %v2004_v49 }
 0x346   : > { %2140 = vst [vmem:[%s3852_s10 + $0x10] sm:$0xff] %v1354_v25  ;;  %v2009_v26 = vadd.f32 %v2150_v35, %v1999_v52 }
 0x347   : > { %v2012_v13 = vmax.f32 %v2010_v58, 0.0 }
 0x348   : > { %v2011_v41 = vmax.f32 %v2009_v26, 0.0 }
 0x349   : > { %2153 = vst [vmem:[%s3852_s10 + $0x38] sm:$0xff] %v2012_v13 }
 0x34a   : > { %2152 = vst [vmem:[%s3852_s10 + $0x30] sm:$0xff] %v2011_v41  ;;  %v2227_v22 = vpop.f32.mrb[6].mxu0 }
 0x34b   : > { %v1675_v34 = vadd.f32 %v2227_v22, %v4008_v0  ;;  %v1669_v31 = vpop.f32.mrb[7].mxu0 }
 0x34c   : > { %v1670_v45 = vadd.f32 %v1669_v31, %v4009_v59 }
 0x34d   : > { %v1681_v14 = vadd.f32 %v2145_v17, %v1675_v34 }
 0x34e   : > { %v1680_v62 = vadd.f32 %v2144_v53, %v1670_v45 }
 0x34f   : > { %v1683_v27 = vmax.f32 %v1681_v14, 0.0 }
 0x350   : > { %v1682_v36 = vmax.f32 %v1680_v62, 0.0 }
 0x351   : > { %2147 = vst [vmem:[%s3852_s10 + $0x28] sm:$0xff] %v1683_v27 }
 0x352   : > { %2146 = vst [vmem:[%s3852_s10 + $0x20] sm:$0xff] %v1682_v36 }
 0x353   : > { %2671 = shalt.err (!%p2668_p7)
}
 0x354   : > { %s2672_s9 = scalar_lea.hbm %s3879_s20, 1024  ;;  %s2676_s10 = scalar_lea.hbm %s3932_s7, 2048 }
 0x355   : > { %p2673_p9 = scmp.ne.s32.totalorder %s3879_s20, %s2672_s9  ;;  %p2677_p5 = scmp.lt.u32.totalorder %s3879_s20, %s3932_s7 }
 0x356   : > { %p2678_p11 = scmp.lt.u32.totalorder %s2676_s10, %s2672_s9  ;;  %p2680_p4 = scmp.lt.u32.totalorder %s2672_s9, %s3879_s20 }
 0x357   : > { %p2674_p1 = pnand %p2673_p9, %p2883_p12 }
 0x358   : > { %p2679_p2 = por %p2678_p11, %p2677_p5 }
 0x359   : > { %p2675_p0 = pneg %p2674_p1 }
 0x35a   : > { %p2681_p6 = por %p2680_p4, %p2679_p2 }
 0x35c   : > { %p2682_p8 = pnand %p2681_p6, %p2675_p0 }
 0x35e   : > { %2685 = shalt.err (!%p2682_p8)
}
 0x35f   : > { %s2747_s17 = smov 128   ;;  %s2748_s21 = smov 8  }
 0x360   : > { %2251 = dma.vmem_to_hbm [thread:$0]  (%p2883_p12), %s3874_s11, 1024, %s3879_s20, %s2017_s15, %s2747_s17, %s2747_s17, %s2748_s21  }
 0x361 PF: > { %s2045_s28 = sand.u32 1, %s2716_s24   ;;  %p4010_p10 = scmp.ne.s32.totalorder %s3962_s8, 0 }
 0x362   : > { %p4011_p13 = scmp.ge.s32.totalorder %s2728_s27, 2  ;;  %s2046_s23 = scalar_lea.sflag [#allocation5], %s2045_s28 }
 0x364   : > { %p2262_p3 = pnand %p4011_p13, %p4010_p10 }
 0x366   : > { %2711 = dma.done.wait (!%p2262_p3), %s2046_s23, 1024  }
 0x367   : > { %2713 = vsyncadd (!%p2262_p3), %s2046_s23, 4294966272  ;;  %p21_p7 = scmp.ge.s32.totalorder %s2845_s13, 4   ;;  %s4012_s24 = smov %s2720_s25 }
 0x368   : > { %s4013_s25 = smov %s2724_s26  ;;  %s4014_s26 = smov %s2879_s18 }
 0x369   : > { %s4015_s27 = smov %s2845_s13  ;;  %23 = sbr.rel (!%p21_p7) target bundleno = 6 (0x6), region = 134 }
 0x370   :  { %2051 = vsyncpa [#allocation4], 1 }
 0x371   :  { %2053 = vsyncpa [#allocation4 + $0x1], 1 }
 0x372   :  { %2054 = vsyncpa [#allocation7], 1 }
 0x373   :  { %2055 = vsyncpa [#allocation5], 1 }
 0x374   :  { %2057 = vsyncpa [#allocation5 + $0x1], 1 }

</bundles_post_ra>
